<compile_context>
chip_gen: v7x
topology: tpu7x:2x2x1
jax: 0.10.0
libtpu: 0.0.40
codegen_flags: <defaults>
</compile_context>

<pallas_src>
import functools

import jax
import jax.numpy as jnp
from jax import lax
from jax.experimental import pallas as pl
from jax.experimental.pallas import tpu as pltpu

OUT_CHANNELS = 128
IN_CHANNELS_LIST = (64, 128, 256, 512)  # scaled-down analogue of [256,512,1024,2048]
BN_EPS = 1e-5
ROW_CHUNK = 128                         # internal row chunk of the 3x3 stage


def _round_up(x, m):
    return (x + m - 1) // m * m


@functools.lru_cache(maxsize=1)
def _vmem_limit_bytes():
    # Generation-aware scoped-VMEM budget: ~3/4 of physical (96 MiB on the
    # 128 MiB v5e/v6e, 48 MiB on the 64 MiB v7x); safe fallback if unavailable.
    cap = 64 * 1024 * 1024
    try:
        cap = int(getattr(pltpu.get_tpu_info(), "vmem_capacity_bytes", cap))
    except Exception:
        pass
    return max(32 * 1024 * 1024, (cap * 3) // 4)


# ----------------------------------------------------------------------------
# Fused per-level kernel: lateral 1x1 conv (+BN shift, +top-down add) -> VMEM
# scratch -> 3x3 conv (+BN shift) with K-stacked taps; optional pool output.
# ----------------------------------------------------------------------------
def _fpn_level_kernel(*refs, n, h, w, pad, tq, has_td, emit_inner, emit_pool):
    it = iter(refs)
    x_ref = next(it)         # (M, C_in)        f32
    wlat_ref = next(it)      # (C_in, OUT)      bf16 (BN scale folded)
    blat_ref = next(it)      # (1, OUT)         f32
    wlyr_ref = next(it)      # (3, 3*OUT, OUT)  bf16, dx-major / dy-stacked K
    blyr_ref = next(it)      # (1, OUT)         f32
    td_ref = next(it) if has_td else None      # (M, OUT) f32
    inner_ref = next(it) if emit_inner else None
    out_ref = next(it)       # (M, OUT)         f32
    pool_ref = next(it) if emit_pool else None
    pad_ref = next(it)       # (M + 2*pad, OUT) f32 VMEM scratch

    m_total = n * h * w

    # ---- Stage 1: lateral 1x1 conv (bf16 MXU) + BN shift + fused top-down add.
    inner = jnp.dot(x_ref[...].astype(jnp.bfloat16), wlat_ref[...],
                    preferred_element_type=jnp.float32)
    inner = inner + blat_ref[...]
    if has_td:
        inner = inner + td_ref[...]
    if emit_inner:
        inner_ref[...] = inner           # needed by the next level's upsample

    # ---- Stage 2: stash inner in a zero-haloed VMEM scratch (no HBM pad, no
    #      HBM round-trip; the halo zeros are the dy zero padding).
    pad_ref[0:pad, :] = jnp.zeros((pad, OUT_CHANNELS), jnp.float32)
    pad_ref[pad + m_total:, :] = jnp.zeros((pad, OUT_CHANNELS), jnp.float32)
    pad_ref[pad:pad + m_total, :] = inner

    # ---- Stage 3: 3x3 conv; taps stacked along K -> 3 MXU dots per row chunk.
    for q0 in range(0, m_total, tq):
        row = q0 + lax.broadcasted_iota(jnp.int32, (tq, 1), 0)
        ww = row % w
        hh = (row // w) % h if n > 1 else None
        acc = jnp.zeros((tq, OUT_CHANNELS), jnp.float32)
        for dx in (-1, 0, 1):
            slabs = []
            for dy in (-1, 0, 1):
                off = pad + q0 + dy * w + dx
                s = pad_ref[off:off + tq, :]
                if n > 1:
                    # Only needed for batch > 1: the flat-row halo handles the
                    # image top/bottom, not boundaries between batch images.
                    ok = (hh + dy >= 0) & (hh + dy < h)
                    s = jnp.where(ok, s, jnp.zeros_like(s))
                slabs.append(s)
            xk = jnp.concatenate(slabs, axis=1)          # (tq, 3*OUT) f32
            # Left/right image-edge masks (f32 select, v5e-native), then one
            # bf16 cast per dx group feeding the MXU.
            if dx == -1:
                xk = jnp.where(ww >= 1, xk, jnp.zeros_like(xk))
            elif dx == 1:
                xk = jnp.where(ww <= w - 2, xk, jnp.zeros_like(xk))
            acc = acc + jnp.dot(xk.astype(jnp.bfloat16), wlyr_ref[dx + 1],
                                preferred_element_type=jnp.float32)
        out_ref[q0:q0 + tq, :] = acc + blyr_ref[...]

    # ---- Stage 4 (coarsest level only): LastLevelMaxPool == max_pool2d(k=1,s=2)
    #      i.e. a stride-2 spatial subsample of this level's output.
    if emit_pool:
        rows = []
        for b in range(n):
            for qh in range(0, h, 2):
                for qw in range(0, w, 2):
                    m = (b * h + qh) * w + qw
                    rows.append(out_ref[m:m + 1, :])
        pool_ref[...] = jnp.concatenate(rows, axis=0)


def _fpn_level_call(x_rows, p_inner, p_layer, td, *, n, h, w,
                    emit_inner, emit_pool):
    """x_rows: (N*H*W, C_in) f32 rows.  Returns ([inner], out, [pool]) flats."""
    m_total, c_in = x_rows.shape
    assert m_total == n * h * w
    pad = _round_up(w + 1, 8)                   # flat-row halo, sublane aligned
    tq = min(m_total, ROW_CHUNK)
    assert m_total % tq == 0

    args = [x_rows, p_inner["w"], p_inner["shift"], p_layer["w"], p_layer["shift"]]
    if td is not None:
        args.append(td)

    out_shapes = []
    if emit_inner:
        out_shapes.append(jax.ShapeDtypeStruct((m_total, OUT_CHANNELS), jnp.float32))
    out_shapes.append(jax.ShapeDtypeStruct((m_total, OUT_CHANNELS), jnp.float32))
    if emit_pool:
        out_shapes.append(jax.ShapeDtypeStruct(
            (n * (h // 2) * (w // 2), OUT_CHANNELS), jnp.float32))

    flops = (2 * m_total * c_in * OUT_CHANNELS
             + 2 * m_total * 9 * OUT_CHANNELS * OUT_CHANNELS)
    bytes_accessed = (x_rows.size * 4 + p_inner["w"].size * 2 + p_layer["w"].size * 2
                      + 2 * OUT_CHANNELS * 4
                      + (td.size * 4 if td is not None else 0)
                      + sum(s.shape[0] * s.shape[1] * 4 for s in out_shapes))

    kernel = functools.partial(
        _fpn_level_kernel, n=n, h=h, w=w, pad=pad, tq=tq,
        has_td=td is not None, emit_inner=emit_inner, emit_pool=emit_pool)

    # Whole level is a single grid step (full-M tile): every operand fits in
    # VMEM at these sizes, and on single-TC chips extra grid steps are pure
    # pipeline overhead.  Operands use the default whole-array VMEM blocks.
    return pl.pallas_call(
        kernel,
        out_shape=tuple(out_shapes),
        scratch_shapes=[pltpu.VMEM((m_total + 2 * pad, OUT_CHANNELS), jnp.float32)],
        compiler_params=pltpu.CompilerParams(vmem_limit_bytes=_vmem_limit_bytes()),
        cost_estimate=pl.CostEstimate(flops=flops, transcendentals=0,
                                      bytes_accessed=bytes_accessed),
    )(*args)


# ----------------------------------------------------------------------------
# Glue (tiny XLA ops): nearest upsample (reshape+broadcast), parameters
# ----------------------------------------------------------------------------
def _upsample_nearest(x_nhwc, out_h, out_w):
    n, h, w, c = x_nhwc.shape
    if out_h % h == 0 and out_w % w == 0:       # integer scale: no gather
        fh, fw = out_h // h, out_w // w
        x = jnp.broadcast_to(x_nhwc[:, :, None, :, None, :], (n, h, fh, w, fw, c))
        return x.reshape(n, out_h, out_w, c)
    rows = (jnp.arange(out_h) * h) // out_h     # generic nearest fallback
    cols = (jnp.arange(out_w) * w) // out_w
    return x_nhwc[:, rows][:, :, cols]


def _bn_affine(key, c):
    k1, k2, k3, k4 = jax.random.split(key, 4)
    gamma = jax.random.uniform(k1, (c,), jnp.float32, 0.5, 1.5)
    beta = jax.random.normal(k2, (c,), jnp.float32) * 0.1
    mean = jax.random.normal(k3, (c,), jnp.float32) * 0.1
    var = jax.random.uniform(k4, (c,), jnp.float32, 0.5, 1.5)
    scale = gamma * jax.lax.rsqrt(var + BN_EPS)
    shift = beta - mean * scale
    return scale.reshape(1, c), shift.reshape(1, c)


def init_fpn_params(key):
    # Deterministic synthetic parameters (no checkpoint); BN scale folded into
    # the bf16 weights; 3x3 weights pre-arranged to the K-stacked layout.
    params = {"inner": [], "layer": []}
    for cin in IN_CHANNELS_LIST:
        key, kw, kb = jax.random.split(key, 3)
        wi = jax.random.normal(kw, (cin, OUT_CHANNELS), jnp.float32) / jnp.sqrt(cin * 1.0)
        scale, shift = _bn_affine(kb, OUT_CHANNELS)
        params["inner"].append({"w": (wi * scale).astype(jnp.bfloat16), "shift": shift})
    for _ in IN_CHANNELS_LIST:
        key, kw, kb = jax.random.split(key, 3)
        w9 = jax.random.normal(kw, (9, OUT_CHANNELS, OUT_CHANNELS),
                               jnp.float32) / jnp.sqrt(9.0 * OUT_CHANNELS)
        scale, shift = _bn_affine(kb, OUT_CHANNELS)
        w9 = (w9 * scale).astype(jnp.bfloat16)       # fold BN scale per out chan
        # (9[tap=ky*3+kx], C, OUT) -> (kx, ky*C:(ky+1)*C, OUT) K-stacked layout
        wst = w9.reshape(3, 3, OUT_CHANNELS, OUT_CHANNELS).transpose(1, 0, 2, 3)
        wst = wst.reshape(3, 3 * OUT_CHANNELS, OUT_CHANNELS)
        params["layer"].append({"w": wst, "shift": shift})
    return params


# ----------------------------------------------------------------------------
# FPN forward (mirrors torchvision FeaturePyramidNetwork.forward)
# ----------------------------------------------------------------------------
def fpn_forward(feat0, feat1, feat2, params):
    feats = (feat0, feat1, feat2)
    shapes = [f.shape for f in feats]                       # (N, C, H, W)
    block_ids = (0, 1, len(IN_CHANNELS_LIST) - 1)           # idx=-1 wraps to 3
    # NCHW -> (N*H*W, C) rows (lane dim = channels).
    # TODO(synk): fold this input layout change into the kernel (transposed-LHS
    # matmul) to drop the remaining XLA transposes.
    rows = [jnp.transpose(f, (0, 2, 3, 1)).reshape(-1, f.shape[1]) for f in feats]

    def level(lvl, td, emit_inner, emit_pool):
        nb, _, hb, wb = shapes[lvl]
        return _fpn_level_call(rows[lvl],
                               params["inner"][block_ids[lvl]],
                               params["layer"][block_ids[lvl]],
                               td, n=nb, h=hb, w=wb,
                               emit_inner=emit_inner, emit_pool=emit_pool)

    n2, _, h2, w2 = shapes[2]
    n1, _, h1, w1 = shapes[1]
    n0, _, h0, w0 = shapes[0]

    # Coarsest level first (also emits the LastLevelMaxPool output in-kernel).
    inner2, out2, pool = level(2, None, emit_inner=True, emit_pool=True)
    td1 = _upsample_nearest(inner2.reshape(n2, h2, w2, OUT_CHANNELS), h1, w1)
    inner1, out1 = level(1, td1.reshape(-1, OUT_CHANNELS),
                         emit_inner=True, emit_pool=False)
    td0 = _upsample_nearest(inner1.reshape(n1, h1, w1, OUT_CHANNELS), h0, w0)
    (out0,) = level(0, td0.reshape(-1, OUT_CHANNELS),
                    emit_inner=False, emit_pool=False)

    def to_nchw(flat, nb, hb, wb):
        return jnp.transpose(flat.reshape(nb, hb, wb, OUT_CHANNELS), (0, 3, 1, 2))

    return {
        "feat0": to_nchw(out0, n0, h0, w0),
        "feat1": to_nchw(out1, n1, h1, w1),
        "feat2": to_nchw(out2, n2, h2, w2),
        "pool": to_nchw(pool, n2, h2 // 2, w2 // 2),
    }


if __name__ == "__main__":
    key = jax.random.PRNGKey(0)
    kp, k0, k1, k2 = jax.random.split(key, 4)
    params = init_fpn_params(kp)

    feat0 = jax.random.normal(k0, (1, IN_CHANNELS_LIST[0], 16, 16), jnp.float32)
    feat1 = jax.random.normal(k1, (1, IN_CHANNELS_LIST[1], 8, 8), jnp.float32)
    feat2 = jax.random.normal(k2, (1, IN_CHANNELS_LIST[3], 4, 4), jnp.float32)

    fwd = jax.jit(fpn_forward)
    out = fwd(feat0, feat1, feat2, params)
    jax.block_until_ready(out)

    assert out["feat0"].shape == (1, OUT_CHANNELS, 16, 16)
    assert out["feat1"].shape == (1, OUT_CHANNELS, 8, 8)
    assert out["feat2"].shape == (1, OUT_CHANNELS, 4, 4)
    assert out["pool"].shape == (1, OUT_CHANNELS, 2, 2)
    assert all(bool(jnp.all(jnp.isfinite(v))) for v in out.values())
    print("KERNEL_OK")
</pallas_src>

<mosaic_0001>
module attributes {stable_mosaic.version = 11 : i64} {
  func.func @_fpn_level_kernel(%arg0: memref<16x512xf32, #tpu.memory_space<vmem>>, %arg1: memref<512x128xbf16, #tpu.memory_space<vmem>>, %arg2: memref<1x128xf32, #tpu.memory_space<vmem>>, %arg3: memref<3x384x128xbf16, #tpu.memory_space<vmem>>, %arg4: memref<1x128xf32, #tpu.memory_space<vmem>>, %arg5: memref<16x128xf32, #tpu.memory_space<vmem>>, %arg6: memref<16x128xf32, #tpu.memory_space<vmem>>, %arg7: memref<4x128xf32, #tpu.memory_space<vmem>>, %arg8: memref<32x128xf32, #tpu.memory_space<vmem>>) attributes {dimension_semantics = [], scalar_prefetch = 0 : i64, scratch_operands = 1 : i64, tpu.core_type = #tpu.core_type<tc>} {
    %c0 = arith.constant 0 : index
    %c0_0 = arith.constant 0 : index
    %0 = vector.load %arg0[%c0, %c0_0] : memref<16x512xf32, #tpu.memory_space<vmem>>, vector<16x512xf32>
    %1 = arith.truncf %0 : vector<16x512xf32> to vector<16x512xbf16>
    %c0_1 = arith.constant 0 : index
    %c0_2 = arith.constant 0 : index
    %2 = vector.load %arg1[%c0_1, %c0_2] : memref<512x128xbf16, #tpu.memory_space<vmem>>, vector<512x128xbf16>
    %cst = arith.constant dense<0.000000e+00> : vector<16x128xf32>
    %3 = tpu.matmul %1, %2, %cst {dimension_numbers = #tpu.dot_dimension_numbers<[1], [0], [0], [1], [0, 0, 1, 1], [], []>} : vector<16x512xbf16>, vector<512x128xbf16>, vector<16x128xf32> -> vector<16x128xf32>
    %c0_3 = arith.constant 0 : index
    %c0_4 = arith.constant 0 : index
    %4 = vector.load %arg2[%c0_3, %c0_4] : memref<1x128xf32, #tpu.memory_space<vmem>>, vector<1x128xf32>
    %5 = vector.broadcast %4 : vector<1x128xf32> to vector<16x128xf32>
    %6 = arith.addf %3, %5 : vector<16x128xf32>
    %c0_5 = arith.constant 0 : index
    %c0_6 = arith.constant 0 : index
    %7 = vector.load %arg5[%c0_5, %c0_6] : memref<16x128xf32, #tpu.memory_space<vmem>>, vector<16x128xf32>
    tpu.vector_store %arg5[%c0_5, %c0_6], %6 {strides = array<i32>} : memref<16x128xf32, #tpu.memory_space<vmem>>, vector<16x128xf32>,
    %cst_7 = arith.constant 0.000000e+00 : f32
    %8 = vector.broadcast %cst_7 : f32 to vector<8x128xf32>
    %c0_8 = arith.constant 0 : index
    %c0_9 = arith.constant 0 : index
    %9 = vector.load %arg8[%c0_8, %c0_9] : memref<32x128xf32, #tpu.memory_space<vmem>>, vector<8x128xf32>
    tpu.vector_store %arg8[%c0_8, %c0_9], %8 {strides = array<i32>} : memref<32x128xf32, #tpu.memory_space<vmem>>, vector<8x128xf32>,
    %cst_10 = arith.constant 0.000000e+00 : f32
    %10 = vector.broadcast %cst_10 : f32 to vector<8x128xf32>
    %c24 = arith.constant 24 : index
    %c0_11 = arith.constant 0 : index
    %11 = vector.load %arg8[%c24, %c0_11] : memref<32x128xf32, #tpu.memory_space<vmem>>, vector<8x128xf32>
    tpu.vector_store %arg8[%c24, %c0_11], %10 {strides = array<i32>} : memref<32x128xf32, #tpu.memory_space<vmem>>, vector<8x128xf32>,
    %c8 = arith.constant 8 : index
    %c0_12 = arith.constant 0 : index
    %12 = vector.load %arg8[%c8, %c0_12] : memref<32x128xf32, #tpu.memory_space<vmem>>, vector<16x128xf32>
    tpu.vector_store %arg8[%c8, %c0_12], %6 {strides = array<i32>} : memref<32x128xf32, #tpu.memory_space<vmem>>, vector<16x128xf32>,
    %13 = tpu.iota {dimensions = array<i32: 0>} : vector<16x1xi32>
    %c0_i32 = arith.constant 0 : i32
    %14 = vector.broadcast %c0_i32 : i32 to vector<16x1xi32>
    %15 = arith.addi %14, %13 : vector<16x1xi32>
    %c4_i32 = arith.constant 4 : i32
    %c0_i32_13 = arith.constant 0 : i32
    %16 = arith.cmpi eq, %c4_i32, %c0_i32_13 : i32
    %c1_i32 = arith.constant 1 : i32
    %17 = arith.select %16, %c1_i32, %c4_i32 : i32
    %18 = vector.broadcast %17 : i32 to vector<16x1xi32>
    %19 = arith.remsi %15, %18 : vector<16x1xi32>
    %c0_i32_14 = arith.constant 0 : i32
    %20 = vector.broadcast %c0_i32_14 : i32 to vector<16x1xi32>
    %21 = arith.cmpi ne, %19, %20 : vector<16x1xi32>
    %c0_i32_15 = arith.constant 0 : i32
    %22 = vector.broadcast %c0_i32_15 : i32 to vector<16x1xi32>
    %23 = arith.cmpi slt, %19, %22 : vector<16x1xi32>
    %c0_i32_16 = arith.constant 0 : i32
    %24 = arith.cmpi slt, %17, %c0_i32_16 : i32
    %25 = vector.broadcast %24 : i1 to vector<16x1xi1>
    %26 = vector.broadcast %25 : vector<16x1xi1> to vector<16x1xi1>
    %27 = arith.xori %23, %26 : vector<16x1xi1>
    %28 = arith.andi %27, %21 : vector<16x1xi1>
    %29 = vector.broadcast %17 : i32 to vector<16x1xi32>
    %30 = arith.addi %19, %29 : vector<16x1xi32>
    %31 = arith.select %28, %30, %19 : vector<16x1xi1>, vector<16x1xi32>
    %cst_17 = arith.constant 0.000000e+00 : f32
    %32 = vector.broadcast %cst_17 : f32 to vector<16x128xf32>
    %c3 = arith.constant 3 : index
    %c0_18 = arith.constant 0 : index
    %33 = vector.load %arg8[%c3, %c0_18] : memref<32x128xf32, #tpu.memory_space<vmem>>, vector<16x128xf32>
    %c7 = arith.constant 7 : index
    %c0_19 = arith.constant 0 : index
    %34 = vector.load %arg8[%c7, %c0_19] : memref<32x128xf32, #tpu.memory_space<vmem>>, vector<16x128xf32>
    %c11 = arith.constant 11 : index
    %c0_20 = arith.constant 0 : index
    %35 = vector.load %arg8[%c11, %c0_20] : memref<32x128xf32, #tpu.memory_space<vmem>>, vector<16x128xf32>
    %36 = tpu.concatenate %33, %34, %35 in 1 : vector<16x128xf32>, vector<16x128xf32>, vector<16x128xf32> -> vector<16x384xf32>
    %c1_i32_21 = arith.constant 1 : i32
    %37 = vector.broadcast %c1_i32_21 : i32 to vector<16x1xi32>
    %38 = arith.cmpi sge, %31, %37 : vector<16x1xi32>
    %cst_22 = arith.constant 0.000000e+00 : f32
    %39 = vector.broadcast %cst_22 : f32 to vector<16x384xf32>
    %40 = vector.shape_cast %38 : vector<16x1xi1> to vector<16x1xi1>
    %41 = vector.broadcast %40 : vector<16x1xi1> to vector<16x384xi1>
    %42 = arith.select %41, %36, %39 : vector<16x384xi1>, vector<16x384xf32>
    %43 = arith.truncf %42 : vector<16x384xf32> to vector<16x384xbf16>
    %c0_23 = arith.constant 0 : index
    %c0_24 = arith.constant 0 : index
    %c0_25 = arith.constant 0 : index
    %44 = vector.load %arg3[%c0_23, %c0_24, %c0_25] : memref<3x384x128xbf16, #tpu.memory_space<vmem>>, vector<1x384x128xbf16>
    %45 = vector.shape_cast %44 : vector<1x384x128xbf16> to vector<384x128xbf16>
    %cst_26 = arith.constant dense<0.000000e+00> : vector<16x128xf32>
    %46 = tpu.matmul %43, %45, %cst_26 {dimension_numbers = #tpu.dot_dimension_numbers<[1], [0], [0], [1], [0, 0, 1, 1], [], []>} : vector<16x384xbf16>, vector<384x128xbf16>, vector<16x128xf32> -> vector<16x128xf32>
    %47 = arith.addf %32, %46 : vector<16x128xf32>
    %c4 = arith.constant 4 : index
    %c0_27 = arith.constant 0 : index
    %48 = vector.load %arg8[%c4, %c0_27] : memref<32x128xf32, #tpu.memory_space<vmem>>, vector<16x128xf32>
    %c8_28 = arith.constant 8 : index
    %c0_29 = arith.constant 0 : index
    %49 = vector.load %arg8[%c8_28, %c0_29] : memref<32x128xf32, #tpu.memory_space<vmem>>, vector<16x128xf32>
    %c12 = arith.constant 12 : index
    %c0_30 = arith.constant 0 : index
    %50 = vector.load %arg8[%c12, %c0_30] : memref<32x128xf32, #tpu.memory_space<vmem>>, vector<16x128xf32>
    %51 = tpu.concatenate %48, %49, %50 in 1 : vector<16x128xf32>, vector<16x128xf32>, vector<16x128xf32> -> vector<16x384xf32>
    %52 = arith.truncf %51 : vector<16x384xf32> to vector<16x384xbf16>
    %c1 = arith.constant 1 : index
    %c0_31 = arith.constant 0 : index
    %c0_32 = arith.constant 0 : index
    %53 = vector.load %arg3[%c1, %c0_31, %c0_32] : memref<3x384x128xbf16, #tpu.memory_space<vmem>>, vector<1x384x128xbf16>
    %54 = vector.shape_cast %53 : vector<1x384x128xbf16> to vector<384x128xbf16>
    %cst_33 = arith.constant dense<0.000000e+00> : vector<16x128xf32>
    %55 = tpu.matmul %52, %54, %cst_33 {dimension_numbers = #tpu.dot_dimension_numbers<[1], [0], [0], [1], [0, 0, 1, 1], [], []>} : vector<16x384xbf16>, vector<384x128xbf16>, vector<16x128xf32> -> vector<16x128xf32>
    %56 = arith.addf %47, %55 : vector<16x128xf32>
    %c5 = arith.constant 5 : index
    %c0_34 = arith.constant 0 : index
    %57 = vector.load %arg8[%c5, %c0_34] : memref<32x128xf32, #tpu.memory_space<vmem>>, vector<16x128xf32>
    %c9 = arith.constant 9 : index
    %c0_35 = arith.constant 0 : index
    %58 = vector.load %arg8[%c9, %c0_35] : memref<32x128xf32, #tpu.memory_space<vmem>>, vector<16x128xf32>
    %c13 = arith.constant 13 : index
    %c0_36 = arith.constant 0 : index
    %59 = vector.load %arg8[%c13, %c0_36] : memref<32x128xf32, #tpu.memory_space<vmem>>, vector<16x128xf32>
    %60 = tpu.concatenate %57, %58, %59 in 1 : vector<16x128xf32>, vector<16x128xf32>, vector<16x128xf32> -> vector<16x384xf32>
    %c2_i32 = arith.constant 2 : i32
    %61 = vector.broadcast %c2_i32 : i32 to vector<16x1xi32>
    %62 = arith.cmpi sle, %31, %61 : vector<16x1xi32>
    %cst_37 = arith.constant 0.000000e+00 : f32
    %63 = vector.broadcast %cst_37 : f32 to vector<16x384xf32>
    %64 = vector.shape_cast %62 : vector<16x1xi1> to vector<16x1xi1>
    %65 = vector.broadcast %64 : vector<16x1xi1> to vector<16x384xi1>
    %66 = arith.select %65, %60, %63 : vector<16x384xi1>, vector<16x384xf32>
    %67 = arith.truncf %66 : vector<16x384xf32> to vector<16x384xbf16>
    %c2 = arith.constant 2 : index
    %c0_38 = arith.constant 0 : index
    %c0_39 = arith.constant 0 : index
    %68 = vector.load %arg3[%c2, %c0_38, %c0_39] : memref<3x384x128xbf16, #tpu.memory_space<vmem>>, vector<1x384x128xbf16>
    %69 = vector.shape_cast %68 : vector<1x384x128xbf16> to vector<384x128xbf16>
    %cst_40 = arith.constant dense<0.000000e+00> : vector<16x128xf32>
    %70 = tpu.matmul %67, %69, %cst_40 {dimension_numbers = #tpu.dot_dimension_numbers<[1], [0], [0], [1], [0, 0, 1, 1], [], []>} : vector<16x384xbf16>, vector<384x128xbf16>, vector<16x128xf32> -> vector<16x128xf32>
    %71 = arith.addf %56, %70 : vector<16x128xf32>
    %c0_41 = arith.constant 0 : index
    %c0_42 = arith.constant 0 : index
    %72 = vector.load %arg4[%c0_41, %c0_42] : memref<1x128xf32, #tpu.memory_space<vmem>>, vector<1x128xf32>
    %73 = vector.broadcast %72 : vector<1x128xf32> to vector<16x128xf32>
    %74 = arith.addf %71, %73 : vector<16x128xf32>
    %c0_43 = arith.constant 0 : index
    %c0_44 = arith.constant 0 : index
    %75 = vector.load %arg6[%c0_43, %c0_44] : memref<16x128xf32, #tpu.memory_space<vmem>>, vector<16x128xf32>
    tpu.vector_store %arg6[%c0_43, %c0_44], %74 {strides = array<i32>} : memref<16x128xf32, #tpu.memory_space<vmem>>, vector<16x128xf32>,
    %c0_45 = arith.constant 0 : index
    %c0_46 = arith.constant 0 : index
    %76 = vector.load %arg6[%c0_45, %c0_46] : memref<16x128xf32, #tpu.memory_space<vmem>>, vector<1x128xf32>
    %c2_47 = arith.constant 2 : index
    %c0_48 = arith.constant 0 : index
    %77 = vector.load %arg6[%c2_47, %c0_48] : memref<16x128xf32, #tpu.memory_space<vmem>>, vector<1x128xf32>
    %c8_49 = arith.constant 8 : index
    %c0_50 = arith.constant 0 : index
    %78 = vector.load %arg6[%c8_49, %c0_50] : memref<16x128xf32, #tpu.memory_space<vmem>>, vector<1x128xf32>
    %c10 = arith.constant 10 : index
    %c0_51 = arith.constant 0 : index
    %79 = vector.load %arg6[%c10, %c0_51] : memref<16x128xf32, #tpu.memory_space<vmem>>, vector<1x128xf32>
    %80 = tpu.concatenate %76, %77, %78, %79 in 0 : vector<1x128xf32>, vector<1x128xf32>, vector<1x128xf32>, vector<1x128xf32> -> vector<4x128xf32>
    %c0_52 = arith.constant 0 : index
    %c0_53 = arith.constant 0 : index
    %81 = vector.load %arg7[%c0_52, %c0_53] : memref<4x128xf32, #tpu.memory_space<vmem>>, vector<4x128xf32>
    tpu.vector_store %arg7[%c0_52, %c0_53], %80 {strides = array<i32>} : memref<4x128xf32, #tpu.memory_space<vmem>>, vector<4x128xf32>,
    return
  }
}

module attributes {stable_mosaic.version = 11 : i64} {
  func.func @_fpn_level_kernel(%arg0: memref<64x128xf32, #tpu.memory_space<vmem>>, %arg1: memref<128x128xbf16, #tpu.memory_space<vmem>>, %arg2: memref<1x128xf32, #tpu.memory_space<vmem>>, %arg3: memref<3x384x128xbf16, #tpu.memory_space<vmem>>, %arg4: memref<1x128xf32, #tpu.memory_space<vmem>>, %arg5: memref<64x128xf32, #tpu.memory_space<vmem>>, %arg6: memref<64x128xf32, #tpu.memory_space<vmem>>, %arg7: memref<64x128xf32, #tpu.memory_space<vmem>>, %arg8: memref<96x128xf32, #tpu.memory_space<vmem>>) attributes {dimension_semantics = [], scalar_prefetch = 0 : i64, scratch_operands = 1 : i64, tpu.core_type = #tpu.core_type<tc>} {
    %c0 = arith.constant 0 : index
    %c0_0 = arith.constant 0 : index
    %0 = vector.load %arg0[%c0, %c0_0] : memref<64x128xf32, #tpu.memory_space<vmem>>, vector<64x128xf32>
    %1 = arith.truncf %0 : vector<64x128xf32> to vector<64x128xbf16>
    %c0_1 = arith.constant 0 : index
    %c0_2 = arith.constant 0 : index
    %2 = vector.load %arg1[%c0_1, %c0_2] : memref<128x128xbf16, #tpu.memory_space<vmem>>, vector<128x128xbf16>
    %cst = arith.constant dense<0.000000e+00> : vector<64x128xf32>
    %3 = tpu.matmul %1, %2, %cst {dimension_numbers = #tpu.dot_dimension_numbers<[1], [0], [0], [1], [0, 0, 1, 1], [], []>} : vector<64x128xbf16>, vector<128x128xbf16>, vector<64x128xf32> -> vector<64x128xf32>
    %c0_3 = arith.constant 0 : index
    %c0_4 = arith.constant 0 : index
    %4 = vector.load %arg2[%c0_3, %c0_4] : memref<1x128xf32, #tpu.memory_space<vmem>>, vector<1x128xf32>
    %5 = vector.broadcast %4 : vector<1x128xf32> to vector<64x128xf32>
    %6 = arith.addf %3, %5 : vector<64x128xf32>
    %c0_5 = arith.constant 0 : index
    %c0_6 = arith.constant 0 : index
    %7 = vector.load %arg5[%c0_5, %c0_6] : memref<64x128xf32, #tpu.memory_space<vmem>>, vector<64x128xf32>
    %8 = arith.addf %6, %7 : vector<64x128xf32>
    %c0_7 = arith.constant 0 : index
    %c0_8 = arith.constant 0 : index
    %9 = vector.load %arg6[%c0_7, %c0_8] : memref<64x128xf32, #tpu.memory_space<vmem>>, vector<64x128xf32>
    tpu.vector_store %arg6[%c0_7, %c0_8], %8 {strides = array<i32>} : memref<64x128xf32, #tpu.memory_space<vmem>>, vector<64x128xf32>,
    %cst_9 = arith.constant 0.000000e+00 : f32
    %10 = vector.broadcast %cst_9 : f32 to vector<16x128xf32>
    %c0_10 = arith.constant 0 : index
    %c0_11 = arith.constant 0 : index
    %11 = vector.load %arg8[%c0_10, %c0_11] : memref<96x128xf32, #tpu.memory_space<vmem>>, vector<16x128xf32>
    tpu.vector_store %arg8[%c0_10, %c0_11], %10 {strides = array<i32>} : memref<96x128xf32, #tpu.memory_space<vmem>>, vector<16x128xf32>,
    %cst_12 = arith.constant 0.000000e+00 : f32
    %12 = vector.broadcast %cst_12 : f32 to vector<16x128xf32>
    %c80 = arith.constant 80 : index
    %c0_13 = arith.constant 0 : index
    %13 = vector.load %arg8[%c80, %c0_13] : memref<96x128xf32, #tpu.memory_space<vmem>>, vector<16x128xf32>
    tpu.vector_store %arg8[%c80, %c0_13], %12 {strides = array<i32>} : memref<96x128xf32, #tpu.memory_space<vmem>>, vector<16x128xf32>,
    %c16 = arith.constant 16 : index
    %c0_14 = arith.constant 0 : index
    %14 = vector.load %arg8[%c16, %c0_14] : memref<96x128xf32, #tpu.memory_space<vmem>>, vector<64x128xf32>
    tpu.vector_store %arg8[%c16, %c0_14], %8 {strides = array<i32>} : memref<96x128xf32, #tpu.memory_space<vmem>>, vector<64x128xf32>,
    %15 = tpu.iota {dimensions = array<i32: 0>} : vector<64x1xi32>
    %c0_i32 = arith.constant 0 : i32
    %16 = vector.broadcast %c0_i32 : i32 to vector<64x1xi32>
    %17 = arith.addi %16, %15 : vector<64x1xi32>
    %c8_i32 = arith.constant 8 : i32
    %c0_i32_15 = arith.constant 0 : i32
    %18 = arith.cmpi eq, %c8_i32, %c0_i32_15 : i32
    %c1_i32 = arith.constant 1 : i32
    %19 = arith.select %18, %c1_i32, %c8_i32 : i32
    %20 = vector.broadcast %19 : i32 to vector<64x1xi32>
    %21 = arith.remsi %17, %20 : vector<64x1xi32>
    %c0_i32_16 = arith.constant 0 : i32
    %22 = vector.broadcast %c0_i32_16 : i32 to vector<64x1xi32>
    %23 = arith.cmpi ne, %21, %22 : vector<64x1xi32>
    %c0_i32_17 = arith.constant 0 : i32
    %24 = vector.broadcast %c0_i32_17 : i32 to vector<64x1xi32>
    %25 = arith.cmpi slt, %21, %24 : vector<64x1xi32>
    %c0_i32_18 = arith.constant 0 : i32
    %26 = arith.cmpi slt, %19, %c0_i32_18 : i32
    %27 = vector.broadcast %26 : i1 to vector<64x1xi1>
    %28 = vector.broadcast %27 : vector<64x1xi1> to vector<64x1xi1>
    %29 = arith.xori %25, %28 : vector<64x1xi1>
    %30 = arith.andi %29, %23 : vector<64x1xi1>
    %31 = vector.broadcast %19 : i32 to vector<64x1xi32>
    %32 = arith.addi %21, %31 : vector<64x1xi32>
    %33 = arith.select %30, %32, %21 : vector<64x1xi1>, vector<64x1xi32>
    %cst_19 = arith.constant 0.000000e+00 : f32
    %34 = vector.broadcast %cst_19 : f32 to vector<64x128xf32>
    %c7 = arith.constant 7 : index
    %c0_20 = arith.constant 0 : index
    %35 = vector.load %arg8[%c7, %c0_20] : memref<96x128xf32, #tpu.memory_space<vmem>>, vector<64x128xf32>
    %c15 = arith.constant 15 : index
    %c0_21 = arith.constant 0 : index
    %36 = vector.load %arg8[%c15, %c0_21] : memref<96x128xf32, #tpu.memory_space<vmem>>, vector<64x128xf32>
    %c23 = arith.constant 23 : index
    %c0_22 = arith.constant 0 : index
    %37 = vector.load %arg8[%c23, %c0_22] : memref<96x128xf32, #tpu.memory_space<vmem>>, vector<64x128xf32>
    %38 = tpu.concatenate %35, %36, %37 in 1 : vector<64x128xf32>, vector<64x128xf32>, vector<64x128xf32> -> vector<64x384xf32>
    %c1_i32_23 = arith.constant 1 : i32
    %39 = vector.broadcast %c1_i32_23 : i32 to vector<64x1xi32>
    %40 = arith.cmpi sge, %33, %39 : vector<64x1xi32>
    %cst_24 = arith.constant 0.000000e+00 : f32
    %41 = vector.broadcast %cst_24 : f32 to vector<64x384xf32>
    %42 = vector.shape_cast %40 : vector<64x1xi1> to vector<64x1xi1>
    %43 = vector.broadcast %42 : vector<64x1xi1> to vector<64x384xi1>
    %44 = arith.select %43, %38, %41 : vector<64x384xi1>, vector<64x384xf32>
    %45 = arith.truncf %44 : vector<64x384xf32> to vector<64x384xbf16>
    %c0_25 = arith.constant 0 : index
    %c0_26 = arith.constant 0 : index
    %c0_27 = arith.constant 0 : index
    %46 = vector.load %arg3[%c0_25, %c0_26, %c0_27] : memref<3x384x128xbf16, #tpu.memory_space<vmem>>, vector<1x384x128xbf16>
    %47 = vector.shape_cast %46 : vector<1x384x128xbf16> to vector<384x128xbf16>
    %cst_28 = arith.constant dense<0.000000e+00> : vector<64x128xf32>
    %48 = tpu.matmul %45, %47, %cst_28 {dimension_numbers = #tpu.dot_dimension_numbers<[1], [0], [0], [1], [0, 0, 1, 1], [], []>} : vector<64x384xbf16>, vector<384x128xbf16>, vector<64x128xf32> -> vector<64x128xf32>
    %49 = arith.addf %34, %48 : vector<64x128xf32>
    %c8 = arith.constant 8 : index
    %c0_29 = arith.constant 0 : index
    %50 = vector.load %arg8[%c8, %c0_29] : memref<96x128xf32, #tpu.memory_space<vmem>>, vector<64x128xf32>
    %c16_30 = arith.constant 16 : index
    %c0_31 = arith.constant 0 : index
    %51 = vector.load %arg8[%c16_30, %c0_31] : memref<96x128xf32, #tpu.memory_space<vmem>>, vector<64x128xf32>
    %c24 = arith.constant 24 : index
    %c0_32 = arith.constant 0 : index
    %52 = vector.load %arg8[%c24, %c0_32] : memref<96x128xf32, #tpu.memory_space<vmem>>, vector<64x128xf32>
    %53 = tpu.concatenate %50, %51, %52 in 1 : vector<64x128xf32>, vector<64x128xf32>, vector<64x128xf32> -> vector<64x384xf32>
    %54 = arith.truncf %53 : vector<64x384xf32> to vector<64x384xbf16>
    %c1 = arith.constant 1 : index
    %c0_33 = arith.constant 0 : index
    %c0_34 = arith.constant 0 : index
    %55 = vector.load %arg3[%c1, %c0_33, %c0_34] : memref<3x384x128xbf16, #tpu.memory_space<vmem>>, vector<1x384x128xbf16>
    %56 = vector.shape_cast %55 : vector<1x384x128xbf16> to vector<384x128xbf16>
    %cst_35 = arith.constant dense<0.000000e+00> : vector<64x128xf32>
    %57 = tpu.matmul %54, %56, %cst_35 {dimension_numbers = #tpu.dot_dimension_numbers<[1], [0], [0], [1], [0, 0, 1, 1], [], []>} : vector<64x384xbf16>, vector<384x128xbf16>, vector<64x128xf32> -> vector<64x128xf32>
    %58 = arith.addf %49, %57 : vector<64x128xf32>
    %c9 = arith.constant 9 : index
    %c0_36 = arith.constant 0 : index
    %59 = vector.load %arg8[%c9, %c0_36] : memref<96x128xf32, #tpu.memory_space<vmem>>, vector<64x128xf32>
    %c17 = arith.constant 17 : index
    %c0_37 = arith.constant 0 : index
    %60 = vector.load %arg8[%c17, %c0_37] : memref<96x128xf32, #tpu.memory_space<vmem>>, vector<64x128xf32>
    %c25 = arith.constant 25 : index
    %c0_38 = arith.constant 0 : index
    %61 = vector.load %arg8[%c25, %c0_38] : memref<96x128xf32, #tpu.memory_space<vmem>>, vector<64x128xf32>
    %62 = tpu.concatenate %59, %60, %61 in 1 : vector<64x128xf32>, vector<64x128xf32>, vector<64x128xf32> -> vector<64x384xf32>
    %c6_i32 = arith.constant 6 : i32
    %63 = vector.broadcast %c6_i32 : i32 to vector<64x1xi32>
    %64 = arith.cmpi sle, %33, %63 : vector<64x1xi32>
    %cst_39 = arith.constant 0.000000e+00 : f32
    %65 = vector.broadcast %cst_39 : f32 to vector<64x384xf32>
    %66 = vector.shape_cast %64 : vector<64x1xi1> to vector<64x1xi1>
    %67 = vector.broadcast %66 : vector<64x1xi1> to vector<64x384xi1>
    %68 = arith.select %67, %62, %65 : vector<64x384xi1>, vector<64x384xf32>
    %69 = arith.truncf %68 : vector<64x384xf32> to vector<64x384xbf16>
    %c2 = arith.constant 2 : index
    %c0_40 = arith.constant 0 : index
    %c0_41 = arith.constant 0 : index
    %70 = vector.load %arg3[%c2, %c0_40, %c0_41] : memref<3x384x128xbf16, #tpu.memory_space<vmem>>, vector<1x384x128xbf16>
    %71 = vector.shape_cast %70 : vector<1x384x128xbf16> to vector<384x128xbf16>
    %cst_42 = arith.constant dense<0.000000e+00> : vector<64x128xf32>
    %72 = tpu.matmul %69, %71, %cst_42 {dimension_numbers = #tpu.dot_dimension_numbers<[1], [0], [0], [1], [0, 0, 1, 1], [], []>} : vector<64x384xbf16>, vector<384x128xbf16>, vector<64x128xf32> -> vector<64x128xf32>
    %73 = arith.addf %58, %72 : vector<64x128xf32>
    %c0_43 = arith.constant 0 : index
    %c0_44 = arith.constant 0 : index
    %74 = vector.load %arg4[%c0_43, %c0_44] : memref<1x128xf32, #tpu.memory_space<vmem>>, vector<1x128xf32>
    %75 = vector.broadcast %74 : vector<1x128xf32> to vector<64x128xf32>
    %76 = arith.addf %73, %75 : vector<64x128xf32>
    %c0_45 = arith.constant 0 : index
    %c0_46 = arith.constant 0 : index
    %77 = vector.load %arg7[%c0_45, %c0_46] : memref<64x128xf32, #tpu.memory_space<vmem>>, vector<64x128xf32>
    tpu.vector_store %arg7[%c0_45, %c0_46], %76 {strides = array<i32>} : memref<64x128xf32, #tpu.memory_space<vmem>>, vector<64x128xf32>,
    return
  }
}

module attributes {stable_mosaic.version = 11 : i64} {
  func.func @_fpn_level_kernel(%arg0: memref<256x64xf32, #tpu.memory_space<vmem>>, %arg1: memref<64x128xbf16, #tpu.memory_space<vmem>>, %arg2: memref<1x128xf32, #tpu.memory_space<vmem>>, %arg3: memref<3x384x128xbf16, #tpu.memory_space<vmem>>, %arg4: memref<1x128xf32, #tpu.memory_space<vmem>>, %arg5: memref<256x128xf32, #tpu.memory_space<vmem>>, %arg6: memref<256x128xf32, #tpu.memory_space<vmem>>, %arg7: memref<304x128xf32, #tpu.memory_space<vmem>>) attributes {dimension_semantics = [], scalar_prefetch = 0 : i64, scratch_operands = 1 : i64, tpu.core_type = #tpu.core_type<tc>} {
    %c0 = arith.constant 0 : index
    %c0_0 = arith.constant 0 : index
    %0 = vector.load %arg0[%c0, %c0_0] : memref<256x64xf32, #tpu.memory_space<vmem>>, vector<256x64xf32>
    %1 = arith.truncf %0 : vector<256x64xf32> to vector<256x64xbf16>
    %c0_1 = arith.constant 0 : index
    %c0_2 = arith.constant 0 : index
    %2 = vector.load %arg1[%c0_1, %c0_2] : memref<64x128xbf16, #tpu.memory_space<vmem>>, vector<64x128xbf16>
    %cst = arith.constant dense<0.000000e+00> : vector<256x128xf32>
    %3 = tpu.matmul %1, %2, %cst {dimension_numbers = #tpu.dot_dimension_numbers<[1], [0], [0], [1], [0, 0, 1, 1], [], []>} : vector<256x64xbf16>, vector<64x128xbf16>, vector<256x128xf32> -> vector<256x128xf32>
    %c0_3 = arith.constant 0 : index
    %c0_4 = arith.constant 0 : index
    %4 = vector.load %arg2[%c0_3, %c0_4] : memref<1x128xf32, #tpu.memory_space<vmem>>, vector<1x128xf32>
    %5 = vector.broadcast %4 : vector<1x128xf32> to vector<256x128xf32>
    %6 = arith.addf %3, %5 : vector<256x128xf32>
    %c0_5 = arith.constant 0 : index
    %c0_6 = arith.constant 0 : index
    %7 = vector.load %arg5[%c0_5, %c0_6] : memref<256x128xf32, #tpu.memory_space<vmem>>, vector<256x128xf32>
    %8 = arith.addf %6, %7 : vector<256x128xf32>
    %cst_7 = arith.constant 0.000000e+00 : f32
    %9 = vector.broadcast %cst_7 : f32 to vector<24x128xf32>
    %c0_8 = arith.constant 0 : index
    %c0_9 = arith.constant 0 : index
    %10 = vector.load %arg7[%c0_8, %c0_9] : memref<304x128xf32, #tpu.memory_space<vmem>>, vector<24x128xf32>
    tpu.vector_store %arg7[%c0_8, %c0_9], %9 {strides = array<i32>} : memref<304x128xf32, #tpu.memory_space<vmem>>, vector<24x128xf32>,
    %cst_10 = arith.constant 0.000000e+00 : f32
    %11 = vector.broadcast %cst_10 : f32 to vector<24x128xf32>
    %c280 = arith.constant 280 : index
    %c0_11 = arith.constant 0 : index
    %12 = vector.load %arg7[%c280, %c0_11] : memref<304x128xf32, #tpu.memory_space<vmem>>, vector<24x128xf32>
    tpu.vector_store %arg7[%c280, %c0_11], %11 {strides = array<i32>} : memref<304x128xf32, #tpu.memory_space<vmem>>, vector<24x128xf32>,
    %c24 = arith.constant 24 : index
    %c0_12 = arith.constant 0 : index
    %13 = vector.load %arg7[%c24, %c0_12] : memref<304x128xf32, #tpu.memory_space<vmem>>, vector<256x128xf32>
    tpu.vector_store %arg7[%c24, %c0_12], %8 {strides = array<i32>} : memref<304x128xf32, #tpu.memory_space<vmem>>, vector<256x128xf32>,
    %14 = tpu.iota {dimensions = array<i32: 0>} : vector<128x1xi32>
    %c0_i32 = arith.constant 0 : i32
    %15 = vector.broadcast %c0_i32 : i32 to vector<128x1xi32>
    %16 = arith.addi %15, %14 : vector<128x1xi32>
    %c16_i32 = arith.constant 16 : i32
    %c0_i32_13 = arith.constant 0 : i32
    %17 = arith.cmpi eq, %c16_i32, %c0_i32_13 : i32
    %c1_i32 = arith.constant 1 : i32
    %18 = arith.select %17, %c1_i32, %c16_i32 : i32
    %19 = vector.broadcast %18 : i32 to vector<128x1xi32>
    %20 = arith.remsi %16, %19 : vector<128x1xi32>
    %c0_i32_14 = arith.constant 0 : i32
    %21 = vector.broadcast %c0_i32_14 : i32 to vector<128x1xi32>
    %22 = arith.cmpi ne, %20, %21 : vector<128x1xi32>
    %c0_i32_15 = arith.constant 0 : i32
    %23 = vector.broadcast %c0_i32_15 : i32 to vector<128x1xi32>
    %24 = arith.cmpi slt, %20, %23 : vector<128x1xi32>
    %c0_i32_16 = arith.constant 0 : i32
    %25 = arith.cmpi slt, %18, %c0_i32_16 : i32
    %26 = vector.broadcast %25 : i1 to vector<128x1xi1>
    %27 = vector.broadcast %26 : vector<128x1xi1> to vector<128x1xi1>
    %28 = arith.xori %24, %27 : vector<128x1xi1>
    %29 = arith.andi %28, %22 : vector<128x1xi1>
    %30 = vector.broadcast %18 : i32 to vector<128x1xi32>
    %31 = arith.addi %20, %30 : vector<128x1xi32>
    %32 = arith.select %29, %31, %20 : vector<128x1xi1>, vector<128x1xi32>
    %cst_17 = arith.constant 0.000000e+00 : f32
    %33 = vector.broadcast %cst_17 : f32 to vector<128x128xf32>
    %c7 = arith.constant 7 : index
    %c0_18 = arith.constant 0 : index
    %34 = vector.load %arg7[%c7, %c0_18] : memref<304x128xf32, #tpu.memory_space<vmem>>, vector<128x128xf32>
    %c23 = arith.constant 23 : index
    %c0_19 = arith.constant 0 : index
    %35 = vector.load %arg7[%c23, %c0_19] : memref<304x128xf32, #tpu.memory_space<vmem>>, vector<128x128xf32>
    %c39 = arith.constant 39 : index
    %c0_20 = arith.constant 0 : index
    %36 = vector.load %arg7[%c39, %c0_20] : memref<304x128xf32, #tpu.memory_space<vmem>>, vector<128x128xf32>
    %37 = tpu.concatenate %34, %35, %36 in 1 : vector<128x128xf32>, vector<128x128xf32>, vector<128x128xf32> -> vector<128x384xf32>
    %c1_i32_21 = arith.constant 1 : i32
    %38 = vector.broadcast %c1_i32_21 : i32 to vector<128x1xi32>
    %39 = arith.cmpi sge, %32, %38 : vector<128x1xi32>
    %cst_22 = arith.constant 0.000000e+00 : f32
    %40 = vector.broadcast %cst_22 : f32 to vector<128x384xf32>
    %41 = vector.shape_cast %39 : vector<128x1xi1> to vector<128x1xi1>
    %42 = vector.broadcast %41 : vector<128x1xi1> to vector<128x384xi1>
    %43 = arith.select %42, %37, %40 : vector<128x384xi1>, vector<128x384xf32>
    %44 = arith.truncf %43 : vector<128x384xf32> to vector<128x384xbf16>
    %c0_23 = arith.constant 0 : index
    %c0_24 = arith.constant 0 : index
    %c0_25 = arith.constant 0 : index
    %45 = vector.load %arg3[%c0_23, %c0_24, %c0_25] : memref<3x384x128xbf16, #tpu.memory_space<vmem>>, vector<1x384x128xbf16>
    %46 = vector.shape_cast %45 : vector<1x384x128xbf16> to vector<384x128xbf16>
    %cst_26 = arith.constant dense<0.000000e+00> : vector<128x128xf32>
    %47 = tpu.matmul %44, %46, %cst_26 {dimension_numbers = #tpu.dot_dimension_numbers<[1], [0], [0], [1], [0, 0, 1, 1], [], []>} : vector<128x384xbf16>, vector<384x128xbf16>, vector<128x128xf32> -> vector<128x128xf32>
    %48 = arith.addf %33, %47 : vector<128x128xf32>
    %c8 = arith.constant 8 : index
    %c0_27 = arith.constant 0 : index
    %49 = vector.load %arg7[%c8, %c0_27] : memref<304x128xf32, #tpu.memory_space<vmem>>, vector<128x128xf32>
    %c24_28 = arith.constant 24 : index
    %c0_29 = arith.constant 0 : index
    %50 = vector.load %arg7[%c24_28, %c0_29] : memref<304x128xf32, #tpu.memory_space<vmem>>, vector<128x128xf32>
    %c40 = arith.constant 40 : index
    %c0_30 = arith.constant 0 : index
    %51 = vector.load %arg7[%c40, %c0_30] : memref<304x128xf32, #tpu.memory_space<vmem>>, vector<128x128xf32>
    %52 = tpu.concatenate %49, %50, %51 in 1 : vector<128x128xf32>, vector<128x128xf32>, vector<128x128xf32> -> vector<128x384xf32>
    %53 = arith.truncf %52 : vector<128x384xf32> to vector<128x384xbf16>
    %c1 = arith.constant 1 : index
    %c0_31 = arith.constant 0 : index
    %c0_32 = arith.constant 0 : index
    %54 = vector.load %arg3[%c1, %c0_31, %c0_32] : memref<3x384x128xbf16, #tpu.memory_space<vmem>>, vector<1x384x128xbf16>
    %55 = vector.shape_cast %54 : vector<1x384x128xbf16> to vector<384x128xbf16>
    %cst_33 = arith.constant dense<0.000000e+00> : vector<128x128xf32>
    %56 = tpu.matmul %53, %55, %cst_33 {dimension_numbers = #tpu.dot_dimension_numbers<[1], [0], [0], [1], [0, 0, 1, 1], [], []>} : vector<128x384xbf16>, vector<384x128xbf16>, vector<128x128xf32> -> vector<128x128xf32>
    %57 = arith.addf %48, %56 : vector<128x128xf32>
    %c9 = arith.constant 9 : index
    %c0_34 = arith.constant 0 : index
    %58 = vector.load %arg7[%c9, %c0_34] : memref<304x128xf32, #tpu.memory_space<vmem>>, vector<128x128xf32>
    %c25 = arith.constant 25 : index
    %c0_35 = arith.constant 0 : index
    %59 = vector.load %arg7[%c25, %c0_35] : memref<304x128xf32, #tpu.memory_space<vmem>>, vector<128x128xf32>
    %c41 = arith.constant 41 : index
    %c0_36 = arith.constant 0 : index
    %60 = vector.load %arg7[%c41, %c0_36] : memref<304x128xf32, #tpu.memory_space<vmem>>, vector<128x128xf32>
    %61 = tpu.concatenate %58, %59, %60 in 1 : vector<128x128xf32>, vector<128x128xf32>, vector<128x128xf32> -> vector<128x384xf32>
    %c14_i32 = arith.constant 14 : i32
    %62 = vector.broadcast %c14_i32 : i32 to vector<128x1xi32>
    %63 = arith.cmpi sle, %32, %62 : vector<128x1xi32>
    %cst_37 = arith.constant 0.000000e+00 : f32
    %64 = vector.broadcast %cst_37 : f32 to vector<128x384xf32>
    %65 = vector.shape_cast %63 : vector<128x1xi1> to vector<128x1xi1>
    %66 = vector.broadcast %65 : vector<128x1xi1> to vector<128x384xi1>
    %67 = arith.select %66, %61, %64 : vector<128x384xi1>, vector<128x384xf32>
    %68 = arith.truncf %67 : vector<128x384xf32> to vector<128x384xbf16>
    %c2 = arith.constant 2 : index
    %c0_38 = arith.constant 0 : index
    %c0_39 = arith.constant 0 : index
    %69 = vector.load %arg3[%c2, %c0_38, %c0_39] : memref<3x384x128xbf16, #tpu.memory_space<vmem>>, vector<1x384x128xbf16>
    %70 = vector.shape_cast %69 : vector<1x384x128xbf16> to vector<384x128xbf16>
    %cst_40 = arith.constant dense<0.000000e+00> : vector<128x128xf32>
    %71 = tpu.matmul %68, %70, %cst_40 {dimension_numbers = #tpu.dot_dimension_numbers<[1], [0], [0], [1], [0, 0, 1, 1], [], []>} : vector<128x384xbf16>, vector<384x128xbf16>, vector<128x128xf32> -> vector<128x128xf32>
    %72 = arith.addf %57, %71 : vector<128x128xf32>
    %c0_41 = arith.constant 0 : index
    %c0_42 = arith.constant 0 : index
    %73 = vector.load %arg4[%c0_41, %c0_42] : memref<1x128xf32, #tpu.memory_space<vmem>>, vector<1x128xf32>
    %74 = vector.broadcast %73 : vector<1x128xf32> to vector<128x128xf32>
    %75 = arith.addf %72, %74 : vector<128x128xf32>
    %c0_43 = arith.constant 0 : index
    %c0_44 = arith.constant 0 : index
    %76 = vector.load %arg6[%c0_43, %c0_44] : memref<256x128xf32, #tpu.memory_space<vmem>>, vector<128x128xf32>
    tpu.vector_store %arg6[%c0_43, %c0_44], %75 {strides = array<i32>} : memref<256x128xf32, #tpu.memory_space<vmem>>, vector<128x128xf32>,
    %77 = tpu.iota {dimensions = array<i32: 0>} : vector<128x1xi32>
    %c128_i32 = arith.constant 128 : i32
    %78 = vector.broadcast %c128_i32 : i32 to vector<128x1xi32>
    %79 = arith.addi %78, %77 : vector<128x1xi32>
    %c16_i32_45 = arith.constant 16 : i32
    %c0_i32_46 = arith.constant 0 : i32
    %80 = arith.cmpi eq, %c16_i32_45, %c0_i32_46 : i32
    %c1_i32_47 = arith.constant 1 : i32
    %81 = arith.select %80, %c1_i32_47, %c16_i32_45 : i32
    %82 = vector.broadcast %81 : i32 to vector<128x1xi32>
    %83 = arith.remsi %79, %82 : vector<128x1xi32>
    %c0_i32_48 = arith.constant 0 : i32
    %84 = vector.broadcast %c0_i32_48 : i32 to vector<128x1xi32>
    %85 = arith.cmpi ne, %83, %84 : vector<128x1xi32>
    %c0_i32_49 = arith.constant 0 : i32
    %86 = vector.broadcast %c0_i32_49 : i32 to vector<128x1xi32>
    %87 = arith.cmpi slt, %83, %86 : vector<128x1xi32>
    %c0_i32_50 = arith.constant 0 : i32
    %88 = arith.cmpi slt, %81, %c0_i32_50 : i32
    %89 = vector.broadcast %88 : i1 to vector<128x1xi1>
    %90 = vector.broadcast %89 : vector<128x1xi1> to vector<128x1xi1>
    %91 = arith.xori %87, %90 : vector<128x1xi1>
    %92 = arith.andi %91, %85 : vector<128x1xi1>
    %93 = vector.broadcast %81 : i32 to vector<128x1xi32>
    %94 = arith.addi %83, %93 : vector<128x1xi32>
    %95 = arith.select %92, %94, %83 : vector<128x1xi1>, vector<128x1xi32>
    %cst_51 = arith.constant 0.000000e+00 : f32
    %96 = vector.broadcast %cst_51 : f32 to vector<128x128xf32>
    %c135 = arith.constant 135 : index
    %c0_52 = arith.constant 0 : index
    %97 = vector.load %arg7[%c135, %c0_52] : memref<304x128xf32, #tpu.memory_space<vmem>>, vector<128x128xf32>
    %c151 = arith.constant 151 : index
    %c0_53 = arith.constant 0 : index
    %98 = vector.load %arg7[%c151, %c0_53] : memref<304x128xf32, #tpu.memory_space<vmem>>, vector<128x128xf32>
    %c167 = arith.constant 167 : index
    %c0_54 = arith.constant 0 : index
    %99 = vector.load %arg7[%c167, %c0_54] : memref<304x128xf32, #tpu.memory_space<vmem>>, vector<128x128xf32>
    %100 = tpu.concatenate %97, %98, %99 in 1 : vector<128x128xf32>, vector<128x128xf32>, vector<128x128xf32> -> vector<128x384xf32>
    %c1_i32_55 = arith.constant 1 : i32
    %101 = vector.broadcast %c1_i32_55 : i32 to vector<128x1xi32>
    %102 = arith.cmpi sge, %95, %101 : vector<128x1xi32>
    %cst_56 = arith.constant 0.000000e+00 : f32
    %103 = vector.broadcast %cst_56 : f32 to vector<128x384xf32>
    %104 = vector.shape_cast %102 : vector<128x1xi1> to vector<128x1xi1>
    %105 = vector.broadcast %104 : vector<128x1xi1> to vector<128x384xi1>
    %106 = arith.select %105, %100, %103 : vector<128x384xi1>, vector<128x384xf32>
    %107 = arith.truncf %106 : vector<128x384xf32> to vector<128x384xbf16>
    %c0_57 = arith.constant 0 : index
    %c0_58 = arith.constant 0 : index
    %c0_59 = arith.constant 0 : index
    %108 = vector.load %arg3[%c0_57, %c0_58, %c0_59] : memref<3x384x128xbf16, #tpu.memory_space<vmem>>, vector<1x384x128xbf16>
    %109 = vector.shape_cast %108 : vector<1x384x128xbf16> to vector<384x128xbf16>
    %cst_60 = arith.constant dense<0.000000e+00> : vector<128x128xf32>
    %110 = tpu.matmul %107, %109, %cst_60 {dimension_numbers = #tpu.dot_dimension_numbers<[1], [0], [0], [1], [0, 0, 1, 1], [], []>} : vector<128x384xbf16>, vector<384x128xbf16>, vector<128x128xf32> -> vector<128x128xf32>
    %111 = arith.addf %96, %110 : vector<128x128xf32>
    %c136 = arith.constant 136 : index
    %c0_61 = arith.constant 0 : index
    %112 = vector.load %arg7[%c136, %c0_61] : memref<304x128xf32, #tpu.memory_space<vmem>>, vector<128x128xf32>
    %c152 = arith.constant 152 : index
    %c0_62 = arith.constant 0 : index
    %113 = vector.load %arg7[%c152, %c0_62] : memref<304x128xf32, #tpu.memory_space<vmem>>, vector<128x128xf32>
    %c168 = arith.constant 168 : index
    %c0_63 = arith.constant 0 : index
    %114 = vector.load %arg7[%c168, %c0_63] : memref<304x128xf32, #tpu.memory_space<vmem>>, vector<128x128xf32>
    %115 = tpu.concatenate %112, %113, %114 in 1 : vector<128x128xf32>, vector<128x128xf32>, vector<128x128xf32> -> vector<128x384xf32>
    %116 = arith.truncf %115 : vector<128x384xf32> to vector<128x384xbf16>
    %c1_64 = arith.constant 1 : index
    %c0_65 = arith.constant 0 : index
    %c0_66 = arith.constant 0 : index
    %117 = vector.load %arg3[%c1_64, %c0_65, %c0_66] : memref<3x384x128xbf16, #tpu.memory_space<vmem>>, vector<1x384x128xbf16>
    %118 = vector.shape_cast %117 : vector<1x384x128xbf16> to vector<384x128xbf16>
    %cst_67 = arith.constant dense<0.000000e+00> : vector<128x128xf32>
    %119 = tpu.matmul %116, %118, %cst_67 {dimension_numbers = #tpu.dot_dimension_numbers<[1], [0], [0], [1], [0, 0, 1, 1], [], []>} : vector<128x384xbf16>, vector<384x128xbf16>, vector<128x128xf32> -> vector<128x128xf32>
    %120 = arith.addf %111, %119 : vector<128x128xf32>
    %c137 = arith.constant 137 : index
    %c0_68 = arith.constant 0 : index
    %121 = vector.load %arg7[%c137, %c0_68] : memref<304x128xf32, #tpu.memory_space<vmem>>, vector<128x128xf32>
    %c153 = arith.constant 153 : index
    %c0_69 = arith.constant 0 : index
    %122 = vector.load %arg7[%c153, %c0_69] : memref<304x128xf32, #tpu.memory_space<vmem>>, vector<128x128xf32>
    %c169 = arith.constant 169 : index
    %c0_70 = arith.constant 0 : index
    %123 = vector.load %arg7[%c169, %c0_70] : memref<304x128xf32, #tpu.memory_space<vmem>>, vector<128x128xf32>
    %124 = tpu.concatenate %121, %122, %123 in 1 : vector<128x128xf32>, vector<128x128xf32>, vector<128x128xf32> -> vector<128x384xf32>
    %c14_i32_71 = arith.constant 14 : i32
    %125 = vector.broadcast %c14_i32_71 : i32 to vector<128x1xi32>
    %126 = arith.cmpi sle, %95, %125 : vector<128x1xi32>
    %cst_72 = arith.constant 0.000000e+00 : f32
    %127 = vector.broadcast %cst_72 : f32 to vector<128x384xf32>
    %128 = vector.shape_cast %126 : vector<128x1xi1> to vector<128x1xi1>
    %129 = vector.broadcast %128 : vector<128x1xi1> to vector<128x384xi1>
    %130 = arith.select %129, %124, %127 : vector<128x384xi1>, vector<128x384xf32>
    %131 = arith.truncf %130 : vector<128x384xf32> to vector<128x384xbf16>
    %c2_73 = arith.constant 2 : index
    %c0_74 = arith.constant 0 : index
    %c0_75 = arith.constant 0 : index
    %132 = vector.load %arg3[%c2_73, %c0_74, %c0_75] : memref<3x384x128xbf16, #tpu.memory_space<vmem>>, vector<1x384x128xbf16>
    %133 = vector.shape_cast %132 : vector<1x384x128xbf16> to vector<384x128xbf16>
    %cst_76 = arith.constant dense<0.000000e+00> : vector<128x128xf32>
    %134 = tpu.matmul %131, %133, %cst_76 {dimension_numbers = #tpu.dot_dimension_numbers<[1], [0], [0], [1], [0, 0, 1, 1], [], []>} : vector<128x384xbf16>, vector<384x128xbf16>, vector<128x128xf32> -> vector<128x128xf32>
    %135 = arith.addf %120, %134 : vector<128x128xf32>
    %c0_77 = arith.constant 0 : index
    %c0_78 = arith.constant 0 : index
    %136 = vector.load %arg4[%c0_77, %c0_78] : memref<1x128xf32, #tpu.memory_space<vmem>>, vector<1x128xf32>
    %137 = vector.broadcast %136 : vector<1x128xf32> to vector<128x128xf32>
    %138 = arith.addf %135, %137 : vector<128x128xf32>
    %c128 = arith.constant 128 : index
    %c0_79 = arith.constant 0 : index
    %139 = vector.load %arg6[%c128, %c0_79] : memref<256x128xf32, #tpu.memory_space<vmem>>, vector<128x128xf32>
    tpu.vector_store %arg6[%c128, %c0_79], %138 {strides = array<i32>} : memref<256x128xf32, #tpu.memory_space<vmem>>, vector<128x128xf32>,
    return
  }
}

</mosaic_0001>

<bundles_post_ra>
// kernel: fpn_forward.4
= control target key start
LH: loop header
LB: loop body
LE: loop exit
PB: predicated region body
PF: predicated region fallthrough
CT: control target
= control target key end

     0   :  { %s2759_s0 = inlined_call_operand.vmem [shape: f32[64,128], index: 0, kind: input, shape index: {}]   ;;  %s2760_s1 = inlined_call_operand.vmem [shape: bf16[128,128], index: 1, kind: input, shape index: {}]   ;;  %s2761_s2 = inlined_call_operand.vmem [shape: f32[1,128], index: 2, kind: input, shape index: {}]   ;;  %s2762_s3 = inlined_call_operand.vmem [shape: bf16[3,384,128], index: 3, kind: input, shape index: {}]   ;;  %s2763_s4 = inlined_call_operand.vmem [shape: f32[1,128], index: 4, kind: input, shape index: {}]   ;;  %s2764_s5 = inlined_call_operand.vmem [shape: f32[64,128], index: 5, kind: input, shape index: {}]   ;;  %s2765_s6 = inlined_call_operand.vmem [shape: f32[64,128], index: 6, kind: output, shape index: {0}]   ;;  %s2766_s7 = inlined_call_operand.hbm [shape: f32[64,128], index: 7, kind: output, shape index: {1}]  }
   0x1   :  { %v2068_v0 = vld [vmem:[%s2760_s1] sm:$0xff]   ;;  %v2069_v1 = vld [vmem:[%s2760_s1 + $0x8] sm:$0xff]   ;;  %v2070_v2 = vld [vmem:[%s2760_s1 + $0x10] sm:$0xff]  }
   0x2   :  { %1912 = vmatprep.subr.bf16.mxu0 %v2068_v0  ;;  %v2071_v3 = vld [vmem:[%s2760_s1 + $0x18] sm:$0xff]   ;;  %v27_v4 = vld [vmem:[%s2759_s0] sm:$0xff]  ;;  %v28_v5 = vld [vmem:[%s2759_s0 + $0x8] sm:$0xff] }
   0x3   :  { %1913 = vmatpush3.bf16.msra.mxu0 %v2068_v0  ;;  %v35_v6 = vpack.c.bf16 %v28_v5, %v27_v4  ;;  %v2072_v7 = vld [vmem:[%s2760_s1 + $0x20] sm:$0xff]   ;;  %v2078_v10 = vld [vmem:[%s2762_s3 + $0x108] sm:$0xff]   ;;  %v2081_v13 = vld [vmem:[%s2762_s3 + $0x110] sm:$0xff]  }
   0x4   :  { %1914 = vmatprep.subr.bf16.mxu0 %v2069_v1  ;;  %v2076_v8 = vld [vmem:[%s2762_s3 + $0x100] sm:$0xff]   ;;  %v2079_v11 = vld [vmem:[%s2762_s3 + $0xc8] sm:$0xff]   ;;  %v2082_v14 = vld [vmem:[%s2762_s3 + $0xd0] sm:$0xff]  }
   0x5   :  { %1928 = vmatprep.mubr.bf16.mxu0 %v35_v6  ;;  %v2077_v9 = vld [vmem:[%s2762_s3 + $0xc0] sm:$0xff]   ;;  %1756 = vmatprep.subr.bf16.mxu1 %v2076_v8  ;;  %v2073_v12 = vld [vmem:[%s2760_s1 + $0x28] sm:$0xff]   ;;  %v2084_v15 = vld [vmem:[%s2762_s3 + $0x118] sm:$0xff]  }
   0x6   :  { %1757 = vmatpush3.bf16.msra.mxu1 %v2077_v9  ;;  %v2074_v16 = vld [vmem:[%s2760_s1 + $0x30] sm:$0xff]   ;;  %v2085_v17 = vld [vmem:[%s2762_s3 + $0xd8] sm:$0xff]   ;;  %v31_v21 = vld [vmem:[%s2759_s0 + $0x20] sm:$0xff] }
   0x7   :  { %1915 = vmatpush3.bf16.msra.mxu0 %v2069_v1  ;;  %1758 = vmatprep.subr.bf16.mxu1 %v2078_v10  ;;  %v2075_v18 = vld [vmem:[%s2760_s1 + $0x38] sm:$0xff]   ;;  %v29_v19 = vld [vmem:[%s2759_s0 + $0x10] sm:$0xff]  ;;  %v32_v22 = vld [vmem:[%s2759_s0 + $0x28] sm:$0xff] }
   0x8   :  { %1916 = vmatprep.subr.bf16.mxu0 %v2070_v2  ;;  %v30_v20 = vld [vmem:[%s2759_s0 + $0x18] sm:$0xff]  ;;  %v2080_v23 = vld [vmem:[%s2762_s3 + $0x140] sm:$0xff]   ;;  %v2083_v25 = vld [vmem:[%s2762_s3 + $0x148] sm:$0xff]   ;;  %v37_v26 = vpack.c.bf16 %v32_v22, %v31_v21 }
   0x9   :  { %v36_v24 = vpack.c.bf16 %v30_v20, %v29_v19  ;;  %v33_v27 = vld [vmem:[%s2759_s0 + $0x30] sm:$0xff]  ;;  %v34_v28 = vld [vmem:[%s2759_s0 + $0x38] sm:$0xff] }
   0xa   :  { %1759 = vmatpush3.bf16.msra.mxu1 %v2079_v11  ;;  %v2086_v29 = vld [vmem:[%s2762_s3 + $0x150] sm:$0xff]   ;;  %v38_v30 = vpack.c.bf16 %v34_v28, %v33_v27 }
   0xb   :  { %1917 = vmatpush3.bf16.msra.mxu0 %v2070_v2  ;;  %1760 = vmatprep.subr.bf16.mxu1 %v2081_v13 }
   0xc   :  { %1918 = vmatprep.subr.bf16.mxu0 %v2071_v3 }
   0xe   :  { %1761 = vmatpush3.bf16.msra.mxu1 %v2082_v14 }
   0xf   :  { %1919 = vmatpush3.bf16.msra.mxu0 %v2071_v3  ;;  %1762 = vmatprep.subr.bf16.mxu1 %v2084_v15 }
  0x10   :  { %1920 = vmatprep.subr.bf16.mxu0 %v2072_v7 }
  0x12   :  { %1763 = vmatpush3.bf16.msra.mxu1 %v2085_v17 }
  0x13   :  { %1921 = vmatpush3.bf16.msra.mxu0 %v2072_v7 }
  0x14   :  { %1922 = vmatprep.subr.bf16.mxu0 %v2073_v12 }
  0x17   :  { %1923 = vmatpush3.bf16.msra.mxu0 %v2073_v12 }
  0x18   :  { %1924 = vmatprep.subr.bf16.mxu0 %v2074_v16 }
  0x1b   :  { %1925 = vmatpush3.bf16.msra.mxu0 %v2074_v16 }
  0x1c   :  { %1926 = vmatprep.subr.bf16.mxu0 %v2075_v18 }
  0x1f   :  { %1927 = vmatpush3.bf16.msra.mxu0 %v2075_v18 }
  0x20   :  { %1936 = vmatprep.subr.bf16.mxu0 %v2080_v23 }
  0x22   :  { %1929 = vmatmul.mubr.bf16.vlgmr.msra.gmra.mrb[0].mxu0 %v36_v24 }
  0x23   :  { %1932 = vmatprep.mubr.bf16.mxu0 %v37_v26  ;;  %1937 = vmatpush3.bf16.msra.mxu0 %v2080_v23 }
  0x24   :  { %1938 = vmatprep.subr.bf16.mxu0 %v2083_v25 }
  0x27   :  { %1939 = vmatpush3.bf16.msra.mxu0 %v2083_v25 }
  0x28   :  { %1940 = vmatprep.subr.bf16.mxu0 %v2086_v29 }
  0x2a   :  { %1933 = vmatmul.mubr.bf16.gmra.mrb[4].mxu0 %v38_v30 }
  0x2b   :  { %1941 = vmatpush3.bf16.msra.mxu0 %v2086_v29 }
  0x2c   :  { %13 = vsyncpa [#allocation4], 0  ;;  %v2087_v31 = vld [vmem:[%s2762_s3 + $0x120] sm:$0xff]   ;;  %v2089_v32 = vld [vmem:[%s2762_s3 + $0x158] sm:$0xff]   ;;  %v2172_v43 = vmov 0.0   ;;  %v211_v60 = vlaneseq }
  0x2d   :  { %v2088_v33 = vld [vmem:[%s2762_s3 + $0xe0] sm:$0xff]   ;;  %1764 = vmatprep.subr.bf16.mxu1 %v2087_v31  ;;  %1942 = vmatprep.subr.bf16.mxu0 %v2089_v32  ;;  %v2090_v34 = vld [vmem:[%s2762_s3 + $0x128] sm:$0xff]   ;;  %v2093_v37 = vld [vmem:[%s2762_s3 + $0x130] sm:$0xff]   ;;  %200 = vst [vmem:[#allocation2 + $0x8] sm:$0xff] %v2172_v43 }
  0x2e   :  { %1765 = vmatpush3.bf16.msra.mxu1 %v2088_v33  ;;  %v2092_v35 = vld [vmem:[%s2762_s3 + $0x160] sm:$0xff]   ;;  %v2091_v36 = vld [vmem:[%s2762_s3 + $0xe8] sm:$0xff]   ;;  %v2094_v39 = vld [vmem:[%s2762_s3 + $0xf0] sm:$0xff]   ;;  %199 = vst [vmem:[#allocation2] sm:$0xff] %v2172_v43  ;;  %v2373_v2 = vshrl.u32 %v211_v60, 7 }
  0x2f   :  { %1943 = vmatpush3.bf16.msra.mxu0 %v2089_v32  ;;  %1766 = vmatprep.subr.bf16.mxu1 %v2090_v34  ;;  %v2095_v38 = vld [vmem:[%s2762_s3 + $0x168] sm:$0xff]   ;;  %v2096_v40 = vld [vmem:[%s2762_s3 + $0x138] sm:$0xff]   ;;  %v2098_v41 = vld [vmem:[%s2762_s3 + $0x170] sm:$0xff]   ;;  %201 = vst [vmem:[#allocation2 + $0x50] sm:$0xff] %v2172_v43 }
  0x30   :  { %1944 = vmatprep.subr.bf16.mxu0 %v2092_v35  ;;  %v2097_v42 = vld [vmem:[%s2762_s3 + $0xf8] sm:$0xff]   ;;  %202 = vst [vmem:[#allocation2 + $0x58] sm:$0xff] %v2172_v43  ;;  %v2099_v44 = vld [vmem:[%s2762_s3 + $0x40] sm:$0xff]   ;;  %v177_v49 = vld [vmem:[%s2764_s5 + $0x10] sm:$0xff]  ;;  %v2400_v20 = vadd.s32 8, %v2373_v2  ;;  %v224_v29 = vand.u32 7, %v2373_v2 }
  0x31   :  { %v2100_v45 = vld [vmem:[%s2762_s3 + $0x178] sm:$0xff]   ;;  %v2346_v46 = vld [vmem:[%s2762_s3 + $0x80] sm:$0xff]   ;;  %v176_v59 = vld [vmem:[%s2764_s5 + $0x8] sm:$0xff] }
  0x32   :  { %1767 = vmatpush3.bf16.msra.mxu1 %v2091_v36  ;;  %v1494_v47 = vld [vmem:[%s2761_s2] ss:$0 sm:$0xff]  ;;  %v178_v55 = vld [vmem:[%s2764_s5 + $0x18] sm:$0xff]  ;;  %v181_v4 = vld [vmem:[%s2764_s5 + $0x30] sm:$0xff]  ;;  %v231_v30 = vand.u32 7, %v2400_v20  ;;  %vm326_vm0 = vcmp.ge.s32.totalorder %v224_v29, 1 }
  0x33   :  { %1945 = vmatpush3.bf16.msra.mxu0 %v2092_v35  ;;  %1768 = vmatprep.subr.bf16.mxu1 %v2093_v37  ;;  %v175_v52 = vld [vmem:[%s2764_s5] sm:$0xff]  ;;  %v2102_v12 = vld [vmem:[%s2762_s3 + $0x48] sm:$0xff]   ;;  %v182_v15 = vld [vmem:[%s2764_s5 + $0x38] sm:$0xff]  ;;  %vm1060_vm11 = vcmp.le.s32.totalorder %v224_v29, 6 }
  0x34   :  { %1946 = vmatprep.subr.bf16.mxu0 %v2095_v38  ;;  %v2101_v7 = vld [vmem:[%s2762_s3] sm:$0xff]   ;;  %v180_v19 = vld [vmem:[%s2764_s5 + $0x28] sm:$0xff]  ;;  %v2105_v25 = vld [vmem:[%s2762_s3 + $0x50] sm:$0xff]   ;;  %vm327_vm1 = vcmp.ge.s32.totalorder %v231_v30, 1  ;;  %vm1061_vm12 = vcmp.le.s32.totalorder %v231_v30, 6 }
  0x35   :  { %v179_v10 = vld [vmem:[%s2764_s5 + $0x20] sm:$0xff]  ;;  %v2103_v23 = vld [vmem:[%s2762_s3 + $0x8] sm:$0xff]   ;;  %v2106_v32 = vld [vmem:[%s2762_s3 + $0x10] sm:$0xff]  }
  0x36   :  { %1769 = vmatpush3.bf16.msra.mxu1 %v2094_v39  ;;  %v2107_v28 = vld [vmem:[%s2762_s3 + $0x88] sm:$0xff]   ;;  %v2108_v35 = vld [vmem:[%s2762_s3 + $0x58] sm:$0xff]   ;;  %v2110_v36 = vld [vmem:[%s2762_s3 + $0x90] sm:$0xff]  }
  0x37   :  { %1947 = vmatpush3.bf16.msra.mxu0 %v2095_v38  ;;  %1770 = vmatprep.subr.bf16.mxu1 %v2096_v40  ;;  %v2109_v37 = vld [vmem:[%s2762_s3 + $0x18] sm:$0xff]   ;;  %vm2449_vm2 = vmpackc.low %vm327_vm1, %vm326_vm0  ;;  %v2135_v30 = vld [vmem:[%s2762_s3 + $0x1e0] sm:$0xff]  }
  0x38   :  { %1948 = vmatprep.subr.bf16.mxu0 %v2098_v41  ;;  %vm2622_vm14 = vmpackc.low %vm1061_vm12, %vm1060_vm11 }
  0x3a   :  { %1771 = vmatpush3.bf16.msra.mxu1 %v2097_v42  ;;  %v2111_v42 = vld [vmem:[%s2762_s3 + $0x60] sm:$0xff]  }
  0x3b   :  { %1949 = vmatpush3.bf16.msra.mxu0 %v2098_v41  ;;  %1808 = vmatprep.subr.bf16.mxu1 %v2099_v44  ;;  %v2113_v44 = vld [vmem:[%s2762_s3 + $0x98] sm:$0xff]   ;;  %v2136_v41 = vld [vmem:[%s2762_s3 + $0x1a0] sm:$0xff]  }
  0x3c   :  { %1950 = vmatprep.subr.bf16.mxu0 %v2100_v45 }
  0x3f   :  { %1951 = vmatpush3.bf16.msra.mxu0 %v2100_v45  ;;  %v2112_v45 = vld [vmem:[%s2762_s3 + $0x20] sm:$0xff]  }
  0x40   :  { %1960 = vmatprep.subr.bf16.mxu0 %v2346_v46 }
  0xf5   :  { %v1930_v48 = vpop.f32.mrb[0].mxu0 }
  0xf6   :  { %v153_v50 = vadd.f32 %v1930_v48, %v1494_v47  ;;  %v144_v51 = vpop.f32.mrb[1].mxu0  ;;  %v2115_v48 = vld [vmem:[%s2762_s3 + $0x28] sm:$0xff]  }
  0xf7   :  { %v145_v53 = vadd.f32 %v1494_v47, %v144_v51  ;;  %v1931_v54 = vpop.f32.mrb[2].mxu0  ;;  %v2484_v51 = vadd.s32 16, %v2373_v2 }
  0xf8   :  { %v185_v56 = vadd.f32 %v177_v49, %v153_v50  ;;  %v156_v57 = vadd.f32 %v1931_v54, %v1494_v47  ;;  %v147_v58 = vpop.f32.mrb[3].mxu0  ;;  %v2117_v49 = vld [vmem:[%s2762_s3 + $0x70] sm:$0xff]   ;;  %v2119_v50 = vld [vmem:[%s2762_s3 + $0xa8] sm:$0xff]  }
  0xf9   :  { %v183_v61 = vadd.f32 %v175_v52, %v145_v53  ;;  %v148_v62 = vadd.f32 %v1494_v47, %v147_v58  ;;  %v2487_v52 = vadd.s32 24, %v2373_v2  ;;  %v2118_v53 = vld [vmem:[%s2762_s3 + $0x30] sm:$0xff]  }
  0xfa   :  { %193 = vst [vmem:[%s2765_s6 + $0x10] sm:$0xff] %v185_v56  ;;  %205 = vst [vmem:[#allocation2 + $0x20] sm:$0xff] %v185_v56  ;;  %v186_v63 = vadd.f32 %v178_v55, %v156_v57  ;;  %v2120_v55 = vld [vmem:[%s2762_s3 + $0x78] sm:$0xff]   ;;  %v2122_v58 = vld [vmem:[%s2762_s3 + $0xb0] sm:$0xff]  }
  0xfb   :  { %191 = vst [vmem:[%s2765_s6] sm:$0xff] %v183_v61  ;;  %203 = vst [vmem:[#allocation2 + $0x10] sm:$0xff] %v183_v61  ;;  %v184_v0 = vadd.f32 %v176_v59, %v148_v62  ;;  %v444_v11 = vpack.c.bf16 %v183_v61, %v2172_v43  ;;  %v238_v59 = vand.u32 7, %v2484_v51  ;;  %v245_v60 = vand.u32 7, %v2487_v52  ;;  %v2121_v62 = vld [vmem:[%s2762_s3 + $0x38] sm:$0xff]  }
  0xfc   :  { %194 = vst [vmem:[%s2765_s6 + $0x18] sm:$0xff] %v186_v63  ;;  %206 = vst [vmem:[#allocation2 + $0x28] sm:$0xff] %v186_v63  ;;  %v447_v1 = vpack.c.bf16 %v186_v63, %v185_v56 }
  0xfd   :  { %192 = vst [vmem:[%s2765_s6 + $0x8] sm:$0xff] %v184_v0  ;;  %204 = vst [vmem:[#allocation2 + $0x18] sm:$0xff] %v184_v0  ;;  %v1934_v3 = vpop.f32.mrb[4].mxu0  ;;  %v445_v5 = vpack.c.bf16 %v184_v0, %v183_v61  ;;  %v446_v6 = vpack.c.bf16 %v185_v56, %v184_v0  ;;  %v2496_v56 = vadd.s32 32, %v2373_v2  ;;  %v2504_v61 = vadd.s32 40, %v2373_v2 }
  0xfe   :  { %v169_v8 = vadd.f32 %v1934_v3, %v1494_v47  ;;  %v160_v9 = vpop.f32.mrb[5].mxu0  ;;  %v2124_v3 = vld [vmem:[%s2762_s3 + $0xb8] sm:$0xff]   ;;  %vm328_vm3 = vcmp.ge.s32.totalorder %v238_v59, 1  ;;  %vm329_vm4 = vcmp.ge.s32.totalorder %v245_v60, 1  ;;  %vm1062_vm15 = vcmp.le.s32.totalorder %v238_v59, 6 }
  0xff   :  { %v161_v13 = vadd.f32 %v1494_v47, %v160_v9  ;;  %v1935_v14 = vpop.f32.mrb[6].mxu0  ;;  %678 = vmatprep.mubr.bf16.mxu1 %v445_v5  ;;  %1952 = vmatprep.mubr.bf16.mxu0 %v446_v6  ;;  %v252_v0 = vand.u32 7, %v2496_v56  ;;  %vm2526_vm5 = vmpackc.low %vm329_vm4, %vm328_vm3  ;;  %v2126_v9 = vld [vmem:[%s2762_s3 + $0x1c8] sm:$0xff]   ;;  %vm1063_vm0 = vcmp.le.s32.totalorder %v245_v60, 6 }
 0x100   :  { %v2394_v16 = vadd.f32 %v181_v4, %v169_v8  ;;  %v172_v17 = vadd.f32 %v1935_v14, %v1494_v47  ;;  %v163_v18 = vpop.f32.mrb[7].mxu0  ;;  %679 = vmatmul.mubr.bf16.vlgmr.msra.gmra.mrb[0].mxu1 %v444_v11  ;;  %v259_v4 = vand.u32 7, %v2504_v61  ;;  %v2551_v14 = vadd.s32 56, %v2373_v2  ;;  %vm2694_vm1 = vmpackc.low %vm1063_vm0, %vm1062_vm15 }
 0x101   :  { %v187_v21 = vadd.f32 %v179_v10, %v161_v13  ;;  %v164_v22 = vadd.f32 %v1494_v47, %v163_v18  ;;  %1809 = vmatpush3.bf16.msra.mxu1 %v2101_v7  ;;  %686 = vmatprep.mubr.bf16.mxu1 %v447_v1  ;;  %v2116_v47 = vld [vmem:[%s2762_s3 + $0xa0] sm:$0xff]   ;;  %vm2535_vm6 = vcmp.ge.s32.totalorder %v252_v0, 1  ;;  %v2548_v13 = vadd.s32 48, %v2373_v2 }
 0x102   :  { %197 = vst [vmem:[%s2765_s6 + $0x30] sm:$0xff] %v2394_v16  ;;  %209 = vst [vmem:[#allocation2 + $0x40] sm:$0xff] %v2394_v16  ;;  %v190_v24 = vadd.f32 %v182_v15, %v172_v17  ;;  %1810 = vmatprep.subr.bf16.mxu1 %v2102_v12  ;;  %v317_v54 = vld [vmem:[#allocation2 + $0xf] sm:$0xff]  ;;  %v316_v1 = vld [vmem:[#allocation2 + $0x7] sm:$0xff]  ;;  %vm331_vm7 = vcmp.ge.s32.totalorder %v259_v4, 1  ;;  %vm1065_vm3 = vcmp.le.s32.totalorder %v259_v4, 6 }
 0x103   :  { %195 = vst [vmem:[%s2765_s6 + $0x20] sm:$0xff] %v187_v21  ;;  %207 = vst [vmem:[#allocation2 + $0x30] sm:$0xff] %v187_v21  ;;  %v188_v26 = vadd.f32 %v180_v19, %v164_v22  ;;  %v448_v27 = vpack.c.bf16 %v187_v21, %v186_v63  ;;  %v2123_v63 = vld [vmem:[%s2762_s3 + $0x1c0] sm:$0xff]   ;;  %v1603_v7 = vpack.c.bf16 %v317_v54, %v316_v1  ;;  %v2129_v22 = vld [vmem:[%s2762_s3 + $0x1d0] sm:$0xff]  }
 0x104   :  { %198 = vst [vmem:[%s2765_s6 + $0x38] sm:$0xff] %v190_v24  ;;  %210 = vst [vmem:[#allocation2 + $0x48] sm:$0xff] %v190_v24  ;;  %v451_v31 = vpack.c.bf16 %v190_v24, %v2394_v16  ;;  %v452_v38 = vpack.c.bf16 %v2172_v43, %v190_v24  ;;  %v318_v39 = vld [vmem:[#allocation2 + $0x17] sm:$0xff]  ;;  %v2447_v40 = vld [vmem:[#allocation2 + $0x1f] sm:$0xff]  ;;  %v266_v24 = vand.u32 7, %v2548_v13 }
 0x105   :  { %196 = vst [vmem:[%s2765_s6 + $0x28] sm:$0xff] %v188_v26  ;;  %208 = vst [vmem:[#allocation2 + $0x38] sm:$0xff] %v188_v26  ;;  %1811 = vmatpush3.bf16.msra.mxu1 %v2103_v23  ;;  %1953 = vmatmul.mubr.bf16.vlgmr.msra.gmra.mrb[8].mxu0 %v448_v27  ;;  %v449_v33 = vpack.c.bf16 %v188_v26, %v187_v21  ;;  %v450_v34 = vpack.c.bf16 %v2394_v16, %v188_v26  ;;  %v320_v5 = vld [vmem:[#allocation2 + $0x27] sm:$0xff] }
 0x106   :  { %1961 = vmatpush3.bf16.msra.mxu0 %v2346_v46  ;;  %1812 = vmatprep.subr.bf16.mxu1 %v2105_v25  ;;  %v2460_v43 = vpack.c.bf16 %v2447_v40, %v318_v39  ;;  %v2114_v46 = vld [vmem:[%s2762_s3 + $0x68] sm:$0xff]   ;;  %v1600_v57 = vpack.c.bf16 %v318_v39, %v317_v54  ;;  %v1606_v11 = vpack.c.bf16 %v320_v5, %v2447_v40  ;;  %v2543_v12 = vld [vmem:[%s2762_s3 + $0x200] sm:$0xff]   ;;  %vm2562_vm8 = vmpackc.low %vm331_vm7, %vm2535_vm6  ;;  %v273_v25 = vand.u32 7, %v2551_v14 }
 0x107   :  { %1962 = vmatprep.subr.bf16.mxu0 %v2107_v28  ;;  %1956 = vmatprep.mubr.bf16.mxu0 %v450_v34  ;;  %v2127_v16 = vld [vmem:[%s2762_s3 + $0x188] sm:$0xff]   ;;  %vm2591_vm9 = vcmp.ge.s32.totalorder %v266_v24, 1  ;;  %v2632_v39 = vld [vmem:[%s2762_s3 + $0x218] sm:$0xff]   ;;  %v2146_v54 = vld [vmem:[%s2762_s3 + $0x230] sm:$0xff]  }
 0x108   :  { %687 = vmatmul.mubr.bf16.gmra.mrb[4].mxu1 %v446_v6  ;;  %v2125_v6 = vld [vmem:[%s2762_s3 + $0x180] sm:$0xff]   ;;  %v2573_v23 = vld [vmem:[%s2762_s3 + $0x208] sm:$0xff]   ;;  %vm333_vm10 = vcmp.ge.s32.totalorder %v273_v25, 1  ;;  %vm1067_vm6 = vcmp.le.s32.totalorder %v273_v25, 6 }
 0x109   :  { %1813 = vmatpush3.bf16.msra.mxu1 %v2106_v32  ;;  %694 = vmatprep.mubr.bf16.mxu1 %v449_v33  ;;  %v2600_v33 = vld [vmem:[%s2762_s3 + $0x210] sm:$0xff]   ;;  %vm2617_vm13 = vmpackc.low %vm333_vm10, %vm2591_vm9 }
 0x10a   :  { %1963 = vmatpush3.bf16.msra.mxu0 %v2107_v28  ;;  %1814 = vmatprep.subr.bf16.mxu1 %v2108_v35  ;;  %v321_v15 = vld [vmem:[#allocation2 + $0x2f] sm:$0xff]  ;;  %v2132_v28 = vld [vmem:[%s2762_s3 + $0x1d8] sm:$0xff]  }
 0x10b   :  { %1964 = vmatprep.subr.bf16.mxu0 %v2110_v36  ;;  %v1615_v19 = vpack.c.bf16 %v321_v15, %v320_v5  ;;  %v325_v35 = vld [vmem:[#allocation2 + $0x4f] sm:$0xff]  ;;  %v1057_v56 = vld [vmem:[#allocation2 + $0x41] sm:$0xff] }
 0x10c   :  { %v323_v17 = vld [vmem:[#allocation2 + $0x3f] sm:$0xff]  ;;  %v322_v21 = vld [vmem:[#allocation2 + $0x37] sm:$0xff]  ;;  %v1058_v61 = vld [vmem:[#allocation2 + $0x49] sm:$0xff] }
 0x10d   :  { %1815 = vmatpush3.bf16.msra.mxu1 %v2109_v37  ;;  %1957 = vmatmul.mubr.bf16.gmra.mrb[12].mxu0 %v452_v38  ;;  %v1621_v26 = vpack.c.bf16 %v323_v17, %v322_v21  ;;  %v1052_v37 = vld [vmem:[#allocation2 + $0x19] sm:$0xff]  ;;  %v1053_v38 = vld [vmem:[#allocation2 + $0x21] sm:$0xff]  ;;  %v1055_v51 = vld [vmem:[#allocation2 + $0x31] sm:$0xff]  ;;  %v1726_v4 = vpack.c.bf16 %v1058_v61, %v1057_v56 }
 0x10e   :  { %1965 = vmatpush3.bf16.msra.mxu0 %v2110_v36  ;;  %1976 = vmatprep.mubr.msk.bf16.mxu0 %vm2449_vm2, %v2460_v43  ;;  %v2133_v36 = vld [vmem:[%s2762_s3 + $0x198] sm:$0xff]   ;;  %v2634_v40 = vpack.c.bf16 %v1053_v38, %v1052_v37 }
 0x10f   :  { %1816 = vmatprep.subr.bf16.mxu1 %v2111_v42  ;;  %1966 = vmatprep.subr.bf16.mxu0 %v2113_v44  ;;  %v2138_v42 = vld [vmem:[%s2762_s3 + $0x1e8] sm:$0xff]   ;;  %v1056_v59 = vld [vmem:[#allocation2 + $0x39] sm:$0xff] }
 0x110   :  { %695 = vmatmul.mubr.bf16.gmra.mrb[8].mxu1 %v448_v27  ;;  %v2130_v27 = vld [vmem:[%s2762_s3 + $0x190] sm:$0xff]   ;;  %v1720_v5 = vpack.c.bf16 %v1056_v59, %v1055_v51 }
 0x111   :  { %1817 = vmatpush3.bf16.msra.mxu1 %v2112_v45  ;;  %702 = vmatprep.mubr.bf16.mxu1 %v451_v31  ;;  %v1612_v31 = vpack.c.bf16 %v322_v21, %v321_v15  ;;  %v2139_v45 = vld [vmem:[%s2762_s3 + $0x1a8] sm:$0xff]  }
 0x112   :  { %1967 = vmatpush3.bf16.msra.mxu0 %v2113_v44  ;;  %1818 = vmatprep.subr.bf16.mxu1 %v2114_v46  ;;  %v2141_v46 = vld [vmem:[%s2762_s3 + $0x1f0] sm:$0xff]  }
 0x113   :  { %1968 = vmatprep.subr.bf16.mxu0 %v2116_v47 }
 0x115   :  { %1819 = vmatpush3.bf16.msra.mxu1 %v2115_v48  ;;  %v1051_v48 = vld [vmem:[#allocation2 + $0x11] sm:$0xff] }
 0x116   :  { %1969 = vmatpush3.bf16.msra.mxu0 %v2116_v47  ;;  %1820 = vmatprep.subr.bf16.mxu1 %v2117_v49  ;;  %v2143_v47 = vld [vmem:[%s2762_s3 + $0x228] sm:$0xff]   ;;  %v2142_v49 = vld [vmem:[%s2762_s3 + $0x1b0] sm:$0xff]  }
 0x117   :  { %1970 = vmatprep.subr.bf16.mxu0 %v2119_v50 }
 0x118   :  { %703 = vmatmul.mubr.bf16.gmra.mrb[12].mxu1 %v450_v34  ;;  %v324_v34 = vld [vmem:[#allocation2 + $0x47] sm:$0xff] }
 0x119   :  { %1821 = vmatpush3.bf16.msra.mxu1 %v2118_v53  ;;  %1601 = vmatprep.mubr.msk.bf16.mxu1 %vm2449_vm2, %v1600_v57  ;;  %v1633_v20 = vpack.c.bf16 %v325_v35, %v324_v34  ;;  %v1618_v44 = vpack.c.bf16 %v324_v34, %v323_v17  ;;  %v1708_v53 = vpack.c.bf16 %v1052_v37, %v1051_v48  ;;  %v2147_v57 = vld [vmem:[%s2762_s3 + $0x238] sm:$0xff]  }
 0x11a   :  { %1971 = vmatpush3.bf16.msra.mxu0 %v2119_v50  ;;  %1822 = vmatprep.subr.bf16.mxu1 %v2120_v55  ;;  %v2144_v50 = vld [vmem:[%s2762_s3 + $0x1f8] sm:$0xff]  }
 0x11b   :  { %1972 = vmatprep.subr.bf16.mxu0 %v2122_v58  ;;  %v2145_v55 = vld [vmem:[%s2762_s3 + $0x1b8] sm:$0xff]  }
 0x11d   :  { %1823 = vmatpush3.bf16.msra.mxu1 %v2121_v62  ;;  %v1050_v62 = vld [vmem:[#allocation2 + $0x9] sm:$0xff] }
 0x11e   :  { %1973 = vmatpush3.bf16.msra.mxu0 %v2122_v58  ;;  %1860 = vmatprep.subr.bf16.mxu1 %v2123_v63  ;;  %v1054_v58 = vld [vmem:[#allocation2 + $0x29] sm:$0xff]  ;;  %v1711_v63 = vpack.c.bf16 %v1051_v48, %v1050_v62 }
 0x11f   :  { %1974 = vmatprep.subr.bf16.mxu0 %v2124_v3  ;;  %v1723_v52 = vpack.c.bf16 %v1055_v51, %v1054_v58 }
 0x120   :  { %1604 = vmatmul.mubr.msk.bf16.vlgmr.msra.gmra.mrb[16].mxu1 %vm2449_vm2, %v1603_v7  ;;  %vm1064_vm2 = vcmp.le.s32.totalorder %v252_v0, 6  ;;  %v1059_v7 = vld [vmem:[#allocation2 + $0x51] sm:$0xff] }
 0x121   :  { %1861 = vmatpush3.bf16.msra.mxu1 %v2125_v6  ;;  %1607 = vmatprep.mubr.msk.bf16.mxu1 %vm2526_vm5, %v1606_v11  ;;  %vm2712_vm4 = vmpackc.low %vm1065_vm3, %vm1064_vm2  ;;  %v1729_v6 = vpack.c.bf16 %v1057_v56, %v1056_v59  ;;  %v1741_v8 = vpack.c.bf16 %v1059_v7, %v1058_v61 }
 0x122   :  { %1975 = vmatpush3.bf16.msra.mxu0 %v2124_v3  ;;  %1862 = vmatprep.subr.bf16.mxu1 %v2126_v9  ;;  %v1714_v3 = vpack.c.bf16 %v1054_v58, %v1053_v38 }
 0x123   :  { %1984 = vmatprep.subr.bf16.mxu0 %v2543_v12 }
 0x125   :  { %1977 = vmatmul.mubr.msk.bf16.vlgmr.msra.gmra.mrb[8].mxu0 %vm2526_vm5, %v1615_v19  ;;  %1863 = vmatpush3.bf16.msra.mxu1 %v2127_v16 }
 0x126   :  { %1980 = vmatprep.mubr.msk.bf16.mxu0 %vm2562_vm8, %v1621_v26  ;;  %1985 = vmatpush3.bf16.msra.mxu0 %v2543_v12 }
 0x127   :  { %1864 = vmatprep.subr.bf16.mxu1 %v2129_v22  ;;  %1986 = vmatprep.subr.bf16.mxu0 %v2573_v23 }
 0x128   :  { %1610 = vmatmul.mubr.msk.bf16.gmra.mrb[20].mxu1 %vm2526_vm5, %v2460_v43  ;;  %v2652_v43 = vld [vmem:[%s2762_s3 + $0x220] sm:$0xff]   ;;  %vm1066_vm5 = vcmp.le.s32.totalorder %v266_v24, 6 }
 0x129   :  { %1865 = vmatpush3.bf16.msra.mxu1 %v2130_v27  ;;  %1613 = vmatprep.mubr.msk.bf16.mxu1 %vm2562_vm8, %v1612_v31  ;;  %vm2729_vm7 = vmpackc.low %vm1067_vm6, %vm1066_vm5 }
 0x12a   :  { %1987 = vmatpush3.bf16.msra.mxu0 %v2573_v23  ;;  %1866 = vmatprep.subr.bf16.mxu1 %v2132_v28 }
 0x12b   :  { %1988 = vmatprep.subr.bf16.mxu0 %v2600_v33 }
 0x12d   :  { %1981 = vmatmul.mubr.msk.bf16.gmra.mrb[12].mxu0 %vm2617_vm13, %v1633_v20  ;;  %1867 = vmatpush3.bf16.msra.mxu1 %v2133_v36 }
 0x12e   :  { %1989 = vmatpush3.bf16.msra.mxu0 %v2600_v33  ;;  %2000 = vmatprep.mubr.msk.bf16.mxu0 %vm2622_vm14, %v2634_v40 }
 0x12f   :  { %1868 = vmatprep.subr.bf16.mxu1 %v2135_v30  ;;  %1990 = vmatprep.subr.bf16.mxu0 %v2632_v39 }
 0x130   :  { %1616 = vmatmul.mubr.msk.bf16.gmra.mrb[24].mxu1 %vm2562_vm8, %v1615_v19 }
 0x131   :  { %1869 = vmatpush3.bf16.msra.mxu1 %v2136_v41  ;;  %1619 = vmatprep.mubr.msk.bf16.mxu1 %vm2617_vm13, %v1618_v44 }
 0x132   :  { %1991 = vmatpush3.bf16.msra.mxu0 %v2632_v39  ;;  %1870 = vmatprep.subr.bf16.mxu1 %v2138_v42 }
 0x133   :  { %1992 = vmatprep.subr.bf16.mxu0 %v2652_v43 }
 0x135   :  { %1871 = vmatpush3.bf16.msra.mxu1 %v2139_v45 }
 0x136   :  { %1993 = vmatpush3.bf16.msra.mxu0 %v2652_v43  ;;  %1872 = vmatprep.subr.bf16.mxu1 %v2141_v46 }
 0x137   :  { %1994 = vmatprep.subr.bf16.mxu0 %v2143_v47 }
 0x138   :  { %1622 = vmatmul.mubr.msk.bf16.gmra.mrb[28].mxu1 %vm2617_vm13, %v1621_v26 }
 0x139   :  { %1873 = vmatpush3.bf16.msra.mxu1 %v2142_v49  ;;  %1709 = vmatprep.mubr.msk.bf16.mxu1 %vm2622_vm14, %v1708_v53 }
 0x13a   :  { %1995 = vmatpush3.bf16.msra.mxu0 %v2143_v47  ;;  %1874 = vmatprep.subr.bf16.mxu1 %v2144_v50 }
 0x13b   :  { %1996 = vmatprep.subr.bf16.mxu0 %v2146_v54 }
 0x13d   :  { %1875 = vmatpush3.bf16.msra.mxu1 %v2145_v55 }
 0x13e   :  { %1997 = vmatpush3.bf16.msra.mxu0 %v2146_v54  ;;  %2008 = vmatprep.subr.bf16.mxu1 %v2543_v12 }
 0x13f   :  { %1998 = vmatprep.subr.bf16.mxu0 %v2147_v57 }
 0x140   :  { %1712 = vmatmul.mubr.msk.bf16.vlgmr.msra.gmra.mrb[32].mxu1 %vm2622_vm14, %v1711_v63 }
 0x141   :  { %2016 = vmatpush3.bf16.msra.mxu1 %v2543_v12  ;;  %1715 = vmatprep.mubr.msk.bf16.mxu1 %vm2694_vm1, %v1714_v3 }
 0x142   :  { %1999 = vmatpush3.bf16.msra.mxu0 %v2147_v57  ;;  %2009 = vmatprep.subr.bf16.mxu1 %v2573_v23 }
 0x145   :  { %2017 = vmatpush3.bf16.msra.mxu1 %v2573_v23  ;;  %2001 = vmatmul.mubr.msk.bf16.vlgmr.msra.gmra.mrb[8].mxu0 %vm2694_vm1, %v1723_v52 }
 0x146   :  { %2010 = vmatprep.subr.bf16.mxu1 %v2600_v33 }
 0x148   :  { %1718 = vmatmul.mubr.msk.bf16.gmra.mrb[36].mxu1 %vm2694_vm1, %v2634_v40 }
 0x149   :  { %2018 = vmatpush3.bf16.msra.mxu1 %v2600_v33  ;;  %1721 = vmatprep.mubr.msk.bf16.mxu1 %vm2712_vm4, %v1720_v5 }
 0x14a   :  { %2011 = vmatprep.subr.bf16.mxu1 %v2632_v39 }
 0x14d   :  { %2019 = vmatpush3.bf16.msra.mxu1 %v2632_v39 }
 0x14e   :  { %2012 = vmatprep.subr.bf16.mxu1 %v2652_v43 }
 0x150   :  { %1724 = vmatmul.mubr.msk.bf16.gmra.mrb[40].mxu1 %vm2712_vm4, %v1723_v52 }
 0x151   :  { %2020 = vmatpush3.bf16.msra.mxu1 %v2652_v43  ;;  %1727 = vmatprep.mubr.msk.bf16.mxu1 %vm2729_vm7, %v1726_v4 }
 0x152   :  { %2013 = vmatprep.subr.bf16.mxu1 %v2143_v47 }
 0x155   :  { %2021 = vmatpush3.bf16.msra.mxu1 %v2143_v47 }
 0x156   :  { %2014 = vmatprep.subr.bf16.mxu1 %v2146_v54 }
 0x158   :  { %1730 = vmatmul.mubr.msk.bf16.gmra.mrb[44].mxu1 %vm2729_vm7, %v1729_v6 }
 0x159   :  { %2022 = vmatpush3.bf16.msra.mxu1 %v2146_v54  ;;  %2004 = vmatprep.mubr.msk.bf16.mxu1 %vm2712_vm4, %v1729_v6 }
 0x15a   :  { %2015 = vmatprep.subr.bf16.mxu1 %v2147_v57 }
 0x15d   :  { %2023 = vmatpush3.bf16.msra.mxu1 %v2147_v57 }
 0x160   :  { %2005 = vmatmul.mubr.msk.bf16.vlgmr.msra.gmra.mrb[48].mxu1 %vm2729_vm7, %v1741_v8 }
 0x1d3   :  { %v1772_v9 = vpop.f32.mrb[0].mxu1 }
 0x1d4   :  { %v1773_v10 = vpop.f32.mrb[1].mxu1 }
 0x1d5   :  { %v1774_v11 = vadd.f32 %v1773_v10, %v1772_v9  ;;  %v1775_v12 = vpop.f32.mrb[2].mxu1 }
 0x1d6   :  { %v1776_v13 = vpop.f32.mrb[3].mxu1 }
 0x1d7   :  { %v1777_v14 = vadd.f32 %v1776_v13, %v1775_v12 }
 0x1db   :  { %v1778_v15 = vpop.f32.mrb[4].mxu1 }
 0x1dc   :  { %v1779_v16 = vpop.f32.mrb[5].mxu1 }
 0x1dd   :  { %v1780_v17 = vadd.f32 %v1779_v16, %v1778_v15  ;;  %v1781_v18 = vpop.f32.mrb[6].mxu1 }
 0x1de   :  { %v1782_v19 = vpop.f32.mrb[7].mxu1 }
 0x1df   :  { %v1783_v21 = vadd.f32 %v1782_v19, %v1781_v18  ;;  %v1743_v18 = vld [vmem:[%s2763_s4] ss:$0 sm:$0xff]  ;;  %s2173_s4 = smov [#allocation3]  }
 0x1e0   :  { %s1481_s26 = sshll.u32 %s2173_s4, 4  ;;  %s1482_s26 = int_to_ptr.vmem [resolvable:$true] %s1481_s26 }
 0x1e1   :  { %s2148_s27 = scalar_lea.vmem %s1482_s26, 1024  ;;  %p2153_p1 = scmp.lt.s32.totalorder %s1482_s26, %s1482_s26 }
 0x1e2   :  { %p2149_p0 = scmp.ne.s32.totalorder %s1482_s26, %s2148_s27  ;;  %p2154_p2 = scmp.lt.s32.totalorder %s2148_s27, %s2148_s27 }
 0x1e3   :  { %v1784_v22 = vpop.f32.mrb[8].mxu1 }
 0x1e4   :  { %v1785_v23 = vpop.f32.mrb[9].mxu1  ;;  %p2155_p3 = por %p2154_p2, %p2153_p1 }
 0x1e5   :  { %v1786_v24 = vadd.f32 %v1785_v23, %v1784_v22  ;;  %v1787_v25 = vpop.f32.mrb[10].mxu1 }
 0x1e6   :  { %v1788_v26 = vpop.f32.mrb[11].mxu1  ;;  %p2156_p4 = pnand %p2155_p3, %p2149_p0 }
 0x1e7   :  { %v1789_v27 = vadd.f32 %v1788_v26, %v1787_v25 }
 0x1eb   :  { %v1790_v28 = vpop.f32.mrb[12].mxu1 }
 0x1ec   :  { %v1791_v31 = vpop.f32.mrb[13].mxu1 }
 0x1ed   :  { %v1792_v32 = vadd.f32 %v1791_v31, %v1790_v28  ;;  %v1793_v33 = vpop.f32.mrb[14].mxu1 }
 0x1ee   :  { %v1794_v34 = vpop.f32.mrb[15].mxu1 }
 0x1ef   :  { %v1795_v35 = vadd.f32 %v1794_v34, %v1793_v33 }
 0x1f3   :  { %v1824_v36 = vpop.f32.mrb[16].mxu1 }
 0x1f4   :  { %v1825_v37 = vpop.f32.mrb[17].mxu1 }
 0x1f5   :  { %v1826_v38 = vadd.f32 %v1825_v37, %v1824_v36  ;;  %v1827_v2 = vpop.f32.mrb[18].mxu1 }
 0x1f6   :  { %v1828_v20 = vpop.f32.mrb[19].mxu1 }
 0x1f7   :  { %v2027_v29 = vadd.f32 %v1826_v38, %v1774_v11  ;;  %v1829_v30 = vadd.f32 %v1828_v20, %v1827_v2 }
 0x1f9   :  { %v2033_v39 = vadd.f32 %v1829_v30, %v1777_v14 }
 0x1fb   :  { %v1830_v40 = vpop.f32.mrb[20].mxu1 }
 0x1fc   :  { %v1831_v41 = vpop.f32.mrb[21].mxu1 }
 0x1fd   :  { %v1832_v42 = vadd.f32 %v1831_v41, %v1830_v40  ;;  %v1833_v44 = vpop.f32.mrb[22].mxu1 }
 0x1fe   :  { %v1834_v43 = vpop.f32.mrb[23].mxu1 }
 0x1ff   :  { %v2024_v45 = vadd.f32 %v1832_v42, %v1780_v17  ;;  %v1835_v46 = vadd.f32 %v1834_v43, %v1833_v44 }
 0x200   :  { %v1982_v47 = vpop.f32.mrb[12].mxu0 }
 0x201   :  { %v2030_v48 = vadd.f32 %v1835_v46, %v1783_v21  ;;  %v1035_v49 = vpop.f32.mrb[13].mxu0 }
 0x202   :  { %v1983_v50 = vpop.f32.mrb[14].mxu0 }
 0x203   :  { %v1038_v53 = vpop.f32.mrb[15].mxu0  ;;  %v1836_v54 = vpop.f32.mrb[24].mxu1 }
 0x204   :  { %v1837_v55 = vpop.f32.mrb[25].mxu1 }
 0x205   :  { %v1838_v57 = vadd.f32 %v1837_v55, %v1836_v54  ;;  %v1839_v58 = vpop.f32.mrb[26].mxu1 }
 0x206   :  { %v1840_v62 = vpop.f32.mrb[27].mxu1 }
 0x207   :  { %v2040_v63 = vadd.f32 %v1838_v57, %v1786_v24  ;;  %v1841_v1 = vadd.f32 %v1840_v62, %v1839_v58 }
 0x209   :  { %v2048_v3 = vadd.f32 %v1841_v1, %v1789_v27  ;;  %v2041_v51 = vadd.f32 %v2040_v63, %v1035_v49 }
 0x20b   :  { %v1842_v52 = vpop.f32.mrb[28].mxu1  ;;  %v2049_v59 = vadd.f32 %v2048_v3, %v1038_v53 }
 0x20c   :  { %v1843_v60 = vpop.f32.mrb[29].mxu1 }
 0x20d   :  { %v1844_v5 = vadd.f32 %v1843_v60, %v1842_v52  ;;  %v1845_v56 = vpop.f32.mrb[30].mxu1 }
 0x20e   :  { %v1846_v61 = vpop.f32.mrb[31].mxu1 }
 0x20f   :  { %v2036_v0 = vadd.f32 %v1844_v5, %v1792_v32  ;;  %v1847_v4 = vadd.f32 %v1846_v61, %v1845_v56 }
 0x211   :  { %v2044_v6 = vadd.f32 %v1847_v4, %v1795_v35  ;;  %v2037_v7 = vadd.f32 %v2036_v0, %v1982_v47 }
 0x213   :  { %v1876_v8 = vpop.f32.mrb[32].mxu1  ;;  %v2045_v9 = vadd.f32 %v2044_v6, %v1983_v50 }
 0x214   :  { %v1877_v10 = vpop.f32.mrb[33].mxu1 }
 0x215   :  { %v1878_v11 = vadd.f32 %v1877_v10, %v1876_v8  ;;  %v1879_v12 = vpop.f32.mrb[34].mxu1 }
 0x216   :  { %v1880_v13 = vpop.f32.mrb[35].mxu1 }
 0x217   :  { %v1881_v14 = vadd.f32 %v1880_v13, %v1879_v12  ;;  %v2028_v15 = vadd.f32 %v2027_v29, %v1878_v11 }
 0x218   :  { %v2002_v16 = vpop.f32.mrb[8].mxu0 }
 0x219   :  { %v1412_v17 = vpop.f32.mrb[9].mxu0  ;;  %v2034_v19 = vadd.f32 %v2033_v39, %v1881_v14 }
 0x21a   :  { %v2029_v21 = vadd.f32 %v2028_v15, %v1412_v17  ;;  %v2003_v22 = vpop.f32.mrb[10].mxu0 }
 0x21b   :  { %v1415_v23 = vpop.f32.mrb[11].mxu0  ;;  %v1882_v24 = vpop.f32.mrb[36].mxu1 }
 0x21c   :  { %v1458_v25 = vadd.f32 %v2029_v21, %v1743_v18  ;;  %v2035_v26 = vadd.f32 %v2034_v19, %v1415_v23  ;;  %v1883_v27 = vpop.f32.mrb[37].mxu1 }
 0x21d   :  { %v1884_v28 = vadd.f32 %v1883_v27, %v1882_v24  ;;  %v1885_v31 = vpop.f32.mrb[38].mxu1 }
 0x21e   :  { %1466 = vst [vmem:[#allocation3] sm:$0xff] %v1458_v25  ;;  %v1459_v32 = vadd.f32 %v2035_v26, %v1743_v18  ;;  %v1886_v33 = vpop.f32.mrb[39].mxu1 }
 0x21f   :  { %v2025_v34 = vadd.f32 %v2024_v45, %v1884_v28  ;;  %v1887_v35 = vadd.f32 %v1886_v33, %v1885_v31 }
 0x220   :  { %1467 = vst [vmem:[#allocation3 + $0x8] sm:$0xff] %v1459_v32 }
 0x221   :  { %v2026_v36 = vadd.f32 %v2025_v34, %v2002_v16  ;;  %v2031_v37 = vadd.f32 %v2030_v48, %v1887_v35 }
 0x223   :  { %v1460_v38 = vadd.f32 %v2026_v36, %v1743_v18  ;;  %v2032_v2 = vadd.f32 %v2031_v37, %v2003_v22  ;;  %v1888_v20 = vpop.f32.mrb[40].mxu1 }
 0x224   :  { %v1889_v29 = vpop.f32.mrb[41].mxu1 }
 0x225   :  { %1468 = vst [vmem:[#allocation3 + $0x10] sm:$0xff] %v1460_v38  ;;  %v1461_v30 = vadd.f32 %v2032_v2, %v1743_v18  ;;  %v1890_v39 = vadd.f32 %v1889_v29, %v1888_v20  ;;  %v1891_v40 = vpop.f32.mrb[42].mxu1 }
 0x226   :  { %v1892_v41 = vpop.f32.mrb[43].mxu1 }
 0x227   :  { %1469 = vst [vmem:[#allocation3 + $0x18] sm:$0xff] %v1461_v30  ;;  %v1893_v42 = vadd.f32 %v1892_v41, %v1891_v40  ;;  %v2042_v44 = vadd.f32 %v2041_v51, %v1890_v39 }
 0x229   :  { %v2050_v43 = vadd.f32 %v2049_v59, %v1893_v42 }
 0x22b   :  { %v1894_v46 = vpop.f32.mrb[44].mxu1 }
 0x22c   :  { %v1895_v47 = vpop.f32.mrb[45].mxu1 }
 0x22d   :  { %v1896_v45 = vadd.f32 %v1895_v47, %v1894_v46  ;;  %v1897_v49 = vpop.f32.mrb[46].mxu1 }
 0x22e   :  { %v1898_v50 = vpop.f32.mrb[47].mxu1 }
 0x22f   :  { %v1899_v53 = vadd.f32 %v1898_v50, %v1897_v49  ;;  %v2038_v48 = vadd.f32 %v2037_v7, %v1896_v45 }
 0x231   :  { %v2046_v54 = vadd.f32 %v2045_v9, %v1899_v53 }
 0x233   :  { %v2006_v55 = vpop.f32.mrb[48].mxu1 }
 0x234   :  { %v2039_v57 = vadd.f32 %v2038_v48, %v2006_v55  ;;  %v1428_v58 = vpop.f32.mrb[49].mxu1 }
 0x235   :  { %v2043_v62 = vadd.f32 %v2042_v44, %v1428_v58  ;;  %v2007_v63 = vpop.f32.mrb[50].mxu1 }
 0x236   :  { %v1464_v1 = vadd.f32 %v2039_v57, %v1743_v18  ;;  %v2047_v3 = vadd.f32 %v2046_v54, %v2007_v63  ;;  %v1431_v52 = vpop.f32.mrb[51].mxu1 }
 0x237   :  { %v1462_v51 = vadd.f32 %v2043_v62, %v1743_v18  ;;  %v2051_v59 = vadd.f32 %v2050_v43, %v1431_v52 }
 0x238   :  { %1472 = vst [vmem:[#allocation3 + $0x30] sm:$0xff] %v1464_v1  ;;  %v1465_v60 = vadd.f32 %v2047_v3, %v1743_v18 }
 0x239   :  { %1470 = vst [vmem:[#allocation3 + $0x20] sm:$0xff] %v1462_v51  ;;  %v1463_v5 = vadd.f32 %v2051_v59, %v1743_v18 }
 0x23a   :  { %1473 = vst [vmem:[#allocation3 + $0x38] sm:$0xff] %v1465_v60 }
 0x23b   :  { %1471 = vst [vmem:[#allocation3 + $0x28] sm:$0xff] %v1463_v5 }
 0x23c   :  { %2159 = shalt.err (!%p2156_p4)
}
 0x23d   :  { %s2160_s30 = scalar_lea.hbm %s2766_s7, 1024 }
 0x23e   :  { %p2161_p5 = scmp.ne.s32.totalorder %s2766_s7, %s2160_s30  ;;  %p2164_p6 = scmp.lt.u32.totalorder %s2160_s30, %s2766_s7 }
 0x240   :  { %p2166_p7 = pnand %p2164_p6, %p2161_p5 }
 0x242   :  { %2169 = shalt.err (!%p2166_p7)
}
 0x243   :  { %s2174_s0 = smov 128   ;;  %s2175_s11 = smov 8  }
 0x244   :  { %1487 = dma.vmem_to_hbm [thread:$0]  %s1482_s26, 1024, %s2766_s7, [#allocation4], %s2174_s0, %s2174_s0, %s2175_s11  }
 0x245   :  { %2170 = dma.done.wait [#allocation4], 1024  }
 0x246   :  { %2171 = vsyncadd [#allocation4], 4294966272 }
 0x247   :  { %1493 = vsyncpa [#allocation4], 1 }

// kernel: fpn_forward.3
= control target key start
LH: loop header
LB: loop body
LE: loop exit
PB: predicated region body
PF: predicated region fallthrough
CT: control target
= control target key end

     0   :  { %13 = vsyncpa [#allocation4], 0  ;;  %s2117_s0 = inlined_call_operand.vmem [shape: f32[16,512], index: 0, kind: input, shape index: {}]   ;;  %s2118_s1 = inlined_call_operand.hbm [shape: bf16[512,128], index: 1, kind: input, shape index: {}]   ;;  %s2119_s2 = inlined_call_operand.vmem [shape: f32[1,128], index: 2, kind: input, shape index: {}]   ;;  %s2120_s3 = inlined_call_operand.hbm [shape: bf16[3,384,128], index: 3, kind: input, shape index: {}]   ;;  %s2121_s4 = inlined_call_operand.vmem [shape: f32[1,128], index: 4, kind: input, shape index: {}]   ;;  %s2122_s5 = inlined_call_operand.vmem [shape: f32[16,128], index: 5, kind: output, shape index: {0}]   ;;  %s2123_s6 = inlined_call_operand.hbm [shape: f32[16,128], index: 6, kind: output, shape index: {1}]   ;;  %s2124_s7 = inlined_call_operand.hbm [shape: f32[4,128], index: 7, kind: output, shape index: {2}]  }
   0x1   :  { %14 = vsyncpa [#allocation7], 0 }
   0x2   :  { %15 = vsyncpa [#allocation5], 0 }
   0x3   :  { %16 = vsyncpa [#allocation10], 0  ;;  %s1917_s24 = smov [#allocation3]   ;;  %s1821_s28 = scalar_lea.hbm %s2118_s1, 4096 }
   0x4   :  { %s24_s25 = sshll.u32 %s1917_s24, 4  ;;  %p1822_p0 = scmp.ne.s32.totalorder %s2118_s1, %s1821_s28  ;;  %s25_s25 = int_to_ptr.vmem [resolvable:$true] %s24_s25 }
   0x5   :  { %p1825_p1 = scmp.lt.u32.totalorder %s1821_s28, %s2118_s1 }
   0x7   :  { %p1827_p2 = pnand %p1825_p1, %p1822_p0 }
   0x9   :  { %1830 = shalt.err (!%p1827_p2)
}
   0xa   :  { %s1831_s10 = scalar_lea.vmem %s25_s25, 4096  ;;  %p1836_p4 = scmp.lt.s32.totalorder %s25_s25, %s25_s25 }
   0xb   :  { %p1832_p3 = scmp.ne.s32.totalorder %s25_s25, %s1831_s10  ;;  %p1837_p5 = scmp.lt.s32.totalorder %s1831_s10, %s1831_s10 }
   0xd   :  { %p1838_p6 = por %p1837_p5, %p1836_p4 }
   0xf   :  { %p1839_p7 = pnand %p1838_p6, %p1832_p3 }
  0x11   :  { %1842 = shalt.err (!%p1839_p7)
}
  0x12   :  { %s1918_s11 = smov 64   ;;  %s1919_s12 = smov 4  }
  0x13   :  { %30 = dma.hbm_to_vmem [thread:$0]  %s2118_s1, 4096, %s25_s25, [#allocation4], %s1918_s11, %s1918_s11, %s1919_s12  }
  0x14   :  { %s1920_s15 = smov [#allocation6]   ;;  %s1843_s19 = scalar_lea.hbm %s2120_s3, 9216 }
  0x15   :  { %s38_s16 = sshll.u32 %s1920_s15, 4  ;;  %p1844_p8 = scmp.ne.s32.totalorder %s2120_s3, %s1843_s19  ;;  %s39_s16 = int_to_ptr.vmem [resolvable:$true] %s38_s16 }
  0x16   :  { %p1847_p9 = scmp.lt.u32.totalorder %s1843_s19, %s2120_s3 }
  0x18   :  { %p1849_p10 = pnand %p1847_p9, %p1844_p8 }
  0x1a   :  { %1852 = shalt.err (!%p1849_p10)
}
  0x1b   :  { %s1853_s24 = scalar_lea.vmem %s39_s16, 9216  ;;  %p1858_p12 = scmp.lt.s32.totalorder %s39_s16, %s39_s16 }
  0x1c   :  { %p1854_p11 = scmp.ne.s32.totalorder %s39_s16, %s1853_s24  ;;  %p1859_p13 = scmp.lt.s32.totalorder %s1853_s24, %s1853_s24 }
  0x1e   :  { %p1860_p0 = por %p1859_p13, %p1858_p12 }
  0x20   :  { %p1861_p1 = pnand %p1860_p0, %p1854_p11 }
  0x22   :  { %1864 = shalt.err (!%p1861_p1)
}
  0x23   :  { %44 = dma.hbm_to_vmem [thread:$0]  %s2120_s3, 9216, %s39_s16, [#allocation7], %s1918_s11, %s1918_s11, %s1919_s12  }
  0x24   :  { %1909 = dma.done.wait [#allocation4], 4096  }
  0x25   :  { %1910 = vsyncadd [#allocation4], 4294963200 }
  0x26   :  { %1911 = dma.done.wait [#allocation7], 9216  }
  0x27   :  { %1912 = vsyncadd [#allocation7], 4294958080  ;;  %v1921_v0 = vmov 0.0   ;;  %v1716_v1 = vld [vmem:[#allocation3 + $0x40] sm:$0xff]   ;;  %v1720_v5 = vld [vmem:[#allocation3 + $0x48] sm:$0xff]   ;;  %vm1922_vm0 = vmmov 0  }
  0x28   :  { %413 = vst [vmem:[#allocation2] sm:$0xff] %v1921_v0  ;;  %414 = vst [vmem:[#allocation2 + $0x18] sm:$0xff] %v1921_v0  ;;  %v1717_v2 = vld [vmem:[#allocation3 + $0xc0] sm:$0xff]   ;;  %1509 = vmatprep.subr.bf16.mxu0 %v1716_v1  ;;  %v1721_v6 = vld [vmem:[#allocation3 + $0xc8] sm:$0xff]   ;;  %s1923_s23 = smov [#allocation8]  }
  0x29   :  { %v1718_v3 = vld [vmem:[#allocation3] sm:$0xff]   ;;  %1531 = vmatprep.subr.bf16.mxu1 %v1717_v2  ;;  %v1722_v7 = vld [vmem:[#allocation3 + $0x8] sm:$0xff]   ;;  %v1724_v9 = vld [vmem:[#allocation3 + $0x50] sm:$0xff]   ;;  %s1356_s24 = sshll.u32 %s1923_s23, 4  ;;  %s1357_s24 = int_to_ptr.vmem [resolvable:$true] %s1356_s24 }
  0x2a   :  { %v1719_v4 = vld [vmem:[#allocation3 + $0x80] sm:$0xff]   ;;  %1510 = vmatpush3.bf16.msra.mxu0 %v1718_v3  ;;  %v1723_v8 = vld [vmem:[#allocation3 + $0x88] sm:$0xff]   ;;  %v1725_v10 = vld [vmem:[#allocation3 + $0xd0] sm:$0xff]   ;;  %s1865_s1 = scalar_lea.vmem %s1357_s24, 256  ;;  %p1870_p3 = scmp.lt.s32.totalorder %s1357_s24, %s1357_s24 }
  0x2b   :  { %1532 = vmatpush3.bf16.msra.mxu1 %v1719_v4  ;;  %1511 = vmatprep.subr.bf16.mxu0 %v1720_v5  ;;  %v1726_v11 = vld [vmem:[#allocation3 + $0x10] sm:$0xff]   ;;  %v1728_v13 = vld [vmem:[#allocation3 + $0x58] sm:$0xff]   ;;  %v1732_v17 = vld [vmem:[#allocation3 + $0x60] sm:$0xff]   ;;  %p1866_p2 = scmp.ne.s32.totalorder %s1357_s24, %s1865_s1  ;;  %p1871_p4 = scmp.lt.s32.totalorder %s1865_s1, %s1865_s1 }
  0x2c   :  { %1533 = vmatprep.subr.bf16.mxu1 %v1721_v6  ;;  %v1727_v12 = vld [vmem:[#allocation3 + $0x90] sm:$0xff]   ;;  %v1729_v14 = vld [vmem:[#allocation3 + $0xd8] sm:$0xff]   ;;  %v1733_v18 = vld [vmem:[#allocation3 + $0xe0] sm:$0xff]  }
  0x2d   :  { %v1730_v15 = vld [vmem:[#allocation3 + $0x18] sm:$0xff]   ;;  %v1734_v19 = vld [vmem:[#allocation3 + $0x20] sm:$0xff]   ;;  %v1736_v21 = vld [vmem:[#allocation3 + $0x68] sm:$0xff]   ;;  %p1872_p5 = por %p1871_p4, %p1870_p3 }
  0x2e   :  { %1512 = vmatpush3.bf16.msra.mxu0 %v1722_v7  ;;  %v1731_v16 = vld [vmem:[#allocation3 + $0x98] sm:$0xff]   ;;  %v1735_v20 = vld [vmem:[#allocation3 + $0xa0] sm:$0xff]   ;;  %v1737_v22 = vld [vmem:[#allocation3 + $0xe8] sm:$0xff]  }
  0x2f   :  { %1534 = vmatpush3.bf16.msra.mxu1 %v1723_v8  ;;  %1513 = vmatprep.subr.bf16.mxu0 %v1724_v9  ;;  %v1738_v23 = vld [vmem:[#allocation3 + $0x28] sm:$0xff]   ;;  %v1740_v25 = vld [vmem:[#allocation3 + $0x70] sm:$0xff]   ;;  %v1744_v29 = vld [vmem:[#allocation3 + $0x78] sm:$0xff]   ;;  %v417_v8 = vlaneseq  ;;  %p1873_p6 = pnand %p1872_p5, %p1866_p2 }
  0x30   :  { %1535 = vmatprep.subr.bf16.mxu1 %v1725_v10  ;;  %v1739_v24 = vld [vmem:[#allocation3 + $0xa8] sm:$0xff]   ;;  %v1741_v26 = vld [vmem:[#allocation3 + $0xf0] sm:$0xff]   ;;  %v1745_v30 = vld [vmem:[#allocation3 + $0xf8] sm:$0xff]  }
  0x31   :  { %v1742_v27 = vld [vmem:[#allocation3 + $0x30] sm:$0xff]   ;;  %v1746_v31 = vld [vmem:[#allocation3 + $0x38] sm:$0xff]   ;;  %v55_v33 = vld [vmem:[%s2117_s0 + $0x8] sm:$0xff] }
  0x32   :  { %1514 = vmatpush3.bf16.msra.mxu0 %v1726_v11  ;;  %v1743_v28 = vld [vmem:[#allocation3 + $0xb0] sm:$0xff]   ;;  %v1747_v32 = vld [vmem:[#allocation3 + $0xb8] sm:$0xff]   ;;  %v59_v34 = vld [vmem:[%s2117_s0 + $0x28] sm:$0xff] }
  0x33   :  { %1536 = vmatpush3.bf16.msra.mxu1 %v1727_v12  ;;  %1515 = vmatprep.subr.bf16.mxu0 %v1728_v13  ;;  %v57_v35 = vld [vmem:[%s2117_s0 + $0x18] sm:$0xff]  ;;  %v63_v36 = vpack.c.bf16 %v59_v34, %v55_v33  ;;  %v54_v38 = vld [vmem:[%s2117_s0] sm:$0xff]  ;;  %v56_v42 = vld [vmem:[%s2117_s0 + $0x10] sm:$0xff] }
  0x34   :  { %1537 = vmatprep.subr.bf16.mxu1 %v1729_v14  ;;  %v61_v37 = vld [vmem:[%s2117_s0 + $0x38] sm:$0xff]  ;;  %v58_v39 = vld [vmem:[%s2117_s0 + $0x20] sm:$0xff]  ;;  %v60_v43 = vld [vmem:[%s2117_s0 + $0x30] sm:$0xff] }
  0x35   :  { %v65_v40 = vpack.c.bf16 %v61_v37, %v57_v35  ;;  %v62_v41 = vpack.c.bf16 %v58_v39, %v54_v38  ;;  %361 = vmatprep.mubr.bf16.mxu0 %v63_v36  ;;  %v64_v44 = vpack.c.bf16 %v60_v43, %v56_v42  ;;  %v1748_v45 = vld [vmem:[#allocation6 + $0x100] sm:$0xff]   ;;  %v1751_v48 = vld [vmem:[#allocation6 + $0x108] sm:$0xff]   ;;  %v1754_v51 = vld [vmem:[#allocation6 + $0x110] sm:$0xff]  }
  0x36   :  { %1516 = vmatpush3.bf16.msra.mxu0 %v1730_v15  ;;  %v1749_v46 = vld [vmem:[#allocation6 + $0x140] sm:$0xff]   ;;  %v1752_v49 = vld [vmem:[#allocation6 + $0x148] sm:$0xff]   ;;  %v1755_v52 = vld [vmem:[#allocation6 + $0x150] sm:$0xff]  }
  0x37   :  { %1538 = vmatpush3.bf16.msra.mxu1 %v1731_v16  ;;  %1517 = vmatprep.subr.bf16.mxu0 %v1732_v17  ;;  %v1750_v47 = vld [vmem:[#allocation6 + $0xc0] sm:$0xff]   ;;  %v1753_v50 = vld [vmem:[#allocation6 + $0xc8] sm:$0xff]   ;;  %v1756_v53 = vld [vmem:[#allocation6 + $0xd0] sm:$0xff]  }
  0x38   :  { %1539 = vmatprep.subr.bf16.mxu1 %v1733_v18  ;;  %402 = vmatprep.mubr.bf16.mxu1 %v65_v40  ;;  %v1757_v54 = vld [vmem:[#allocation6 + $0x118] sm:$0xff]   ;;  %v1760_v57 = vld [vmem:[#allocation6 + $0x120] sm:$0xff]   ;;  %v1763_v60 = vld [vmem:[#allocation6 + $0x128] sm:$0xff]  }
  0x39   :  { %v1758_v55 = vld [vmem:[#allocation6 + $0x158] sm:$0xff]   ;;  %v1761_v58 = vld [vmem:[#allocation6 + $0x160] sm:$0xff]   ;;  %v1764_v61 = vld [vmem:[#allocation6 + $0x168] sm:$0xff]  }
  0x3a   :  { %1518 = vmatpush3.bf16.msra.mxu0 %v1734_v19  ;;  %v1759_v56 = vld [vmem:[#allocation6 + $0xd8] sm:$0xff]   ;;  %v1762_v59 = vld [vmem:[#allocation6 + $0xe0] sm:$0xff]   ;;  %v1765_v62 = vld [vmem:[#allocation6 + $0xe8] sm:$0xff]  }
  0x3b   :  { %1540 = vmatpush3.bf16.msra.mxu1 %v1735_v20  ;;  %1519 = vmatprep.subr.bf16.mxu0 %v1736_v21  ;;  %v1766_v63 = vld [vmem:[#allocation6 + $0x130] sm:$0xff]   ;;  %v1769_v3 = vld [vmem:[#allocation6 + $0x138] sm:$0xff]   ;;  %v1772_v6 = vld [vmem:[#allocation6 + $0x40] sm:$0xff]   ;;  %v2031_v21 = vshrl.u32 %v417_v8, 7 }
  0x3c   :  { %1541 = vmatprep.subr.bf16.mxu1 %v1737_v22  ;;  %v1767_v1 = vld [vmem:[#allocation6 + $0x170] sm:$0xff]   ;;  %v1770_v4 = vld [vmem:[#allocation6 + $0x178] sm:$0xff]   ;;  %v1385_v10 = vld [vmem:[%s2119_s2] ss:$0 sm:$0xff] }
  0x3d   :  { %v1768_v2 = vld [vmem:[#allocation6 + $0xf0] sm:$0xff]   ;;  %v1771_v5 = vld [vmem:[#allocation6 + $0xf8] sm:$0xff]   ;;  %v1776_v42 = vld [vmem:[#allocation6 + $0x88] sm:$0xff]  }
  0x3e   :  { %1520 = vmatpush3.bf16.msra.mxu0 %v1738_v23  ;;  %v1777_v43 = vld [vmem:[#allocation6 + $0x8] sm:$0xff]  }
  0x3f   :  { %1542 = vmatpush3.bf16.msra.mxu1 %v1739_v24  ;;  %1521 = vmatprep.subr.bf16.mxu0 %v1740_v25 }
  0x40   :  { %1543 = vmatprep.subr.bf16.mxu1 %v1741_v26  ;;  %v2037_v26 = vadd.s32 8, %v2031_v21 }
  0x42   :  { %1522 = vmatpush3.bf16.msra.mxu0 %v1742_v27 }
  0x43   :  { %1544 = vmatpush3.bf16.msra.mxu1 %v1743_v28  ;;  %1523 = vmatprep.subr.bf16.mxu0 %v1744_v29  ;;  %v424_v28 = vand.u32 3, %v2031_v21  ;;  %v431_v29 = vand.u32 3, %v2037_v26  ;;  %v1809_v21 = vld [vmem:[#allocation6 + $0x220] sm:$0xff]   ;;  %v1814_v26 = vld [vmem:[#allocation6 + $0x1f0] sm:$0xff]  }
  0x44   :  { %1545 = vmatprep.subr.bf16.mxu1 %v1745_v30  ;;  %v1773_v30 = vld [vmem:[#allocation6 + $0x80] sm:$0xff]  }
  0x45   :  { %vm449_vm1 = vcmp.ge.s32.totalorder %v424_v28, 1  ;;  %vm450_vm2 = vcmp.ge.s32.totalorder %v431_v29, 1  ;;  %vm1026_vm4 = vcmp.le.s32.totalorder %v424_v28, 2  ;;  %vm1027_vm5 = vcmp.le.s32.totalorder %v431_v29, 2  ;;  %v1816_v28 = vld [vmem:[#allocation6 + $0x1b0] sm:$0xff]   ;;  %v1817_v29 = vld [vmem:[#allocation6 + $0x1f8] sm:$0xff]  }
  0x46   :  { %1524 = vmatpush3.bf16.msra.mxu0 %v1746_v31  ;;  %vm2048_vm3 = vmpackc.low %vm450_vm2, %vm449_vm1 }
  0x47   :  { %1546 = vmatpush3.bf16.msra.mxu1 %v1747_v32  ;;  %1553 = vmatprep.subr.bf16.mxu0 %v1748_v45  ;;  %v1774_v32 = vld [vmem:[#allocation6] sm:$0xff]   ;;  %v1779_v45 = vld [vmem:[#allocation6 + $0x90] sm:$0xff]   ;;  %vm2068_vm6 = vmpackc.low %vm1027_vm5, %vm1026_vm4 }
  0x48   :  { %1646 = vmatprep.subr.bf16.mxu1 %v1921_v0 }
  0x49   :  { %362 = vmatmul.mubr.bf16.vlgmr.msra.gmra.mrb[0].mxu0 %v62_v41  ;;  %v1775_v41 = vld [vmem:[#allocation6 + $0x48] sm:$0xff]  }
  0x4a   :  { %403 = vmatmul.mubr.bf16.vlgmr.msra.gmra.mrb[0].mxu1 %v64_v44  ;;  %1554 = vmatpush3.bf16.msra.mxu0 %v1750_v47  ;;  %v1778_v44 = vld [vmem:[#allocation6 + $0x50] sm:$0xff]   ;;  %v1781_v47 = vld [vmem:[#allocation6 + $0x58] sm:$0xff]  }
  0x4b   :  { %1647 = vmatpush3.bf16.msra.mxu1 %v1749_v46  ;;  %1555 = vmatprep.subr.bf16.mxu0 %v1751_v48  ;;  %v1780_v46 = vld [vmem:[#allocation6 + $0x10] sm:$0xff]   ;;  %v1782_v48 = vld [vmem:[#allocation6 + $0x98] sm:$0xff]  }
  0x4c   :  { %1648 = vmatprep.subr.bf16.mxu1 %v1921_v0  ;;  %1662 = vmatprep.mubr.msk.bf16.mxu1 %vm1922_vm0, %v1921_v0 }
  0x4e   :  { %1556 = vmatpush3.bf16.msra.mxu0 %v1753_v50  ;;  %v1784_v50 = vld [vmem:[#allocation6 + $0x60] sm:$0xff]  }
  0x4f   :  { %1649 = vmatpush3.bf16.msra.mxu1 %v1752_v49  ;;  %1557 = vmatprep.subr.bf16.mxu0 %v1754_v51  ;;  %v1783_v49 = vld [vmem:[#allocation6 + $0x18] sm:$0xff]   ;;  %v1785_v51 = vld [vmem:[#allocation6 + $0xa0] sm:$0xff]  }
  0x50   :  { %1650 = vmatprep.subr.bf16.mxu1 %v1921_v0 }
  0x52   :  { %1558 = vmatpush3.bf16.msra.mxu0 %v1756_v53  ;;  %v1787_v53 = vld [vmem:[#allocation6 + $0x68] sm:$0xff]  }
  0x53   :  { %1651 = vmatpush3.bf16.msra.mxu1 %v1755_v52  ;;  %1559 = vmatprep.subr.bf16.mxu0 %v1757_v54  ;;  %v1786_v52 = vld [vmem:[#allocation6 + $0x20] sm:$0xff]   ;;  %v1788_v54 = vld [vmem:[#allocation6 + $0xa8] sm:$0xff]  }
  0x54   :  { %1652 = vmatprep.subr.bf16.mxu1 %v1921_v0 }
  0x56   :  { %1560 = vmatpush3.bf16.msra.mxu0 %v1759_v56  ;;  %v1790_v56 = vld [vmem:[#allocation6 + $0x70] sm:$0xff]  }
  0x57   :  { %1653 = vmatpush3.bf16.msra.mxu1 %v1758_v55  ;;  %1561 = vmatprep.subr.bf16.mxu0 %v1760_v57  ;;  %v1789_v55 = vld [vmem:[#allocation6 + $0x28] sm:$0xff]   ;;  %v1791_v57 = vld [vmem:[#allocation6 + $0xb0] sm:$0xff]  }
  0x58   :  { %1654 = vmatprep.subr.bf16.mxu1 %v1921_v0 }
  0x5a   :  { %1562 = vmatpush3.bf16.msra.mxu0 %v1762_v59  ;;  %v1793_v59 = vld [vmem:[#allocation6 + $0x78] sm:$0xff]  }
  0x5b   :  { %1655 = vmatpush3.bf16.msra.mxu1 %v1761_v58  ;;  %1563 = vmatprep.subr.bf16.mxu0 %v1763_v60  ;;  %v1792_v58 = vld [vmem:[#allocation6 + $0x30] sm:$0xff]   ;;  %v1794_v60 = vld [vmem:[#allocation6 + $0xb8] sm:$0xff]  }
  0x5c   :  { %1656 = vmatprep.subr.bf16.mxu1 %v1921_v0 }
  0x5e   :  { %1564 = vmatpush3.bf16.msra.mxu0 %v1765_v62  ;;  %v1796_v62 = vld [vmem:[#allocation6 + $0x1c0] sm:$0xff]  }
  0x5f   :  { %1657 = vmatpush3.bf16.msra.mxu1 %v1764_v61  ;;  %1565 = vmatprep.subr.bf16.mxu0 %v1766_v63  ;;  %v1795_v61 = vld [vmem:[#allocation6 + $0x38] sm:$0xff]  }
  0x60   :  { %1658 = vmatprep.subr.bf16.mxu1 %v1921_v0 }
  0x62   :  { %1566 = vmatpush3.bf16.msra.mxu0 %v1768_v2  ;;  %v1797_v2 = vld [vmem:[#allocation6 + $0x200] sm:$0xff]  }
  0x63   :  { %1659 = vmatpush3.bf16.msra.mxu1 %v1767_v1  ;;  %1567 = vmatprep.subr.bf16.mxu0 %v1769_v3  ;;  %v1798_v3 = vld [vmem:[#allocation6 + $0x180] sm:$0xff]  }
  0x64   :  { %1660 = vmatprep.subr.bf16.mxu1 %v1921_v0 }
  0x66   :  { %1568 = vmatpush3.bf16.msra.mxu0 %v1771_v5 }
  0x67   :  { %1661 = vmatpush3.bf16.msra.mxu1 %v1770_v4  ;;  %1584 = vmatprep.subr.bf16.mxu0 %v1772_v6 }
  0x68   :  { %1666 = vmatprep.subr.bf16.mxu1 %v1921_v0 }
 0x11c   :  { %v1525_v7 = vpop.f32.mrb[0].mxu0 }
 0x11d   :  { %v1547_v9 = vpop.f32.mrb[0].mxu1  ;;  %v1526_v11 = vpop.f32.mrb[1].mxu0 }
 0x11e   :  { %v1527_v12 = vadd.f32 %v1526_v11, %v1525_v7  ;;  %v1548_v13 = vpop.f32.mrb[1].mxu1  ;;  %v1528_v14 = vpop.f32.mrb[2].mxu0 }
 0x11f   :  { %v1549_v15 = vadd.f32 %v1548_v13, %v1547_v9  ;;  %v1550_v16 = vpop.f32.mrb[2].mxu1  ;;  %v1529_v17 = vpop.f32.mrb[3].mxu0  ;;  %v1801_v13 = vld [vmem:[#allocation6 + $0x188] sm:$0xff]  }
 0x120   :  { %v364_v18 = vadd.f32 %v1527_v12, %v1385_v10  ;;  %v1530_v19 = vadd.f32 %v1529_v17, %v1528_v14  ;;  %v1551_v20 = vpop.f32.mrb[3].mxu1  ;;  %v1800_v12 = vld [vmem:[#allocation6 + $0x208] sm:$0xff]   ;;  %v1802_v14 = vld [vmem:[#allocation6 + $0x1d0] sm:$0xff]   ;;  %v1805_v17 = vld [vmem:[#allocation6 + $0x1d8] sm:$0xff]  }
 0x121   :  { %v1552_v22 = vadd.f32 %v1551_v20, %v1550_v16  ;;  %v1804_v16 = vld [vmem:[#allocation6 + $0x190] sm:$0xff]   ;;  %v1808_v20 = vld [vmem:[#allocation6 + $0x1e0] sm:$0xff]  }
 0x122   :  { %v405_v23 = vadd.f32 %v1549_v15, %v364_v18  ;;  %v367_v24 = vadd.f32 %v1530_v19, %v1385_v10  ;;  %v1799_v10 = vld [vmem:[#allocation6 + $0x1c8] sm:$0xff]   ;;  %v1803_v15 = vld [vmem:[#allocation6 + $0x210] sm:$0xff]   ;;  %v1806_v18 = vld [vmem:[#allocation6 + $0x218] sm:$0xff]  }
 0x123   :  { %v1807_v19 = vld [vmem:[#allocation6 + $0x198] sm:$0xff]  }
 0x124   :  { %411 = vst [vmem:[%s2122_s5] sm:$0xff] %v405_v23  ;;  %415 = vst [vmem:[#allocation2 + $0x8] sm:$0xff] %v405_v23  ;;  %v408_v25 = vadd.f32 %v1552_v22, %v367_v24  ;;  %v1810_v22 = vld [vmem:[#allocation6 + $0x1a0] sm:$0xff]   ;;  %v1812_v24 = vld [vmem:[#allocation6 + $0x228] sm:$0xff]  }
 0x126   :  { %412 = vst [vmem:[%s2122_s5 + $0x8] sm:$0xff] %v408_v25  ;;  %416 = vst [vmem:[#allocation2 + $0x10] sm:$0xff] %v408_v25  ;;  %v518_v27 = vpack.c.bf16 %v408_v25, %v405_v23  ;;  %v1811_v23 = vld [vmem:[#allocation6 + $0x1e8] sm:$0xff]  }
 0x127   :  { %v1813_v25 = vld [vmem:[#allocation6 + $0x1a8] sm:$0xff]  }
 0x128   :  { %745 = vmatprep.mubr.bf16.mxu0 %v518_v27  ;;  %v1815_v27 = vld [vmem:[#allocation6 + $0x230] sm:$0xff]  }
 0x12b   :  { %v512_v31 = vld [vmem:[#allocation2 + $0x4] sm:$0xff] }
 0x12c   :  { %v446_v33 = vld [vmem:[#allocation2 + $0x7] sm:$0xff] }
 0x12d   :  { %v513_v34 = vld [vmem:[#allocation2 + $0xc] sm:$0xff]  ;;  %v516_v35 = vld [vmem:[#allocation2 + $0x14] sm:$0xff]  ;;  %v444_v4 = vld [vmem:[#allocation2 + $0x3] sm:$0xff] }
 0x12e   :  { %v447_v36 = vld [vmem:[#allocation2 + $0xf] sm:$0xff]  ;;  %v519_v37 = vpack.c.bf16 %v516_v35, %v513_v34  ;;  %v517_v38 = vpack.c.bf16 %v513_v34, %v512_v31  ;;  %v1819_v31 = vld [vmem:[#allocation6 + $0x1b8] sm:$0xff]   ;;  %v1021_v35 = vld [vmem:[#allocation2 + $0x5] sm:$0xff] }
 0x12f   :  { %v1467_v39 = vpack.c.bf16 %v447_v36, %v446_v33  ;;  %v445_v63 = vld [vmem:[#allocation2 + $0xb] sm:$0xff]  ;;  %v448_v1 = vld [vmem:[#allocation2 + $0x13] sm:$0xff] }
 0x130   :  { %1663 = vmatmul.mubr.bf16.vlgmr.msra.gmra.mrb[4].mxu1 %v519_v37  ;;  %746 = vmatmul.mubr.bf16.vlgmr.msra.gmra.mrb[4].mxu0 %v517_v38  ;;  %v1023_v5 = vld [vmem:[#allocation2 + $0x9] sm:$0xff]  ;;  %v1024_v6 = vld [vmem:[#allocation2 + $0x11] sm:$0xff]  ;;  %v1473_v7 = vpack.c.bf16 %v448_v1, %v445_v63  ;;  %v1470_v8 = vpack.c.bf16 %v445_v63, %v444_v4 }
 0x131   :  { %1667 = vmatpush3.bf16.msra.mxu1 %v1773_v30  ;;  %1585 = vmatpush3.bf16.msra.mxu0 %v1774_v32  ;;  %v1500_v11 = vpack.c.bf16 %v1024_v6, %v1023_v5  ;;  %v1818_v30 = vld [vmem:[#allocation6 + $0x238] sm:$0xff]   ;;  %v1820_v32 = vld [vmem:[#allocation2] sm:$0xff]  ;;  %v1022_v33 = vld [vmem:[#allocation2 + $0xd] sm:$0xff] }
 0x132   :  { %1468 = vmatprep.mubr.msk.bf16.mxu0 %vm2048_vm3, %v1467_v39  ;;  %1668 = vmatprep.subr.bf16.mxu1 %v1921_v0  ;;  %v1025_v34 = vld [vmem:[#allocation2 + $0x15] sm:$0xff]  ;;  %v1503_v37 = vpack.c.bf16 %v1022_v33, %v1021_v35 }
 0x133   :  { %1586 = vmatprep.subr.bf16.mxu0 %v1775_v41  ;;  %1682 = vmatprep.mubr.msk.bf16.mxu1 %vm1922_vm0, %v1921_v0  ;;  %v1506_v36 = vpack.c.bf16 %v1025_v34, %v1022_v33 }
 0x135   :  { %1669 = vmatpush3.bf16.msra.mxu1 %v1776_v42  ;;  %1587 = vmatpush3.bf16.msra.mxu0 %v1777_v43 }
 0x136   :  { %1670 = vmatprep.subr.bf16.mxu1 %v1921_v0  ;;  %1588 = vmatprep.subr.bf16.mxu0 %v1778_v44 }
 0x139   :  { %1671 = vmatpush3.bf16.msra.mxu1 %v1779_v45  ;;  %1589 = vmatpush3.bf16.msra.mxu0 %v1780_v46 }
 0x13a   :  { %1672 = vmatprep.subr.bf16.mxu1 %v1921_v0  ;;  %1590 = vmatprep.subr.bf16.mxu0 %v1781_v47 }
 0x13d   :  { %1673 = vmatpush3.bf16.msra.mxu1 %v1782_v48  ;;  %1591 = vmatpush3.bf16.msra.mxu0 %v1783_v49 }
 0x13e   :  { %1674 = vmatprep.subr.bf16.mxu1 %v1921_v0  ;;  %1592 = vmatprep.subr.bf16.mxu0 %v1784_v50 }
 0x141   :  { %1675 = vmatpush3.bf16.msra.mxu1 %v1785_v51  ;;  %1593 = vmatpush3.bf16.msra.mxu0 %v1786_v52 }
 0x142   :  { %1676 = vmatprep.subr.bf16.mxu1 %v1921_v0  ;;  %1594 = vmatprep.subr.bf16.mxu0 %v1787_v53 }
 0x145   :  { %1677 = vmatpush3.bf16.msra.mxu1 %v1788_v54  ;;  %1595 = vmatpush3.bf16.msra.mxu0 %v1789_v55 }
 0x146   :  { %1678 = vmatprep.subr.bf16.mxu1 %v1921_v0  ;;  %1596 = vmatprep.subr.bf16.mxu0 %v1790_v56 }
 0x149   :  { %1679 = vmatpush3.bf16.msra.mxu1 %v1791_v57  ;;  %1597 = vmatpush3.bf16.msra.mxu0 %v1792_v58 }
 0x14a   :  { %1680 = vmatprep.subr.bf16.mxu1 %v1921_v0  ;;  %1598 = vmatprep.subr.bf16.mxu0 %v1793_v59 }
 0x14d   :  { %1681 = vmatpush3.bf16.msra.mxu1 %v1794_v60  ;;  %1599 = vmatpush3.bf16.msra.mxu0 %v1795_v61 }
 0x14e   :  { %1686 = vmatprep.subr.bf16.mxu1 %v1921_v0  ;;  %1615 = vmatprep.subr.bf16.mxu0 %v1796_v62 }
 0x150   :  { %1683 = vmatmul.mubr.msk.bf16.vlgmr.msra.gmra.mrb[8].mxu1 %vm2048_vm3, %v1473_v7  ;;  %1471 = vmatmul.mubr.msk.bf16.vlgmr.msra.gmra.mrb[8].mxu0 %vm2048_vm3, %v1470_v8 }
 0x151   :  { %1687 = vmatpush3.bf16.msra.mxu1 %v1797_v2  ;;  %1616 = vmatpush3.bf16.msra.mxu0 %v1798_v3 }
 0x152   :  { %1501 = vmatprep.mubr.msk.bf16.mxu0 %vm2068_vm6, %v1500_v11  ;;  %1688 = vmatprep.subr.bf16.mxu1 %v1921_v0  ;;  %v1508_v11 = vld [vmem:[%s2121_s4] ss:$0 sm:$0xff] }
 0x153   :  { %1617 = vmatprep.subr.bf16.mxu0 %v1799_v10  ;;  %1702 = vmatprep.mubr.msk.bf16.mxu1 %vm1922_vm0, %v1921_v0 }
 0x155   :  { %1689 = vmatpush3.bf16.msra.mxu1 %v1800_v12  ;;  %1618 = vmatpush3.bf16.msra.mxu0 %v1801_v13 }
 0x156   :  { %1690 = vmatprep.subr.bf16.mxu1 %v1921_v0  ;;  %1619 = vmatprep.subr.bf16.mxu0 %v1802_v14 }
 0x159   :  { %1691 = vmatpush3.bf16.msra.mxu1 %v1803_v15  ;;  %1620 = vmatpush3.bf16.msra.mxu0 %v1804_v16 }
 0x15a   :  { %1692 = vmatprep.subr.bf16.mxu1 %v1921_v0  ;;  %1621 = vmatprep.subr.bf16.mxu0 %v1805_v17 }
 0x15d   :  { %1693 = vmatpush3.bf16.msra.mxu1 %v1806_v18  ;;  %1622 = vmatpush3.bf16.msra.mxu0 %v1807_v19 }
 0x15e   :  { %1694 = vmatprep.subr.bf16.mxu1 %v1921_v0  ;;  %1623 = vmatprep.subr.bf16.mxu0 %v1808_v20 }
 0x161   :  { %1695 = vmatpush3.bf16.msra.mxu1 %v1809_v21  ;;  %1624 = vmatpush3.bf16.msra.mxu0 %v1810_v22 }
 0x162   :  { %1696 = vmatprep.subr.bf16.mxu1 %v1921_v0  ;;  %1625 = vmatprep.subr.bf16.mxu0 %v1811_v23 }
 0x165   :  { %1697 = vmatpush3.bf16.msra.mxu1 %v1812_v24  ;;  %1626 = vmatpush3.bf16.msra.mxu0 %v1813_v25 }
 0x166   :  { %1698 = vmatprep.subr.bf16.mxu1 %v1921_v0  ;;  %1627 = vmatprep.subr.bf16.mxu0 %v1814_v26 }
 0x169   :  { %1699 = vmatpush3.bf16.msra.mxu1 %v1815_v27  ;;  %1628 = vmatpush3.bf16.msra.mxu0 %v1816_v28 }
 0x16a   :  { %1700 = vmatprep.subr.bf16.mxu1 %v1820_v32  ;;  %1629 = vmatprep.subr.bf16.mxu0 %v1817_v29 }
 0x16d   :  { %1701 = vmatpush3.bf16.msra.mxu1 %v1818_v30  ;;  %1630 = vmatpush3.bf16.msra.mxu0 %v1819_v31 }
 0x170   :  { %1703 = vmatmul.mubr.msk.bf16.vlgmr.msra.gmra.mrb[12].mxu1 %vm2068_vm6, %v1506_v36  ;;  %1504 = vmatmul.mubr.msk.bf16.vlgmr.msra.gmra.mrb[12].mxu0 %vm2068_vm6, %v1503_v37 }
 0x203   :  { %v788_v0 = vpop.f32.mrb[4].mxu1  ;;  %v1569_v38 = vpop.f32.mrb[4].mxu0 }
 0x204   :  { %v1664_v39 = vpop.f32.mrb[5].mxu1  ;;  %v1570_v40 = vpop.f32.mrb[5].mxu0 }
 0x205   :  { %v1571_v41 = vadd.f32 %v1570_v40, %v1569_v38  ;;  %v791_v42 = vpop.f32.mrb[6].mxu1  ;;  %v1572_v43 = vpop.f32.mrb[6].mxu0 }
 0x206   :  { %v1665_v44 = vpop.f32.mrb[7].mxu1  ;;  %v1573_v45 = vpop.f32.mrb[7].mxu0 }
 0x207   :  { %v789_v46 = vadd.f32 %v1571_v41, %v788_v0  ;;  %v1574_v47 = vadd.f32 %v1573_v45, %v1572_v43 }
 0x209   :  { %v792_v48 = vadd.f32 %v1574_v47, %v791_v42 }
 0x223   :  { %v1014_v49 = vpop.f32.mrb[8].mxu1  ;;  %v1600_v50 = vpop.f32.mrb[8].mxu0 }
 0x224   :  { %v1684_v51 = vpop.f32.mrb[9].mxu1  ;;  %v1601_v52 = vpop.f32.mrb[9].mxu0 }
 0x225   :  { %v1602_v53 = vadd.f32 %v1601_v52, %v1600_v50  ;;  %v1017_v54 = vpop.f32.mrb[10].mxu1  ;;  %v1603_v55 = vpop.f32.mrb[10].mxu0 }
 0x226   :  { %v1685_v56 = vpop.f32.mrb[11].mxu1  ;;  %v1604_v57 = vpop.f32.mrb[11].mxu0 }
 0x227   :  { %v974_v58 = vadd.f32 %v1602_v53, %v789_v46  ;;  %v1605_v59 = vadd.f32 %v1604_v57, %v1603_v55 }
 0x229   :  { %v1015_v60 = vadd.f32 %v1014_v49, %v974_v58  ;;  %v977_v61 = vadd.f32 %v1605_v59, %v792_v48 }
 0x22b   :  { %v1018_v62 = vadd.f32 %v1017_v54, %v977_v61 }
 0x243   :  { %v1309_v63 = vpop.f32.mrb[12].mxu1  ;;  %v1631_v1 = vpop.f32.mrb[12].mxu0 }
 0x244   :  { %v1704_v2 = vpop.f32.mrb[13].mxu1  ;;  %v1632_v3 = vpop.f32.mrb[13].mxu0 }
 0x245   :  { %v1633_v4 = vadd.f32 %v1632_v3, %v1631_v1  ;;  %v1312_v5 = vpop.f32.mrb[14].mxu1  ;;  %v1634_v6 = vpop.f32.mrb[14].mxu0 }
 0x246   :  { %v1705_v7 = vpop.f32.mrb[15].mxu1  ;;  %v1635_v8 = vpop.f32.mrb[15].mxu0 }
 0x247   :  { %v1310_v9 = vadd.f32 %v1633_v4, %v1309_v63  ;;  %v1636_v10 = vadd.f32 %v1635_v8, %v1634_v6 }
 0x249   :  { %v1316_v12 = vadd.f32 %v1310_v9, %v1015_v60  ;;  %v1313_v13 = vadd.f32 %v1636_v10, %v1312_v5 }
 0x24b   :  { %v1325_v14 = vadd.f32 %v1508_v11, %v1316_v12  ;;  %v1317_v15 = vadd.f32 %v1313_v13, %v1018_v62 }
 0x24d   :  { %1327 = vst [vmem:[#allocation8] sm:$0xff] %v1325_v14  ;;  %v1326_v16 = vadd.f32 %v1508_v11, %v1317_v15 }
 0x24f   :  { %1328 = vst [vmem:[#allocation8 + $0x8] sm:$0xff] %v1326_v16 }
 0x250   :  { %1876 = shalt.err (!%p1873_p6)
}
 0x251   :  { %s1877_s4 = scalar_lea.hbm %s2123_s6, 256 }
 0x252   :  { %p1878_p7 = scmp.ne.s32.totalorder %s2123_s6, %s1877_s4  ;;  %p1881_p8 = scmp.lt.u32.totalorder %s1877_s4, %s2123_s6 }
 0x254   :  { %p1883_p9 = pnand %p1881_p8, %p1878_p7 }
 0x256   :  { %1886 = shalt.err (!%p1883_p9)
}
 0x257   :  { %s1924_s30 = smov 128   ;;  %s1925_s8 = smov 8   ;;  %v1330_v17 = vld [vmem:[#allocation8 + $0x2] sm:$0x1]  ;;  %vm1342_vm7 = vcmask 1040384   ;;  %vm1344_vm8 = vcmask 1041408  }
 0x258   :  { %1362 = dma.vmem_to_hbm [thread:$0]  %s1357_s24, 256, %s2123_s6, [#allocation5], %s1924_s30, %s1924_s30, %s1925_s8   ;;  %v1334_v18 = vrot.slane %v1330_v17, 7  ;;  %v1329_v19 = vld [vmem:[#allocation8] sm:$0x1]  ;;  %vm1346_vm9 = vcmask 1042432  }
 0x259   :  { %s1926_s11 = smov [#allocation9]   ;;  %v1331_v20 = vld [vmem:[#allocation8 + $0x8] sm:$0x1]  ;;  %v1332_v21 = vld [vmem:[#allocation8 + $0xa] sm:$0x1] }
 0x25a   :  { %s1369_s12 = sshll.u32 %s1926_s11, 4  ;;  %v1337_v22 = vrot.slane %v1331_v20, 6  ;;  %v1340_v23 = vrot.slane %v1332_v21, 5  ;;  %v1343_v24 = vsel %vm1342_vm7, %v1329_v19, %v1334_v18  ;;  %s1370_s12 = int_to_ptr.vmem [resolvable:$true] %s1369_s12 }
 0x25b   :  { %s1887_s13 = scalar_lea.vmem %s1370_s12, 64  ;;  %p1892_p11 = scmp.lt.s32.totalorder %s1370_s12, %s1370_s12 }
 0x25c   :  { %v1345_v25 = vsel %vm1344_vm8, %v1343_v24, %v1337_v22  ;;  %p1888_p10 = scmp.ne.s32.totalorder %s1370_s12, %s1887_s13  ;;  %p1893_p12 = scmp.lt.s32.totalorder %s1887_s13, %s1887_s13 }
 0x25d   :  { %v1347_v26 = vsel %vm1346_vm9, %v1345_v25, %v1340_v23 }
 0x25e   :  { %1348 = vst [vmem:[#allocation9] sm:$0xf] %v1347_v26  ;;  %p1894_p13 = por %p1893_p12, %p1892_p11 }
 0x260   :  { %p1895_p0 = pnand %p1894_p13, %p1888_p10 }
 0x262   :  { %1898 = shalt.err (!%p1895_p0)
}
 0x263   :  { %s1899_s15 = scalar_lea.hbm %s2124_s7, 64 }
 0x264   :  { %p1900_p1 = scmp.ne.s32.totalorder %s2124_s7, %s1899_s15  ;;  %p1903_p2 = scmp.lt.u32.totalorder %s1899_s15, %s2124_s7 }
 0x266   :  { %p1905_p3 = pnand %p1903_p2, %p1900_p1 }
 0x268   :  { %1908 = shalt.err (!%p1905_p3)
}
 0x269   :  { %1372 = dma.vmem_to_hbm [thread:$0]  %s1370_s12, 64, %s2124_s7, [#allocation10]  }
 0x26a   :  { %1913 = dma.done.wait [#allocation5], 256  }
 0x26b   :  { %1914 = vsyncadd [#allocation5], 4294967040 }
 0x26c   :  { %1915 = dma.done.wait [#allocation10], 64  }
 0x26d   :  { %1916 = vsyncadd [#allocation10], 4294967232 }
 0x26e   :  { %1381 = vsyncpa [#allocation4], 1 }
 0x26f   :  { %1382 = vsyncpa [#allocation7], 1 }
 0x270   :  { %1383 = vsyncpa [#allocation5], 1 }
 0x271   :  { %1384 = vsyncpa [#allocation10], 1 }

// kernel: fpn_forward.5
= control target key start
LH: loop header
LB: loop body
LE: loop exit
PB: predicated region body
PF: predicated region fallthrough
CT: control target
= control target key end

     0   :  { %vm112_vm0 = vcmask 523264   ;;  %s7356_s0 = inlined_call_operand.vmem [shape: f32[256,64], index: 0, kind: input, shape index: {}]   ;;  %s7357_s1 = inlined_call_operand.vmem [shape: bf16[64,128], index: 1, kind: input, shape index: {}]   ;;  %s7358_s2 = inlined_call_operand.vmem [shape: f32[1,128], index: 2, kind: input, shape index: {}]   ;;  %s7359_s3 = inlined_call_operand.vmem [shape: bf16[3,384,128], index: 3, kind: input, shape index: {}]   ;;  %s7360_s4 = inlined_call_operand.vmem [shape: f32[1,128], index: 4, kind: input, shape index: {}]   ;;  %s7361_s5 = inlined_call_operand.vmem [shape: f32[256,128], index: 5, kind: input, shape index: {}]   ;;  %s7362_s6 = inlined_call_operand.hbm [shape: f32[256,128], index: 6, kind: output, shape index: {}]  }
   0x1   :  { %v5481_v0 = vld [vmem:[%s7357_s1] sm:$0xff]   ;;  %v5482_v1 = vld [vmem:[%s7357_s1 + $0x8] sm:$0xff]   ;;  %v5483_v2 = vld [vmem:[%s7357_s1 + $0x10] sm:$0xff]  }
   0x2   :  { %5052 = vmatprep.subr.bf16.mxu0 %v5481_v0  ;;  %v25_v3 = vld [vmem:[%s7356_s0] sm:$0xff]  ;;  %v26_v4 = vld [vmem:[%s7356_s0 + $0x8] sm:$0xff]  ;;  %v5484_v6 = vld [vmem:[%s7357_s1 + $0x18] sm:$0xff]  }
   0x3   :  { %5053 = vmatpush3.bf16.msra.mxu0 %v5481_v0  ;;  %v57_v5 = vpack.c.bf16 %v26_v4, %v25_v3  ;;  %v27_v7 = vld [vmem:[%s7356_s0 + $0x10] sm:$0xff]  ;;  %v28_v8 = vld [vmem:[%s7356_s0 + $0x18] sm:$0xff]  ;;  %v29_v9 = vld [vmem:[%s7356_s0 + $0x20] sm:$0xff]  ;;  %v5654_v4 = vmov 0.0  }
   0x4   :  { %5054 = vmatprep.subr.bf16.mxu0 %v5482_v1  ;;  %v30_v10 = vld [vmem:[%s7356_s0 + $0x28] sm:$0xff]  ;;  %v58_v11 = vpack.c.bf16 %v28_v8, %v27_v7  ;;  %v5485_v13 = vld [vmem:[%s7359_s3 + $0x100] sm:$0xff]   ;;  %v31_v15 = vld [vmem:[%s7356_s0 + $0x30] sm:$0xff]  ;;  %387 = vst [vmem:[#allocation2 + $0x8] sm:$0xff] %v5654_v4 }
   0x5   :  { %5060 = vmatprep.mubr.msk.bf16.mxu0 %vm112_vm0, %v57_v5  ;;  %v59_v12 = vpack.c.bf16 %v30_v10, %v29_v9  ;;  %v5486_v14 = vld [vmem:[%s7359_s3 + $0xc0] sm:$0xff]   ;;  %v32_v16 = vld [vmem:[%s7356_s0 + $0x38] sm:$0xff]  ;;  %v5487_v17 = vld [vmem:[%s7359_s3 + $0x108] sm:$0xff]   ;;  %5284 = vmatprep.subr.bf16.mxu1 %v5485_v13  ;;  %388 = vst [vmem:[#allocation2 + $0x10] sm:$0xff] %v5654_v4 }
   0x6   :  { %v33_v18 = vld [vmem:[%s7356_s0 + $0x40] sm:$0xff]  ;;  %v34_v19 = vld [vmem:[%s7356_s0 + $0x48] sm:$0xff]  ;;  %5292 = vmatpush3.bf16.msra.mxu1 %v5486_v14  ;;  %v5489_v21 = vld [vmem:[%s7359_s3 + $0x110] sm:$0xff]   ;;  %v60_v23 = vpack.c.bf16 %v32_v16, %v31_v15  ;;  %386 = vst [vmem:[#allocation2] sm:$0xff] %v5654_v4 }
   0x7   :  { %5055 = vmatpush3.bf16.msra.mxu0 %v5482_v1  ;;  %v5488_v20 = vld [vmem:[%s7359_s3 + $0xc8] sm:$0xff]   ;;  %5285 = vmatprep.subr.bf16.mxu1 %v5487_v17  ;;  %v5490_v22 = vld [vmem:[%s7359_s3 + $0xd0] sm:$0xff]   ;;  %v5491_v24 = vld [vmem:[%s7359_s3 + $0x118] sm:$0xff]   ;;  %v61_v25 = vpack.c.bf16 %v34_v19, %v33_v18  ;;  %389 = vst [vmem:[#allocation2 + $0x118] sm:$0xff] %v5654_v4 }
   0x8   :  { %5056 = vmatprep.subr.bf16.mxu0 %v5483_v2  ;;  %v35_v26 = vld [vmem:[%s7356_s0 + $0x50] sm:$0xff]  ;;  %v36_v27 = vld [vmem:[%s7356_s0 + $0x58] sm:$0xff]  ;;  %v37_v28 = vld [vmem:[%s7356_s0 + $0x60] sm:$0xff]  ;;  %390 = vst [vmem:[#allocation2 + $0x120] sm:$0xff] %v5654_v4 }
   0x9   :  { %v38_v29 = vld [vmem:[%s7356_s0 + $0x68] sm:$0xff]  ;;  %v62_v30 = vpack.c.bf16 %v36_v27, %v35_v26  ;;  %v39_v32 = vld [vmem:[%s7356_s0 + $0x70] sm:$0xff]  ;;  %v40_v33 = vld [vmem:[%s7356_s0 + $0x78] sm:$0xff]  ;;  %391 = vst [vmem:[#allocation2 + $0x128] sm:$0xff] %v5654_v4 }
   0xa   :  { %5293 = vmatpush3.bf16.msra.mxu1 %v5488_v20  ;;  %v63_v31 = vpack.c.bf16 %v38_v29, %v37_v28  ;;  %v41_v34 = vld [vmem:[%s7356_s0 + $0x80] sm:$0xff]  ;;  %v42_v35 = vld [vmem:[%s7356_s0 + $0x88] sm:$0xff]  ;;  %v64_v36 = vpack.c.bf16 %v40_v33, %v39_v32  ;;  %v43_v38 = vld [vmem:[%s7356_s0 + $0x90] sm:$0xff] }
   0xb   :  { %5057 = vmatpush3.bf16.msra.mxu0 %v5483_v2  ;;  %5286 = vmatprep.subr.bf16.mxu1 %v5489_v21  ;;  %v65_v37 = vpack.c.bf16 %v42_v35, %v41_v34  ;;  %v44_v39 = vld [vmem:[%s7356_s0 + $0x98] sm:$0xff]  ;;  %v45_v40 = vld [vmem:[%s7356_s0 + $0xa0] sm:$0xff]  ;;  %v46_v41 = vld [vmem:[%s7356_s0 + $0xa8] sm:$0xff] }
   0xc   :  { %5058 = vmatprep.subr.bf16.mxu0 %v5484_v6  ;;  %v66_v42 = vpack.c.bf16 %v44_v39, %v43_v38  ;;  %v67_v43 = vpack.c.bf16 %v46_v41, %v45_v40  ;;  %v47_v44 = vld [vmem:[%s7356_s0 + $0xb0] sm:$0xff]  ;;  %v48_v45 = vld [vmem:[%s7356_s0 + $0xb8] sm:$0xff]  ;;  %v49_v46 = vld [vmem:[%s7356_s0 + $0xc0] sm:$0xff] }
   0xd   :  { %v50_v47 = vld [vmem:[%s7356_s0 + $0xc8] sm:$0xff]  ;;  %v68_v48 = vpack.c.bf16 %v48_v45, %v47_v44  ;;  %v51_v50 = vld [vmem:[%s7356_s0 + $0xd0] sm:$0xff]  ;;  %v52_v51 = vld [vmem:[%s7356_s0 + $0xd8] sm:$0xff] }
   0xe   :  { %5294 = vmatpush3.bf16.msra.mxu1 %v5490_v22  ;;  %v69_v49 = vpack.c.bf16 %v50_v47, %v49_v46  ;;  %v53_v52 = vld [vmem:[%s7356_s0 + $0xe0] sm:$0xff]  ;;  %v54_v53 = vld [vmem:[%s7356_s0 + $0xe8] sm:$0xff]  ;;  %v70_v54 = vpack.c.bf16 %v52_v51, %v51_v50  ;;  %v55_v56 = vld [vmem:[%s7356_s0 + $0xf0] sm:$0xff] }
   0xf   :  { %5059 = vmatpush3.bf16.msra.mxu0 %v5484_v6  ;;  %5287 = vmatprep.subr.bf16.mxu1 %v5491_v24  ;;  %v71_v55 = vpack.c.bf16 %v54_v53, %v53_v52  ;;  %v56_v57 = vld [vmem:[%s7356_s0 + $0xf8] sm:$0xff]  ;;  %v5493_v60 = vld [vmem:[%s7359_s3 + $0x120] sm:$0xff]   ;;  %v5495_v62 = vld [vmem:[%s7359_s3 + $0x128] sm:$0xff]  }
  0x10   :  { %4572 = vmatprep.subr.bf16.mxu0 %v5485_v13  ;;  %v72_v58 = vpack.c.bf16 %v56_v57, %v55_v56  ;;  %v5492_v59 = vld [vmem:[%s7359_s3 + $0xd8] sm:$0xff]   ;;  %v5494_v61 = vld [vmem:[%s7359_s3 + $0xe0] sm:$0xff]   ;;  %v5496_v63 = vld [vmem:[%s7359_s3 + $0xe8] sm:$0xff]  }
  0x11   :  { %v5497_v0 = vld [vmem:[%s7359_s3 + $0x130] sm:$0xff]   ;;  %v5499_v2 = vld [vmem:[%s7359_s3 + $0x138] sm:$0xff]   ;;  %v5501_v5 = vld [vmem:[%s7359_s3 + $0x140] sm:$0xff]  }
  0x12   :  { %5061 = vmatmul.mubr.msk.bf16.vlgmr.msra.gmra.mrb[0].mxu0 %vm112_vm0, %v58_v11  ;;  %5295 = vmatpush3.bf16.msra.mxu1 %v5492_v59  ;;  %v5498_v1 = vld [vmem:[%s7359_s3 + $0xf0] sm:$0xff]   ;;  %v5500_v3 = vld [vmem:[%s7359_s3 + $0xf8] sm:$0xff]  }
  0x13   :  { %5064 = vmatprep.mubr.msk.bf16.mxu0 %vm112_vm0, %v59_v12  ;;  %4573 = vmatpush3.bf16.msra.mxu0 %v5486_v14 }
  0x14   :  { %4574 = vmatprep.subr.bf16.mxu0 %v5487_v17  ;;  %5288 = vmatprep.subr.bf16.mxu1 %v5493_v60 }
  0x16   :  { %5296 = vmatpush3.bf16.msra.mxu1 %v5494_v61 }
  0x17   :  { %4575 = vmatpush3.bf16.msra.mxu0 %v5488_v20  ;;  %5289 = vmatprep.subr.bf16.mxu1 %v5495_v62 }
  0x18   :  { %4576 = vmatprep.subr.bf16.mxu0 %v5489_v21 }
  0x1a   :  { %5065 = vmatmul.mubr.msk.bf16.gmra.mrb[4].mxu0 %vm112_vm0, %v60_v23  ;;  %5297 = vmatpush3.bf16.msra.mxu1 %v5496_v63 }
  0x1b   :  { %5068 = vmatprep.mubr.msk.bf16.mxu0 %vm112_vm0, %v61_v25  ;;  %4577 = vmatpush3.bf16.msra.mxu0 %v5490_v22 }
  0x1c   :  { %4578 = vmatprep.subr.bf16.mxu0 %v5491_v24  ;;  %5290 = vmatprep.subr.bf16.mxu1 %v5497_v0 }
  0x1e   :  { %5298 = vmatpush3.bf16.msra.mxu1 %v5498_v1 }
  0x1f   :  { %4579 = vmatpush3.bf16.msra.mxu0 %v5492_v59  ;;  %5291 = vmatprep.subr.bf16.mxu1 %v5499_v2 }
  0x20   :  { %4580 = vmatprep.subr.bf16.mxu0 %v5493_v60 }
  0x22   :  { %5069 = vmatmul.mubr.msk.bf16.gmra.mrb[8].mxu0 %vm112_vm0, %v62_v30  ;;  %5299 = vmatpush3.bf16.msra.mxu1 %v5500_v3 }
  0x23   :  { %5072 = vmatprep.mubr.msk.bf16.mxu0 %vm112_vm0, %v63_v31  ;;  %4581 = vmatpush3.bf16.msra.mxu0 %v5494_v61 }
  0x24   :  { %4582 = vmatprep.subr.bf16.mxu0 %v5495_v62 }
  0x27   :  { %4583 = vmatpush3.bf16.msra.mxu0 %v5496_v63 }
  0x28   :  { %4584 = vmatprep.subr.bf16.mxu0 %v5497_v0 }
  0x2a   :  { %5073 = vmatmul.mubr.msk.bf16.gmra.mrb[12].mxu0 %vm112_vm0, %v64_v36 }
  0x2b   :  { %5076 = vmatprep.mubr.msk.bf16.mxu0 %vm112_vm0, %v65_v37  ;;  %4585 = vmatpush3.bf16.msra.mxu0 %v5498_v1 }
  0x2c   :  { %4586 = vmatprep.subr.bf16.mxu0 %v5499_v2 }
  0x2f   :  { %4587 = vmatpush3.bf16.msra.mxu0 %v5500_v3 }
  0x30   :  { %5092 = vmatprep.subr.bf16.mxu0 %v5501_v5 }
  0x32   :  { %5077 = vmatmul.mubr.msk.bf16.gmra.mrb[16].mxu0 %vm112_vm0, %v66_v42 }
  0x33   :  { %5080 = vmatprep.mubr.msk.bf16.mxu0 %vm112_vm0, %v67_v43 }
  0x3a   :  { %5081 = vmatmul.mubr.msk.bf16.gmra.mrb[20].mxu0 %vm112_vm0, %v68_v48 }
  0x3b   :  { %5084 = vmatprep.mubr.msk.bf16.mxu0 %vm112_vm0, %v69_v49 }
  0x42   :  { %5085 = vmatmul.mubr.msk.bf16.gmra.mrb[24].mxu0 %vm112_vm0, %v70_v54 }
  0x43   :  { %5088 = vmatprep.mubr.msk.bf16.mxu0 %vm112_vm0, %v71_v55 }
  0x4a   :  { %5089 = vmatmul.mubr.msk.bf16.gmra.mrb[28].mxu0 %vm112_vm0, %v72_v58 }
  0x4b   :  { %11 = vsyncpa [#allocation4], 0  ;;  %v5505_v6 = vld [vmem:[%s7359_s3 + $0x40] sm:$0xff]   ;;  %v324_v9 = vld [vmem:[%s7361_s5 + $0x10] sm:$0xff]  ;;  %v5655_v39 = vmov 0.0|0.0   ;;  %vm5656_vm2 = vmmov 1  }
  0x4c   :  { %4652 = vmatprep.subr.bf16.mxu1 %v5505_v6  ;;  %v5876_v7 = vld [vmem:[%s7358_s2] ss:$0 sm:$0xff]  ;;  %v325_v15 = vld [vmem:[%s7361_s5 + $0x18] sm:$0xff]  ;;  %v323_v19 = vld [vmem:[%s7361_s5 + $0x8] sm:$0xff] }
  0x4d   :  { %v322_v12 = vld [vmem:[%s7361_s5] sm:$0xff]  ;;  %v328_v26 = vld [vmem:[%s7361_s5 + $0x30] sm:$0xff]  ;;  %v5502_v31 = vld [vmem:[%s7359_s3 + $0x148] sm:$0xff]  }
  0x4e   :  { %v326_v30 = vld [vmem:[%s7361_s5 + $0x20] sm:$0xff]  ;;  %v329_v34 = vld [vmem:[%s7361_s5 + $0x38] sm:$0xff]  ;;  %v327_v38 = vld [vmem:[%s7361_s5 + $0x28] sm:$0xff] }
  0x4f   :  { %v5503_v43 = vld [vmem:[%s7359_s3 + $0x150] sm:$0xff]   ;;  %v330_v51 = vld [vmem:[%s7361_s5 + $0x40] sm:$0xff]  ;;  %v5504_v52 = vld [vmem:[%s7359_s3 + $0x158] sm:$0xff]  }
  0x50   :  { %v332_v47 = vld [vmem:[%s7361_s5 + $0x50] sm:$0xff]  ;;  %v333_v55 = vld [vmem:[%s7361_s5 + $0x58] sm:$0xff]  ;;  %v331_v59 = vld [vmem:[%s7361_s5 + $0x48] sm:$0xff] }
  0x51   :  { %v5506_v63 = vld [vmem:[%s7359_s3 + $0x160] sm:$0xff]   ;;  %v336_v3 = vld [vmem:[%s7361_s5 + $0x70] sm:$0xff] }
  0xe5   :  { %v5062_v8 = vpop.f32.mrb[0].mxu0 }
  0xe6   :  { %v204_v10 = vadd.f32 %v5062_v8, %v5876_v7  ;;  %v195_v11 = vpop.f32.mrb[1].mxu0 }
  0xe7   :  { %v196_v13 = vadd.f32 %v5876_v7, %v195_v11  ;;  %v5063_v14 = vpop.f32.mrb[2].mxu0 }
  0xe8   :  { %v356_v16 = vadd.f32 %v324_v9, %v204_v10  ;;  %v207_v17 = vadd.f32 %v5063_v14, %v5876_v7  ;;  %v198_v18 = vpop.f32.mrb[3].mxu0  ;;  %v334_v9 = vld [vmem:[%s7361_s5 + $0x60] sm:$0xff]  ;;  %v5509_v14 = vld [vmem:[%s7359_s3 + $0x168] sm:$0xff]  }
  0xe9   :  { %v354_v20 = vadd.f32 %v322_v12, %v196_v13  ;;  %v199_v21 = vadd.f32 %v5876_v7, %v198_v18  ;;  %v337_v12 = vld [vmem:[%s7361_s5 + $0x78] sm:$0xff]  ;;  %v5508_v13 = vld [vmem:[%s7359_s3 + $0x48] sm:$0xff]  }
  0xea   :  { %394 = vst [vmem:[#allocation2 + $0x28] sm:$0xff] %v356_v16  ;;  %v357_v22 = vadd.f32 %v325_v15, %v207_v17  ;;  %v335_v18 = vld [vmem:[%s7361_s5 + $0x68] sm:$0xff] }
  0xeb   :  { %392 = vst [vmem:[#allocation2 + $0x18] sm:$0xff] %v354_v20  ;;  %v355_v23 = vadd.f32 %v323_v19, %v199_v21  ;;  %v5510_v21 = vld [vmem:[%s7359_s3 + $0x8] sm:$0xff]  }
  0xec   :  { %395 = vst [vmem:[#allocation2 + $0x30] sm:$0xff] %v357_v22  ;;  %v5894_v24 = vpack.c.bf16 %v357_v22, %v356_v16 }
  0xed   :  { %393 = vst [vmem:[#allocation2 + $0x20] sm:$0xff] %v355_v23  ;;  %v5066_v25 = vpop.f32.mrb[4].mxu0  ;;  %v842_v27 = vpack.c.bf16 %v355_v23, %v354_v20  ;;  %v5511_v23 = vld [vmem:[%s7359_s3 + $0x50] sm:$0xff]  }
  0xee   :  { %v220_v28 = vadd.f32 %v5066_v25, %v5876_v7  ;;  %v211_v29 = vpop.f32.mrb[5].mxu0 }
  0xef   :  { %v212_v32 = vadd.f32 %v5876_v7, %v211_v29  ;;  %v5067_v33 = vpop.f32.mrb[6].mxu0  ;;  %1076 = vmatprep.mubr.bf16.mxu0 %v842_v27  ;;  %v340_v29 = vld [vmem:[%s7361_s5 + $0x90] sm:$0xff] }
  0xf0   :  { %v360_v35 = vadd.f32 %v328_v26, %v220_v28  ;;  %v223_v36 = vadd.f32 %v5067_v33, %v5876_v7  ;;  %v214_v37 = vpop.f32.mrb[7].mxu0  ;;  %1077 = vmatmul.mubr.bf16.vlgmr.msra.gmra.mrb[32].mxu0 %v5655_v39  ;;  %v5512_v26 = vld [vmem:[%s7359_s3 + $0x170] sm:$0xff]   ;;  %v5515_v39 = vld [vmem:[%s7359_s3 + $0x178] sm:$0xff]  }
  0xf1   :  { %v358_v40 = vadd.f32 %v326_v30, %v212_v32  ;;  %v215_v41 = vadd.f32 %v5876_v7, %v214_v37  ;;  %1084 = vmatprep.mubr.bf16.mxu0 %v5894_v24  ;;  %5093 = vmatpush3.bf16.msra.mxu0 %v5501_v5  ;;  %v5507_v5 = vld [vmem:[%s7359_s3] sm:$0xff]   ;;  %v5513_v30 = vld [vmem:[%s7359_s3 + $0x10] sm:$0xff]  }
  0xf2   :  { %398 = vst [vmem:[#allocation2 + $0x48] sm:$0xff] %v360_v35  ;;  %v361_v42 = vadd.f32 %v329_v34, %v223_v36  ;;  %5094 = vmatprep.subr.bf16.mxu0 %v5502_v31  ;;  %v338_v34 = vld [vmem:[%s7361_s5 + $0x80] sm:$0xff] }
  0xf3   :  { %396 = vst [vmem:[#allocation2 + $0x38] sm:$0xff] %v358_v40  ;;  %v359_v44 = vadd.f32 %v327_v38, %v215_v41  ;;  %v341_v38 = vld [vmem:[%s7361_s5 + $0x98] sm:$0xff] }
  0xf4   :  { %399 = vst [vmem:[#allocation2 + $0x50] sm:$0xff] %v361_v42  ;;  %v5919_v45 = vpack.c.bf16 %v361_v42, %v360_v35  ;;  %v5514_v35 = vld [vmem:[%s7359_s3 + $0x58] sm:$0xff]  }
  0xf5   :  { %397 = vst [vmem:[#allocation2 + $0x40] sm:$0xff] %v359_v44  ;;  %v5070_v46 = vpop.f32.mrb[8].mxu0  ;;  %5095 = vmatpush3.bf16.msra.mxu0 %v5502_v31  ;;  %v5924_v48 = vpack.c.bf16 %v359_v44, %v358_v40  ;;  %v424_v40 = vlaneseq  ;;  %v339_v44 = vld [vmem:[%s7361_s5 + $0x88] sm:$0xff] }
  0xf6   :  { %v236_v49 = vadd.f32 %v5070_v46, %v5876_v7  ;;  %v227_v50 = vpop.f32.mrb[9].mxu0  ;;  %5096 = vmatprep.subr.bf16.mxu0 %v5503_v43 }
  0xf7   :  { %v228_v53 = vadd.f32 %v5876_v7, %v227_v50  ;;  %v5071_v54 = vpop.f32.mrb[10].mxu0 }
  0xf8   :  { %v364_v56 = vadd.f32 %v332_v47, %v236_v49  ;;  %v239_v57 = vadd.f32 %v5071_v54, %v5876_v7  ;;  %v230_v58 = vpop.f32.mrb[11].mxu0  ;;  %1085 = vmatmul.mubr.bf16.gmra.mrb[36].mxu0 %v842_v27  ;;  %v5516_v49 = vld [vmem:[%s7359_s3 + $0x18] sm:$0xff]  }
  0xf9   :  { %v362_v60 = vadd.f32 %v330_v51, %v228_v53  ;;  %v231_v61 = vadd.f32 %v5876_v7, %v230_v58  ;;  %1092 = vmatprep.mubr.bf16.mxu0 %v5924_v48  ;;  %5097 = vmatpush3.bf16.msra.mxu0 %v5503_v43  ;;  %v5517_v51 = vld [vmem:[%s7359_s3 + $0x60] sm:$0xff]   ;;  %v6031_v53 = vshrl.u32 %v424_v40, 7  ;;  %v344_v58 = vld [vmem:[%s7361_s5 + $0xb0] sm:$0xff] }
  0xfa   :  { %402 = vst [vmem:[#allocation2 + $0x68] sm:$0xff] %v364_v56  ;;  %v365_v62 = vadd.f32 %v333_v55, %v239_v57  ;;  %5098 = vmatprep.subr.bf16.mxu0 %v5504_v52  ;;  %v5518_v55 = vld [vmem:[%s7359_s3 + $0x20] sm:$0xff]  }
  0xfb   :  { %400 = vst [vmem:[#allocation2 + $0x58] sm:$0xff] %v362_v60  ;;  %v363_v0 = vadd.f32 %v331_v59, %v231_v61  ;;  %v342_v61 = vld [vmem:[%s7361_s5 + $0xa0] sm:$0xff] }
  0xfc   :  { %403 = vst [vmem:[#allocation2 + $0x70] sm:$0xff] %v365_v62  ;;  %v5946_v1 = vpack.c.bf16 %v365_v62, %v364_v56  ;;  %v5520_v62 = vld [vmem:[%s7359_s3 + $0x68] sm:$0xff]  }
  0xfd   :  { %401 = vst [vmem:[#allocation2 + $0x60] sm:$0xff] %v363_v0  ;;  %v5074_v2 = vpop.f32.mrb[12].mxu0  ;;  %5099 = vmatpush3.bf16.msra.mxu0 %v5504_v52  ;;  %v5951_v4 = vpack.c.bf16 %v363_v0, %v362_v60 }
  0xfe   :  { %v252_v6 = vadd.f32 %v5074_v2, %v5876_v7  ;;  %v243_v8 = vpop.f32.mrb[13].mxu0  ;;  %5100 = vmatprep.subr.bf16.mxu0 %v5506_v63 }
  0xff   :  { %v244_v10 = vadd.f32 %v5876_v7, %v243_v8  ;;  %v5075_v11 = vpop.f32.mrb[14].mxu0  ;;  %1108 = vmatprep.mubr.bf16.mxu1 %v5951_v4 }
 0x100   :  { %v368_v15 = vadd.f32 %v336_v3, %v252_v6  ;;  %v255_v16 = vadd.f32 %v5075_v11, %v5876_v7  ;;  %v246_v17 = vpop.f32.mrb[15].mxu0  ;;  %1093 = vmatmul.mubr.bf16.gmra.mrb[40].mxu0 %v5894_v24  ;;  %1109 = vmatmul.mubr.bf16.vlgmr.msra.gmra.mrb[0].mxu1 %v5919_v45  ;;  %v345_v3 = vld [vmem:[%s7361_s5 + $0xb8] sm:$0xff]  ;;  %v5521_v11 = vld [vmem:[%s7359_s3 + $0x28] sm:$0xff]  }
 0x101   :  { %v366_v19 = vadd.f32 %v334_v9, %v244_v10  ;;  %v247_v20 = vadd.f32 %v5876_v7, %v246_v17  ;;  %4653 = vmatpush3.bf16.msra.mxu1 %v5507_v5  ;;  %1100 = vmatprep.mubr.bf16.mxu0 %v5919_v45  ;;  %v5522_v5 = vld [vmem:[%s7359_s3 + $0x88] sm:$0xff]   ;;  %v5525_v17 = vld [vmem:[%s7359_s3 + $0x90] sm:$0xff]  }
 0x102   :  { %406 = vst [vmem:[#allocation2 + $0x88] sm:$0xff] %v368_v15  ;;  %v369_v22 = vadd.f32 %v337_v12, %v255_v16  ;;  %1116 = vmatprep.mubr.bf16.mxu1 %v5946_v1  ;;  %5101 = vmatpush3.bf16.msra.mxu0 %v5506_v63  ;;  %v445_v63 = vand.u32 15, %v6031_v53  ;;  %v343_v10 = vld [vmem:[%s7361_s5 + $0xa8] sm:$0xff] }
 0x103   :  { %404 = vst [vmem:[#allocation2 + $0x78] sm:$0xff] %v366_v19  ;;  %v367_v25 = vadd.f32 %v335_v18, %v247_v20  ;;  %4654 = vmatprep.subr.bf16.mxu1 %v5508_v13  ;;  %5102 = vmatprep.subr.bf16.mxu0 %v5509_v14  ;;  %v636_v20 = vld [vmem:[#allocation2 + $0x1f] sm:$0xff] }
 0x104   :  { %407 = vst [vmem:[#allocation2 + $0x90] sm:$0xff] %v369_v22  ;;  %v5989_v27 = vpack.c.bf16 %v369_v22, %v368_v15  ;;  %vm6073_vm1 = vcmp.ge.s32.totalorder %v445_v63, 1  ;;  %v348_v22 = vld [vmem:[%s7361_s5 + $0xd0] sm:$0xff] }
 0x105   :  { %405 = vst [vmem:[#allocation2 + $0x80] sm:$0xff] %v367_v25  ;;  %v5078_v28 = vpop.f32.mrb[16].mxu0  ;;  %4655 = vmatpush3.bf16.msra.mxu1 %v5510_v21  ;;  %v5997_v31 = vpack.c.bf16 %v367_v25, %v366_v19  ;;  %v5524_v19 = vld [vmem:[%s7359_s3 + $0x30] sm:$0xff]   ;;  %vm6096_vm3 = vmpackc.low %vm5656_vm2, %vm6073_vm1  ;;  %v5538_v25 = vld [vmem:[%s7359_s3 + $0x1c0] sm:$0xff]  }
 0x106   :  { %v268_v32 = vadd.f32 %v5078_v28, %v5876_v7  ;;  %v259_v33 = vpop.f32.mrb[17].mxu0  ;;  %5103 = vmatpush3.bf16.msra.mxu0 %v5509_v14  ;;  %4656 = vmatprep.subr.bf16.mxu1 %v5511_v23  ;;  %v5523_v14 = vld [vmem:[%s7359_s3 + $0x70] sm:$0xff]  }
 0x107   :  { %v260_v36 = vadd.f32 %v5876_v7, %v259_v33  ;;  %v5079_v37 = vpop.f32.mrb[18].mxu0  ;;  %5104 = vmatprep.subr.bf16.mxu0 %v5512_v26 }
 0x108   :  { %v372_v41 = vadd.f32 %v340_v29, %v268_v32  ;;  %v271_v42 = vadd.f32 %v5079_v37, %v5876_v7  ;;  %v262_v43 = vpop.f32.mrb[19].mxu0  ;;  %1101 = vmatmul.mubr.bf16.gmra.mrb[44].mxu0 %v5924_v48  ;;  %1117 = vmatmul.mubr.bf16.gmra.mrb[4].mxu1 %v5951_v4  ;;  %v346_v29 = vld [vmem:[%s7361_s5 + $0xc0] sm:$0xff]  ;;  %v5526_v32 = vld [vmem:[%s7359_s3 + $0x78] sm:$0xff]  }
 0x109   :  { %v370_v46 = vadd.f32 %v338_v34, %v260_v36  ;;  %v263_v47 = vadd.f32 %v5876_v7, %v262_v43  ;;  %4657 = vmatpush3.bf16.msra.mxu1 %v5513_v30  ;;  %5108 = vmatprep.mubr.bf16.mxu0 %v5894_v24  ;;  %v5519_v24 = vld [vmem:[%s7359_s3 + $0x80] sm:$0xff]   ;;  %v635_v30 = vld [vmem:[#allocation2 + $0x17] sm:$0xff] }
 0x10a   :  { %410 = vst [vmem:[#allocation2 + $0xa8] sm:$0xff] %v372_v41  ;;  %v373_v50 = vadd.f32 %v341_v38, %v271_v42  ;;  %5105 = vmatpush3.bf16.msra.mxu0 %v5512_v26  ;;  %4658 = vmatprep.subr.bf16.mxu1 %v5514_v35  ;;  %v349_v35 = vld [vmem:[%s7361_s5 + $0xd8] sm:$0xff]  ;;  %v6112_v36 = vpack.c.bf16 %v636_v20, %v635_v30  ;;  %v347_v42 = vld [vmem:[%s7361_s5 + $0xc8] sm:$0xff] }
 0x10b   :  { %408 = vst [vmem:[#allocation2 + $0x98] sm:$0xff] %v370_v46  ;;  %v371_v52 = vadd.f32 %v339_v44, %v263_v47  ;;  %1124 = vmatprep.mubr.bf16.mxu1 %v5997_v31  ;;  %5106 = vmatprep.subr.bf16.mxu0 %v5515_v39  ;;  %v5528_v37 = vld [vmem:[%s7359_s3 + $0x98] sm:$0xff]   ;;  %v633_v44 = vld [vmem:[#allocation2 + $0x7] sm:$0xff] }
 0x10c   :  { %411 = vst [vmem:[#allocation2 + $0xb0] sm:$0xff] %v373_v50  ;;  %v6033_v54 = vpack.c.bf16 %v373_v50, %v372_v41  ;;  %v5527_v43 = vld [vmem:[%s7359_s3 + $0x38] sm:$0xff]  }
 0x10d   :  { %409 = vst [vmem:[#allocation2 + $0xa0] sm:$0xff] %v371_v52  ;;  %4659 = vmatpush3.bf16.msra.mxu1 %v5516_v49  ;;  %v6038_v56 = vpack.c.bf16 %v371_v52, %v370_v46  ;;  %v5082_v57 = vpop.f32.mrb[20].mxu0  ;;  %v634_v46 = vld [vmem:[#allocation2 + $0xf] sm:$0xff] }
 0x10e   :  { %5107 = vmatpush3.bf16.msra.mxu0 %v5515_v39  ;;  %4660 = vmatprep.subr.bf16.mxu1 %v5517_v51  ;;  %v284_v59 = vadd.f32 %v5082_v57, %v5876_v7  ;;  %v275_v60 = vpop.f32.mrb[21].mxu0  ;;  %v6135_v51 = vadd.s32 32, %v6031_v53  ;;  %v5561_v57 = vld [vmem:[%s7359_s3 + $0x130] sm:$0xff]  }
 0x10f   :  { %5124 = vmatprep.subr.bf16.mxu0 %v5519_v24  ;;  %v276_v0 = vadd.f32 %v5876_v7, %v275_v60  ;;  %v5083_v2 = vpop.f32.mrb[22].mxu0  ;;  %v638_v60 = vld [vmem:[#allocation2 + $0x2f] sm:$0xff] }
 0x110   :  { %1125 = vmatmul.mubr.bf16.gmra.mrb[8].mxu1 %v5946_v1  ;;  %v376_v6 = vadd.f32 %v344_v58, %v284_v59  ;;  %v287_v8 = vadd.f32 %v5083_v2, %v5876_v7  ;;  %v278_v9 = vpop.f32.mrb[23].mxu0  ;;  %v637_v59 = vld [vmem:[#allocation2 + $0x27] sm:$0xff] }
 0x111   :  { %5109 = vmatmul.mubr.bf16.vlgmr.msra.gmra.mrb[48].mxu0 %v5924_v48  ;;  %4661 = vmatpush3.bf16.msra.mxu1 %v5518_v55  ;;  %v374_v12 = vadd.f32 %v342_v61, %v276_v0  ;;  %v279_v13 = vadd.f32 %v5876_v7, %v278_v9  ;;  %v5531_v55 = vld [vmem:[%s7359_s3 + $0xc0] sm:$0xff]  }
 0x112   :  { %1132 = vmatprep.mubr.bf16.mxu1 %v5989_v27  ;;  %5112 = vmatprep.mubr.bf16.mxu0 %v5919_v45  ;;  %414 = vst [vmem:[#allocation2 + $0xc8] sm:$0xff] %v376_v6  ;;  %v377_v15 = vadd.f32 %v345_v3, %v287_v8  ;;  %v6081_v45 = vadd.s32 16, %v6031_v53  ;;  %v350_v3 = vld [vmem:[%s7361_s5 + $0xe0] sm:$0xff]  ;;  %v473_v8 = vand.u32 15, %v6135_v51 }
 0x113   :  { %5125 = vmatpush3.bf16.msra.mxu0 %v5519_v24  ;;  %4662 = vmatprep.subr.bf16.mxu1 %v5520_v62  ;;  %412 = vst [vmem:[#allocation2 + $0xb8] sm:$0xff] %v374_v12  ;;  %v375_v16 = vadd.f32 %v343_v10, %v279_v13  ;;  %v4026_v24 = vpack.c.bf16 %v634_v46, %v633_v44  ;;  %v352_v62 = vld [vmem:[%s7361_s5 + $0xf0] sm:$0xff]  ;;  %v5532_v13 = vld [vmem:[%s7359_s3 + $0xa8] sm:$0xff]  }
 0x114   :  { %5126 = vmatprep.subr.bf16.mxu0 %v5522_v5  ;;  %415 = vst [vmem:[#allocation2 + $0xd0] sm:$0xff] %v377_v15  ;;  %v6083_v18 = vpack.c.bf16 %v377_v15, %v376_v6  ;;  %v459_v38 = vand.u32 15, %v6081_v45  ;;  %v5533_v6 = vld [vmem:[%s7359_s3 + $0x108] sm:$0xff]   ;;  %vm657_vm6 = vcmp.ge.s32.totalorder %v473_v8, 1  ;;  %v5546_v8 = vld [vmem:[%s7359_s3 + $0x190] sm:$0xff]  }
 0x115   :  { %4663 = vmatpush3.bf16.msra.mxu1 %v5521_v11  ;;  %413 = vst [vmem:[#allocation2 + $0xc0] sm:$0xff] %v375_v16  ;;  %v5086_v21 = vpop.f32.mrb[24].mxu0  ;;  %v6091_v23 = vpack.c.bf16 %v375_v16, %v374_v12  ;;  %v353_v11 = vld [vmem:[%s7361_s5 + $0xf8] sm:$0xff]  ;;  %v6175_v12 = vpack.c.bf16 %v638_v60, %v637_v59  ;;  %v351_v16 = vld [vmem:[%s7361_s5 + $0xe8] sm:$0xff]  ;;  %vm6207_vm7 = vmpackc.low %vm5656_vm2, %vm657_vm6 }
 0x116   :  { %4664 = vmatprep.subr.bf16.mxu1 %v5523_v14  ;;  %v300_v26 = vadd.f32 %v5086_v21, %v5876_v7  ;;  %v291_v28 = vpop.f32.mrb[25].mxu0  ;;  %vm6143_vm4 = vcmp.ge.s32.totalorder %v459_v38, 1  ;;  %v5537_v21 = vld [vmem:[%s7359_s3 + $0x110] sm:$0xff]   ;;  %v5543_v38 = vld [vmem:[%s7359_s3 + $0x118] sm:$0xff]  }
 0x117   :  { %5127 = vmatpush3.bf16.msra.mxu0 %v5522_v5  ;;  %v292_v33 = vadd.f32 %v5876_v7, %v291_v28  ;;  %v5087_v34 = vpop.f32.mrb[26].mxu0  ;;  %vm6161_vm5 = vmpackc.low %vm5656_vm2, %vm6143_vm4  ;;  %v640_v28 = vld [vmem:[#allocation2 + $0x3f] sm:$0xff]  ;;  %v5544_v60 = vld [vmem:[%s7359_s3 + $0x1d0] sm:$0xff]  }
 0x118   :  { %1133 = vmatmul.mubr.bf16.gmra.mrb[12].mxu1 %v5997_v31  ;;  %5128 = vmatprep.subr.bf16.mxu0 %v5525_v17  ;;  %v380_v39 = vadd.f32 %v348_v22, %v300_v26  ;;  %v303_v40 = vadd.f32 %v5087_v34, %v5876_v7  ;;  %v294_v41 = vpop.f32.mrb[27].mxu0  ;;  %v6197_v22 = vadd.s32 48, %v6031_v53  ;;  %v5534_v26 = vld [vmem:[%s7359_s3 + $0xb0] sm:$0xff]   ;;  %v644_v59 = vld [vmem:[#allocation2 + $0x5f] sm:$0xff] }
 0x119   :  { %5113 = vmatmul.mubr.bf16.gmra.mrb[52].mxu0 %v5951_v4  ;;  %4665 = vmatpush3.bf16.msra.mxu1 %v5524_v19  ;;  %v378_v47 = vadd.f32 %v346_v29, %v292_v33  ;;  %v295_v49 = vadd.f32 %v5876_v7, %v294_v41  ;;  %v5529_v4 = vld [vmem:[%s7359_s3 + $0x100] sm:$0xff]   ;;  %v5539_v34 = vld [vmem:[%s7359_s3 + $0xd0] sm:$0xff]   ;;  %v5575_v33 = vld [vmem:[%s7359_s3 + $0x228] sm:$0xff]  }
 0x11a   :  { %5116 = vmatprep.mubr.bf16.mxu0 %v5946_v1  ;;  %4024 = vmatprep.mubr.msk.bf16.mxu1 %vm6096_vm3, %v6112_v36  ;;  %418 = vst [vmem:[#allocation2 + $0xe8] sm:$0xff] %v380_v39  ;;  %v381_v50 = vadd.f32 %v349_v35, %v303_v40  ;;  %v5530_v1 = vld [vmem:[%s7359_s3 + $0xa0] sm:$0xff]   ;;  %v5545_v40 = vld [vmem:[%s7359_s3 + $0xd8] sm:$0xff]   ;;  %v646_v5 = vld [vmem:[#allocation2 + $0x6f] sm:$0xff] }
 0x11b   :  { %5129 = vmatpush3.bf16.msra.mxu0 %v5525_v17  ;;  %4666 = vmatprep.subr.bf16.mxu1 %v5526_v32  ;;  %416 = vst [vmem:[#allocation2 + $0xd8] sm:$0xff] %v378_v47  ;;  %v379_v52 = vadd.f32 %v347_v42, %v295_v49  ;;  %v5535_v17 = vld [vmem:[%s7359_s3 + $0xc8] sm:$0xff]   ;;  %v639_v32 = vld [vmem:[#allocation2 + $0x37] sm:$0xff]  ;;  %v5549_v41 = vld [vmem:[%s7359_s3 + $0x120] sm:$0xff]  }
 0x11c   :  { %5130 = vmatprep.subr.bf16.mxu0 %v5528_v37  ;;  %419 = vst [vmem:[#allocation2 + $0xf0] sm:$0xff] %v381_v50  ;;  %v6147_v58 = vpack.c.bf16 %v381_v50, %v380_v39  ;;  %v4035_v35 = vpack.c.bf16 %v640_v28, %v639_v32  ;;  %v5536_v39 = vld [vmem:[%s7359_s3 + $0xb8] sm:$0xff]   ;;  %v641_v42 = vld [vmem:[#allocation2 + $0x47] sm:$0xff] }
 0x11d   :  { %4667 = vmatpush3.bf16.msra.mxu1 %v5527_v43  ;;  %417 = vst [vmem:[#allocation2 + $0xe0] sm:$0xff] %v379_v52  ;;  %v5090_v61 = vpop.f32.mrb[28].mxu0  ;;  %v6152_v63 = vpack.c.bf16 %v379_v52, %v378_v47  ;;  %v642_v43 = vld [vmem:[#allocation2 + $0x4f] sm:$0xff]  ;;  %v5551_v47 = vld [vmem:[%s7359_s3 + $0xe0] sm:$0xff]   ;;  %v651_v44 = vld [vmem:[#allocation2 + $0x97] sm:$0xff] }
 0x11e   :  { %4812 = vmatprep.subr.bf16.mxu1 %v5529_v4  ;;  %v316_v0 = vadd.f32 %v5090_v61, %v5876_v7  ;;  %v307_v2 = vpop.f32.mrb[29].mxu0  ;;  %v6251_v49 = vpack.c.bf16 %v642_v43, %v641_v42  ;;  %v5540_v4 = vld [vmem:[%s7359_s3 + $0x180] sm:$0xff]   ;;  %v5541_v50 = vld [vmem:[%s7359_s3 + $0x1c8] sm:$0xff]   ;;  %v6421_v61 = vadd.s32 40, %v6031_v53 }
 0x11f   :  { %5131 = vmatpush3.bf16.msra.mxu0 %v5528_v37  ;;  %v308_v9 = vadd.f32 %v5876_v7, %v307_v2  ;;  %v5091_v10 = vpop.f32.mrb[30].mxu0  ;;  %v487_v37 = vand.u32 15, %v6197_v22  ;;  %v5555_v52 = vld [vmem:[%s7359_s3 + $0x128] sm:$0xff]   ;;  %v643_v2 = vld [vmem:[#allocation2 + $0x57] sm:$0xff]  ;;  %v5552_v28 = vld [vmem:[%s7359_s3 + $0x1a0] sm:$0xff]  }
 0x120   :  { %4027 = vmatmul.mubr.msk.bf16.vlgmr.msra.gmra.mrb[16].mxu1 %vm6096_vm3, %v4026_v24  ;;  %5132 = vmatprep.subr.bf16.mxu0 %v5530_v1  ;;  %v384_v14 = vadd.f32 %v352_v62, %v316_v0  ;;  %v319_v15 = vadd.f32 %v5091_v10, %v5876_v7  ;;  %v310_v48 = vpop.f32.mrb[31].mxu0  ;;  %v5557_v24 = vld [vmem:[%s7359_s3 + $0xe8] sm:$0xff]   ;;  %v6294_v62 = vadd.s32 96, %v6031_v53  ;;  %v5562_v0 = vld [vmem:[%s7359_s3 + $0xf0] sm:$0xff]   ;;  %v5547_v10 = vld [vmem:[%s7359_s3 + $0x1d8] sm:$0xff]  }
 0x121   :  { %5117 = vmatmul.mubr.bf16.gmra.mrb[56].mxu0 %v5997_v31  ;;  %4813 = vmatpush3.bf16.msra.mxu1 %v5531_v55  ;;  %v382_v19 = vadd.f32 %v350_v3, %v308_v9  ;;  %v311_v20 = vadd.f32 %v5876_v7, %v310_v48  ;;  %vm659_vm8 = vcmp.ge.s32.totalorder %v487_v37, 1  ;;  %v6280_v55 = vadd.s32 80, %v6031_v53  ;;  %v645_v3 = vld [vmem:[#allocation2 + $0x67] sm:$0xff]  ;;  %v1578_v42 = vld [vmem:[#allocation2 + $0x19] sm:$0xff] }
 0x122   :  { %5120 = vmatprep.mubr.bf16.mxu0 %v5989_v27  ;;  %4030 = vmatprep.mubr.msk.bf16.mxu1 %vm6161_vm5, %v6175_v12  ;;  %422 = vst [vmem:[#allocation2 + $0x108] sm:$0xff] %v384_v14  ;;  %v385_v31 = vadd.f32 %v353_v11, %v319_v15  ;;  %vm6243_vm9 = vmpackc.low %vm5656_vm2, %vm659_vm8  ;;  %v5563_v11 = vld [vmem:[%s7359_s3 + $0x138] sm:$0xff]   ;;  %v6330_v48 = vld [vmem:[%s7359_s3 + $0x140] sm:$0xff]  }
 0x123   :  { %5133 = vmatpush3.bf16.msra.mxu0 %v5530_v1  ;;  %4814 = vmatprep.subr.bf16.mxu1 %v5533_v6  ;;  %420 = vst [vmem:[#allocation2 + $0xf8] sm:$0xff] %v382_v19  ;;  %v383_v7 = vadd.f32 %v351_v16, %v311_v20  ;;  %v5542_v1 = vld [vmem:[%s7359_s3 + $0x188] sm:$0xff]   ;;  %v4047_v6 = vpack.c.bf16 %v644_v59, %v643_v2  ;;  %v515_v9 = vand.u32 15, %v6280_v55  ;;  %v5548_v15 = vld [vmem:[%s7359_s3 + $0x198] sm:$0xff]   ;;  %v5550_v16 = vld [vmem:[%s7359_s3 + $0x1e0] sm:$0xff]   ;;  %v6339_v20 = vadd.s32 8, %v6031_v53 }
 0x124   :  { %5134 = vmatprep.subr.bf16.mxu0 %v5532_v13  ;;  %423 = vst [vmem:[#allocation2 + $0x110] sm:$0xff] %v385_v31  ;;  %v6202_v29 = vpack.c.bf16 %v385_v31, %v384_v14  ;;  %v5564_v14 = vld [vmem:[%s7359_s3 + $0xf8] sm:$0xff]   ;;  %v649_v31 = vld [vmem:[#allocation2 + $0x87] sm:$0xff] }
 0x125   :  { %4815 = vmatpush3.bf16.msra.mxu1 %v5535_v17  ;;  %421 = vst [vmem:[#allocation2 + $0x100] sm:$0xff] %v383_v7  ;;  %v6204_v30 = vpack.c.bf16 %v383_v7, %v382_v19  ;;  %vm663_vm12 = vcmp.ge.s32.totalorder %v515_v9, 1  ;;  %v6336_v17 = vadd.s32 112, %v6031_v53  ;;  %v648_v19 = vld [vmem:[#allocation2 + $0x7f] sm:$0xff]  ;;  %v650_v7 = vld [vmem:[#allocation2 + $0x8f] sm:$0xff]  ;;  %v480_v9 = vand.u32 15, %v6421_v61 }
 0x126   :  { %4816 = vmatprep.subr.bf16.mxu1 %v5537_v21  ;;  %vm6342_vm14 = vmpackc.low %vm5656_vm2, %vm663_vm12  ;;  %v6367_v37 = vpack.c.bf16 %v650_v7, %v649_v31  ;;  %v1579_v43 = vld [vmem:[#allocation2 + $0x21] sm:$0xff]  ;;  %v1576_v59 = vld [vmem:[#allocation2 + $0x9] sm:$0xff]  ;;  %v6475_v31 = vadd.s32 72, %v6031_v53 }
 0x127   :  { %5135 = vmatpush3.bf16.msra.mxu0 %v5532_v13  ;;  %v529_v13 = vand.u32 15, %v6294_v62  ;;  %v5574_v21 = vld [vmem:[%s7359_s3 + $0x220] sm:$0xff]   ;;  %v1585_v7 = vld [vmem:[#allocation2 + $0x51] sm:$0xff] }
 0x128   :  { %4033 = vmatmul.mubr.msk.bf16.gmra.mrb[20].mxu1 %vm6161_vm5, %v6112_v36  ;;  %5136 = vmatprep.subr.bf16.mxu0 %v5534_v26  ;;  %v6234_v36 = vadd.s32 64, %v6031_v53 }
 0x129   :  { %5121 = vmatmul.mubr.bf16.gmra.mrb[60].mxu0 %v6038_v56  ;;  %4036 = vmatprep.mubr.msk.bf16.mxu1 %vm6207_vm7, %v4035_v35  ;;  %vm665_vm13 = vcmp.ge.s32.totalorder %v529_v13, 1  ;;  %v1583_v13 = vld [vmem:[#allocation2 + $0x41] sm:$0xff] }
 0x12a   :  { %5140 = vmatprep.mubr.msk.bf16.mxu0 %vm6096_vm3, %v6175_v12  ;;  %4817 = vmatpush3.bf16.msra.mxu1 %v5539_v34  ;;  %v501_v46 = vand.u32 15, %v6234_v36  ;;  %vm6356_vm15 = vmpackc.low %vm5656_vm2, %vm665_vm13  ;;  %v5553_v34 = vld [vmem:[%s7359_s3 + $0x1e8] sm:$0xff]  }
 0x12b   :  { %5137 = vmatpush3.bf16.msra.mxu0 %v5534_v26  ;;  %4818 = vmatprep.subr.bf16.mxu1 %v5543_v38  ;;  %v647_v26 = vld [vmem:[#allocation2 + $0x77] sm:$0xff]  ;;  %v452_v38 = vand.u32 15, %v6339_v20 }
 0x12c   :  { %5138 = vmatprep.subr.bf16.mxu0 %v5536_v39  ;;  %vm661_vm10 = vcmp.ge.s32.totalorder %v501_v46, 1  ;;  %v6353_v32 = vpack.c.bf16 %v648_v19, %v647_v26  ;;  %v5566_v26 = vld [vmem:[%s7359_s3 + $0x148] sm:$0xff]  }
 0x12d   :  { %vm6289_vm11 = vmpackc.low %vm5656_vm2, %vm661_vm10  ;;  %vm1597_vm1 = vcmp.le.s32.totalorder %v452_v38, 14  ;;  %v6507_v38 = vadd.s32 88, %v6031_v53 }
 0x12e   :  { %4819 = vmatpush3.bf16.msra.mxu1 %v5545_v40  ;;  %v5556_v40 = vld [vmem:[%s7359_s3 + $0x1f0] sm:$0xff]   ;;  %vm6398_vm4 = vmpackc.low %vm1597_vm1, %vm5656_vm2 }
 0x12f   :  { %5139 = vmatpush3.bf16.msra.mxu0 %v5536_v39  ;;  %4820 = vmatprep.subr.bf16.mxu1 %v5549_v41  ;;  %v5554_v39 = vld [vmem:[%s7359_s3 + $0x1a8] sm:$0xff]   ;;  %v652_v41 = vld [vmem:[#allocation2 + $0x9f] sm:$0xff]  ;;  %v522_v46 = vand.u32 15, %v6507_v38 }
 0x130   :  { %4039 = vmatmul.mubr.msk.bf16.gmra.mrb[24].mxu1 %vm6207_vm7, %v6175_v12  ;;  %4732 = vmatprep.subr.bf16.mxu0 %v5538_v25  ;;  %v6313_v12 = vpack.c.bf16 %v646_v5, %v645_v3  ;;  %v6383_v25 = vadd.s32 24, %v6031_v53  ;;  %v1580_v3 = vld [vmem:[#allocation2 + $0x29] sm:$0xff] }
 0x131   :  { %4042 = vmatprep.mubr.msk.bf16.mxu1 %vm6243_vm9, %v6251_v49  ;;  %vm1607_vm13 = vcmp.le.s32.totalorder %v522_v46, 14  ;;  %v5586_v5 = vld [vmem:[%s7359_s3 + $0x10] sm:$0xff]  }
 0x132   :  { %5141 = vmatmul.mubr.msk.bf16.vlgmr.msra.gmra.mrb[48].mxu0 %vm6161_vm5, %v4035_v35  ;;  %4821 = vmatpush3.bf16.msra.mxu1 %v5551_v47  ;;  %v5558_v47 = vld [vmem:[%s7359_s3 + $0x1b0] sm:$0xff]  }
 0x133   :  { %5144 = vmatprep.mubr.msk.bf16.mxu0 %vm6207_vm7, %v6251_v49  ;;  %4733 = vmatpush3.bf16.msra.mxu0 %v5540_v4  ;;  %vm1601_vm7 = vcmp.le.s32.totalorder %v480_v9, 14  ;;  %v5584_v9 = vld [vmem:[%s7359_s3 + $0x178] sm:$0xff]   ;;  %v5583_v4 = vld [vmem:[%s7359_s3 + $0x8] sm:$0xff]  }
 0x134   :  { %4734 = vmatprep.subr.bf16.mxu0 %v5541_v50  ;;  %4822 = vmatprep.subr.bf16.mxu1 %v5555_v52  ;;  %v5559_v50 = vld [vmem:[%s7359_s3 + $0x1f8] sm:$0xff]   ;;  %v4167_v52 = vpack.c.bf16 %v1579_v43, %v1578_v42  ;;  %vm6455_vm8 = vmpackc.low %vm1601_vm7, %vm5656_vm2 }
 0x135   :  { %v5578_v43 = vld [vmem:[%s7359_s3 + $0x238] sm:$0xff]  }
 0x136   :  { %4823 = vmatpush3.bf16.msra.mxu1 %v5557_v24  ;;  %v466_v24 = vand.u32 15, %v6383_v25  ;;  %v5598_v42 = vld [vmem:[%s7359_s3 + $0x98] sm:$0xff]  }
 0x137   :  { %4735 = vmatpush3.bf16.msra.mxu0 %v5542_v1  ;;  %4824 = vmatprep.subr.bf16.mxu1 %v5561_v57  ;;  %v5560_v1 = vld [vmem:[%s7359_s3 + $0x1b8] sm:$0xff]   ;;  %v5568_v57 = vld [vmem:[%s7359_s3 + $0x200] sm:$0xff]  }
 0x138   :  { %4045 = vmatmul.mubr.msk.bf16.gmra.mrb[28].mxu1 %vm6243_vm9, %v4035_v35  ;;  %4736 = vmatprep.subr.bf16.mxu0 %v5544_v60  ;;  %v543_v35 = vand.u32 15, %v6336_v17  ;;  %v1577_v60 = vld [vmem:[#allocation2 + $0x11] sm:$0xff]  ;;  %vm1599_vm5 = vcmp.le.s32.totalorder %v466_v24, 14  ;;  %v5576_v24 = vld [vmem:[%s7359_s3 + $0x168] sm:$0xff]  }
 0x139   :  { %4048 = vmatprep.mubr.msk.bf16.mxu1 %vm6289_vm11, %v4047_v6  ;;  %v4170_v2 = vpack.c.bf16 %v1577_v60, %v1576_v59  ;;  %vm6427_vm6 = vmpackc.low %vm1599_vm5, %vm5656_vm2 }
 0x13a   :  { %5145 = vmatmul.mubr.msk.bf16.gmra.mrb[52].mxu0 %vm6243_vm9, %v4047_v6  ;;  %4825 = vmatpush3.bf16.msra.mxu1 %v5562_v0  ;;  %vm667_vm0 = vcmp.ge.s32.totalorder %v543_v35, 1  ;;  %v1581_v0 = vld [vmem:[#allocation2 + $0x31] sm:$0xff]  ;;  %v508_v35 = vand.u32 15, %v6475_v31 }
 0x13b   :  { %5148 = vmatprep.mubr.msk.bf16.mxu0 %vm6289_vm11, %v6313_v12  ;;  %4737 = vmatpush3.bf16.msra.mxu0 %v5546_v8  ;;  %vm6386_vm3 = vmpackc.low %vm5656_vm2, %vm667_vm0  ;;  %v6437_v8 = vpack.c.bf16 %v1581_v0, %v1580_v3  ;;  %v5579_v0 = vld [vmem:[%s7359_s3 + $0x170] sm:$0xff]   ;;  %v1590_v3 = vld [vmem:[#allocation2 + $0x79] sm:$0xff] }
 0x13c   :  { %4738 = vmatprep.subr.bf16.mxu0 %v5547_v10  ;;  %4826 = vmatprep.subr.bf16.mxu1 %v5563_v11  ;;  %v5571_v10 = vld [vmem:[%s7359_s3 + $0x210] sm:$0xff]   ;;  %v6449_v11 = vadd.s32 56, %v6031_v53 }
 0x13e   :  { %4827 = vmatpush3.bf16.msra.mxu1 %v5564_v14  ;;  %v494_v19 = vand.u32 15, %v6449_v11  ;;  %v5587_v14 = vld [vmem:[%s7359_s3 + $0x58] sm:$0xff]  }
 0x13f   :  { %4739 = vmatpush3.bf16.msra.mxu0 %v5548_v15  ;;  %5188 = vmatprep.subr.bf16.mxu1 %v6330_v48  ;;  %v5572_v15 = vld [vmem:[%s7359_s3 + $0x218] sm:$0xff]  }
 0x140   :  { %4051 = vmatmul.mubr.msk.bf16.gmra.mrb[32].mxu1 %vm6289_vm11, %v6251_v49  ;;  %4740 = vmatprep.subr.bf16.mxu0 %v5550_v16  ;;  %v6395_v49 = vpack.c.bf16 %v652_v41, %v651_v44  ;;  %vm1603_vm9 = vcmp.le.s32.totalorder %v494_v19, 14  ;;  %vm1605_vm11 = vcmp.le.s32.totalorder %v508_v35, 14  ;;  %v5570_v41 = vld [vmem:[%s7359_s3 + $0x158] sm:$0xff]   ;;  %v1592_v19 = vld [vmem:[#allocation2 + $0x89] sm:$0xff]  ;;  %v2158_v35 = vadd.s32 128, %v6031_v53 }
 0x141   :  { %4054 = vmatprep.mubr.msk.bf16.mxu1 %vm6342_vm14, %v6313_v12  ;;  %vm6482_vm10 = vmpackc.low %vm1603_vm9, %vm5656_vm2 }
 0x142   :  { %5149 = vmatmul.mubr.msk.bf16.gmra.mrb[56].mxu0 %vm6342_vm14, %v6353_v32  ;;  %vm6514_vm12 = vmpackc.low %vm1605_vm11, %vm5656_vm2 }
 0x143   :  { %5152 = vmatprep.mubr.msk.bf16.mxu0 %vm6356_vm15, %v6367_v37  ;;  %4741 = vmatpush3.bf16.msra.mxu0 %v5552_v28  ;;  %v1584_v28 = vld [vmem:[#allocation2 + $0x49] sm:$0xff] }
 0x144   :  { %4742 = vmatprep.subr.bf16.mxu0 %v5553_v34  ;;  %v6490_v34 = vpack.c.bf16 %v1585_v7, %v1584_v28  ;;  %v5581_v28 = vld [vmem:[%s7359_s3] sm:$0xff]   ;;  %v5610_v7 = vld [vmem:[%s7359_s3 + $0x190] sm:$0xff]  }
 0x147   :  { %4743 = vmatpush3.bf16.msra.mxu0 %v5554_v39  ;;  %v1586_v39 = vld [vmem:[#allocation2 + $0x59] sm:$0xff] }
 0x148   :  { %4057 = vmatmul.mubr.msk.bf16.gmra.mrb[36].mxu1 %vm6342_vm14, %v4047_v6  ;;  %4744 = vmatprep.subr.bf16.mxu0 %v5556_v40  ;;  %v5569_v6 = vld [vmem:[%s7359_s3 + $0x208] sm:$0xff]   ;;  %vm6545_vm14 = vmpackc.low %vm1607_vm13, %vm5656_vm2 }
 0x149   :  { %4060 = vmatprep.mubr.msk.bf16.mxu1 %vm6356_vm15, %v6353_v32  ;;  %v1587_v40 = vld [vmem:[#allocation2 + $0x61] sm:$0xff] }
 0x14a   :  { %5153 = vmatmul.mubr.msk.bf16.gmra.mrb[60].mxu0 %vm6386_vm3, %v6395_v49  ;;  %v6521_v44 = vpack.c.bf16 %v1587_v40, %v1586_v39  ;;  %v1594_v39 = vld [vmem:[#allocation2 + $0x99] sm:$0xff]  ;;  %v1595_v40 = vld [vmem:[#allocation2 + $0xa1] sm:$0xff] }
 0x14b   :  { %4745 = vmatpush3.bf16.msra.mxu0 %v5558_v47  ;;  %4168 = vmatprep.mubr.msk.bf16.mxu0 %vm6398_vm4, %v4167_v52  ;;  %v5580_v47 = vld [vmem:[%s7359_s3 + $0x40] sm:$0xff]  }
 0x14c   :  { %4746 = vmatprep.subr.bf16.mxu0 %v5559_v50  ;;  %v6538_v50 = vadd.s32 104, %v6031_v53 }
 0x14e   :  { %v536_v60 = vand.u32 15, %v6538_v50 }
 0x14f   :  { %4747 = vmatpush3.bf16.msra.mxu0 %v5560_v1  ;;  %v1588_v1 = vld [vmem:[#allocation2 + $0x69] sm:$0xff] }
 0x150   :  { %4063 = vmatmul.mubr.msk.bf16.gmra.mrb[40].mxu1 %vm6356_vm15, %v6313_v12  ;;  %5156 = vmatprep.subr.bf16.mxu0 %v5568_v57  ;;  %v1582_v12 = vld [vmem:[#allocation2 + $0x39] sm:$0xff]  ;;  %vm1609_vm15 = vcmp.le.s32.totalorder %v536_v60, 14 }
 0x151   :  { %4066 = vmatprep.mubr.msk.bf16.mxu1 %vm6386_vm3, %v6367_v37  ;;  %v6462_v16 = vpack.c.bf16 %v1583_v13, %v1582_v12  ;;  %vm6567_vm0 = vmpackc.low %vm1609_vm15, %vm5656_vm2 }
 0x152   :  { %4171 = vmatmul.mubr.msk.bf16.vlgmr.msra.gmra.mrb[64].mxu0 %vm6398_vm4, %v4170_v2  ;;  %v6560_v2 = vadd.s32 120, %v6031_v53  ;;  %v2178_v53 = vand.u32 15, %v2158_v35  ;;  %v2168_v35 = vadd.s32 128, %v6280_v55  ;;  %v2379_v55 = vld [vmem:[#allocation2 + $0xef] sm:$0xff] }
 0x153   :  { %4174 = vmatprep.mubr.msk.bf16.mxu0 %vm6427_vm6, %v6437_v8  ;;  %5157 = vmatpush3.bf16.msra.mxu0 %v5568_v57  ;;  %v5605_v57 = vld [vmem:[%s7359_s3 + $0x1c0] sm:$0xff]  }
 0x154   :  { %5158 = vmatprep.subr.bf16.mxu0 %v5569_v6  ;;  %v550_v13 = vand.u32 15, %v6560_v2  ;;  %v2248_v46 = vand.u32 15, %v2168_v35 }
 0x156   :  { %vm1611_vm1 = vcmp.le.s32.totalorder %v550_v13, 14  ;;  %v5604_v13 = vld [vmem:[%s7359_s3 + $0xb8] sm:$0xff]  }
 0x157   :  { %5159 = vmatpush3.bf16.msra.mxu0 %v5569_v6  ;;  %v1591_v6 = vld [vmem:[#allocation2 + $0x81] sm:$0xff] }
 0x158   :  { %4069 = vmatmul.mubr.msk.bf16.gmra.mrb[44].mxu1 %vm6386_vm3, %v6353_v32  ;;  %5160 = vmatprep.subr.bf16.mxu0 %v5571_v10  ;;  %v4203_v12 = vpack.c.bf16 %v1591_v6, %v1590_v3  ;;  %vm6583_vm3 = vmpackc.low %vm1611_vm1, %vm5656_vm2  ;;  %v5591_v32 = vld [vmem:[%s7359_s3 + $0x20] sm:$0xff]   ;;  %v5607_v3 = vld [vmem:[%s7359_s3 + $0x1c8] sm:$0xff]  }
 0x159   :  { %2808 = vmatprep.mubr.bf16.mxu1 %v6038_v56 }
 0x15a   :  { %4177 = vmatmul.mubr.msk.bf16.gmra.mrb[68].mxu0 %vm6427_vm6, %v4167_v52  ;;  %v1589_v52 = vld [vmem:[#allocation2 + $0x71] sm:$0xff] }
 0x15b   :  { %4180 = vmatprep.mubr.msk.bf16.mxu0 %vm6455_vm8, %v6462_v16  ;;  %5161 = vmatpush3.bf16.msra.mxu0 %v5571_v10  ;;  %v4197_v59 = vpack.c.bf16 %v1589_v52, %v1588_v1  ;;  %v2162_v52 = vadd.s32 128, %v6135_v51  ;;  %v5602_v1 = vld [vmem:[%s7359_s3 + $0xa8] sm:$0xff]  }
 0x15c   :  { %5162 = vmatprep.subr.bf16.mxu0 %v5572_v15  ;;  %v5608_v10 = vld [vmem:[%s7359_s3 + $0x188] sm:$0xff]  }
 0x15d   :  { %v2206_v60 = vand.u32 15, %v2162_v52 }
 0x15f   :  { %5163 = vmatpush3.bf16.msra.mxu0 %v5572_v15  ;;  %v5589_v15 = vld [vmem:[%s7359_s3 + $0x80] sm:$0xff]  }
 0x160   :  { %2809 = vmatmul.mubr.bf16.vlgmr.msra.gmra.mrb[48].mxu1 %v5989_v27  ;;  %5164 = vmatprep.subr.bf16.mxu0 %v5574_v21  ;;  %v5567_v27 = vld [vmem:[%s7359_s3 + $0x150] sm:$0xff]  }
 0x161   :  { %5189 = vmatpush3.bf16.msra.mxu1 %v6330_v48  ;;  %2816 = vmatprep.mubr.bf16.mxu1 %v6033_v54  ;;  %v5577_v48 = vld [vmem:[%s7359_s3 + $0x230] sm:$0xff]  }
 0x162   :  { %4183 = vmatmul.mubr.msk.bf16.gmra.mrb[72].mxu0 %vm6455_vm8, %v6437_v8  ;;  %5190 = vmatprep.subr.bf16.mxu1 %v5566_v26 }
 0x163   :  { %4186 = vmatprep.mubr.msk.bf16.mxu0 %vm6482_vm10, %v6490_v34  ;;  %5165 = vmatpush3.bf16.msra.mxu0 %v5574_v21  ;;  %v1593_v21 = vld [vmem:[#allocation2 + $0x91] sm:$0xff] }
 0x164   :  { %5166 = vmatprep.subr.bf16.mxu0 %v5575_v33 }
 0x165   :  { %5191 = vmatpush3.bf16.msra.mxu1 %v5566_v26  ;;  %v6587_v26 = vpack.c.bf16 %v1593_v21, %v1592_v19 }
 0x166   :  { %5192 = vmatprep.subr.bf16.mxu1 %v5567_v27 }
 0x167   :  { %5167 = vmatpush3.bf16.msra.mxu0 %v5575_v33  ;;  %v5582_v33 = vld [vmem:[%s7359_s3 + $0x48] sm:$0xff]  }
 0x168   :  { %2817 = vmatmul.mubr.bf16.gmra.mrb[52].mxu1 %v6038_v56  ;;  %5168 = vmatprep.subr.bf16.mxu0 %v5577_v48  ;;  %v5573_v56 = vld [vmem:[%s7359_s3 + $0x160] sm:$0xff]  }
 0x169   :  { %2824 = vmatprep.mubr.bf16.mxu1 %v6091_v23  ;;  %5193 = vmatpush3.bf16.msra.mxu1 %v5567_v27  ;;  %v5593_v27 = vld [vmem:[%s7359_s3 + $0x68] sm:$0xff]  }
 0x16a   :  { %4189 = vmatmul.mubr.msk.bf16.gmra.mrb[76].mxu0 %vm6482_vm10, %v6462_v16  ;;  %5194 = vmatprep.subr.bf16.mxu1 %v5570_v41 }
 0x16b   :  { %4192 = vmatprep.mubr.msk.bf16.mxu0 %vm6514_vm12, %v6521_v44  ;;  %5169 = vmatpush3.bf16.msra.mxu0 %v5577_v48  ;;  %v5595_v48 = vld [vmem:[%s7359_s3 + $0x90] sm:$0xff]  }
 0x16c   :  { %5170 = vmatprep.subr.bf16.mxu0 %v5578_v43 }
 0x16d   :  { %5195 = vmatpush3.bf16.msra.mxu1 %v5570_v41  ;;  %v2160_v41 = vadd.s32 128, %v6081_v45  ;;  %v5599_v45 = vld [vmem:[%s7359_s3 + $0x78] sm:$0xff]  }
 0x16e   :  { %5196 = vmatprep.subr.bf16.mxu1 %v5573_v56 }
 0x16f   :  { %5171 = vmatpush3.bf16.msra.mxu0 %v5578_v43  ;;  %v5597_v43 = vld [vmem:[%s7359_s3 + $0x30] sm:$0xff]  }
 0x170   :  { %2825 = vmatmul.mubr.bf16.gmra.mrb[56].mxu1 %v6033_v54  ;;  %4892 = vmatprep.subr.bf16.mxu0 %v5580_v47  ;;  %v5600_v47 = vld [vmem:[%s7359_s3 + $0x38] sm:$0xff]  }
 0x171   :  { %2832 = vmatprep.mubr.bf16.mxu1 %v6083_v18  ;;  %5197 = vmatpush3.bf16.msra.mxu1 %v5573_v56  ;;  %v2192_v56 = vand.u32 15, %v2160_v41  ;;  %v6803_v41 = vld [vmem:[%s7359_s3 + $0x1a8] sm:$0xff]  }
 0x172   :  { %4195 = vmatmul.mubr.msk.bf16.gmra.mrb[80].mxu0 %vm6514_vm12, %v6490_v34  ;;  %5198 = vmatprep.subr.bf16.mxu1 %v5576_v24 }
 0x173   :  { %4198 = vmatprep.mubr.msk.bf16.mxu0 %vm6545_vm14, %v4197_v59 }
 0x175   :  { %5199 = vmatpush3.bf16.msra.mxu1 %v5576_v24  ;;  %v2370_v24 = vld [vmem:[#allocation2 + $0xa7] sm:$0xff] }
 0x176   :  { %5200 = vmatprep.subr.bf16.mxu1 %v5579_v0 }
 0x178   :  { %2833 = vmatmul.mubr.bf16.gmra.mrb[60].mxu1 %v6091_v23 }
 0x179   :  { %2840 = vmatprep.mubr.bf16.mxu1 %v6152_v63  ;;  %5201 = vmatpush3.bf16.msra.mxu1 %v5579_v0  ;;  %v5606_v0 = vld [vmem:[%s7359_s3 + $0x180] sm:$0xff]  }
 0x17a   :  { %4201 = vmatmul.mubr.msk.bf16.gmra.mrb[84].mxu0 %vm6545_vm14, %v6521_v44  ;;  %5202 = vmatprep.subr.bf16.mxu1 %v5584_v9 }
 0x17b   :  { %4204 = vmatprep.mubr.msk.bf16.mxu0 %vm6567_vm0, %v4203_v12 }
 0x17d   :  { %5203 = vmatpush3.bf16.msra.mxu1 %v5584_v9  ;;  %v2372_v9 = vld [vmem:[#allocation2 + $0xb7] sm:$0xff] }
 0x17e   :  { %5220 = vmatprep.subr.bf16.mxu1 %v5589_v15 }
 0x180   :  { %2841 = vmatmul.mubr.bf16.gmra.mrb[64].mxu1 %v6083_v18 }
 0x181   :  { %2848 = vmatprep.mubr.bf16.mxu1 %v6147_v58 }
 0x182   :  { %4207 = vmatmul.mubr.msk.bf16.gmra.mrb[88].mxu0 %vm6567_vm0, %v4197_v59 }
 0x183   :  { %4210 = vmatprep.mubr.msk.bf16.mxu0 %vm6583_vm3, %v6587_v26 }
 0x188   :  { %2849 = vmatmul.mubr.bf16.gmra.mrb[68].mxu1 %v6152_v63 }
 0x189   :  { %2856 = vmatprep.mubr.bf16.mxu1 %v6204_v30 }
 0x18a   :  { %4213 = vmatmul.mubr.msk.bf16.gmra.mrb[92].mxu0 %vm6583_vm3, %v4203_v12 }
 0x18b   :  { %5172 = vmatprep.mubr.msk.bf16.mxu0 %vm6398_vm4, %v6437_v8  ;;  %v5585_v8 = vld [vmem:[%s7359_s3 + $0x50] sm:$0xff]   ;;  %vm2386_vm4 = vcmp.ge.s32.totalorder %v2178_v53, 1  ;;  %v2377_v53 = vld [vmem:[#allocation2 + $0xdf] sm:$0xff] }
 0x18c   :  { %vm6678_vm5 = vmpackc.low %vm5656_vm2, %vm2386_vm4 }
 0x190   :  { %2857 = vmatmul.mubr.bf16.gmra.mrb[72].mxu1 %v6147_v58 }
 0x191   :  { %2864 = vmatprep.mubr.bf16.mxu1 %v6202_v29 }
 0x192   :  { %5173 = vmatmul.mubr.msk.bf16.vlgmr.msra.gmra.mrb[48].mxu0 %vm6427_vm6, %v6462_v16  ;;  %v5588_v16 = vld [vmem:[%s7359_s3 + $0x18] sm:$0xff]   ;;  %vm2388_vm6 = vcmp.ge.s32.totalorder %v2192_v56, 1 }
 0x193   :  { %5176 = vmatprep.mubr.msk.bf16.mxu0 %vm6455_vm8, %v6490_v34  ;;  %4893 = vmatpush3.bf16.msra.mxu0 %v5581_v28  ;;  %v5590_v34 = vld [vmem:[%s7359_s3 + $0x60] sm:$0xff]   ;;  %vm6707_vm7 = vmpackc.low %vm5656_vm2, %vm2388_vm6  ;;  %vm2390_vm8 = vcmp.ge.s32.totalorder %v2206_v60, 1  ;;  %v5611_v28 = vld [vmem:[%s7359_s3 + $0x1d8] sm:$0xff]   ;;  %v2159_v60 = vadd.s32 128, %v6339_v20 }
 0x194   :  { %4894 = vmatprep.subr.bf16.mxu0 %v5582_v33  ;;  %vm6737_vm9 = vmpackc.low %vm5656_vm2, %vm2390_vm8  ;;  %v2166_v33 = vadd.s32 128, %v6234_v36 }
 0x196   :  { %v2234_v36 = vand.u32 15, %v2166_v33  ;;  %v2384_v33 = vld [vmem:[#allocation2 + $0x117] sm:$0xff] }
 0x197   :  { %4895 = vmatpush3.bf16.msra.mxu0 %v5583_v4  ;;  %v2374_v4 = vld [vmem:[#allocation2 + $0xc7] sm:$0xff] }
 0x198   :  { %2865 = vmatmul.mubr.bf16.gmra.mrb[76].mxu1 %v6204_v30  ;;  %4896 = vmatprep.subr.bf16.mxu0 %v5585_v8  ;;  %v2375_v8 = vld [vmem:[#allocation2 + $0xcf] sm:$0xff] }
 0x199   :  { %5204 = vmatprep.mubr.bf16.mxu1 %v6033_v54  ;;  %v5592_v54 = vld [vmem:[%s7359_s3 + $0x88] sm:$0xff]  }
 0x19a   :  { %5177 = vmatmul.mubr.msk.bf16.gmra.mrb[52].mxu0 %vm6482_vm10, %v6521_v44  ;;  %v6674_v44 = vpack.c.bf16 %v1595_v40, %v1594_v39 }
 0x19b   :  { %5180 = vmatprep.mubr.msk.bf16.mxu0 %vm6514_vm12, %v4197_v59  ;;  %4897 = vmatpush3.bf16.msra.mxu0 %v5586_v5  ;;  %v6763_v5 = vld [vmem:[%s7359_s3 + $0x1e0] sm:$0xff]   ;;  %vm2394_vm12 = vcmp.ge.s32.totalorder %v2234_v36, 1  ;;  %v2380_v59 = vld [vmem:[#allocation2 + $0xf7] sm:$0xff]  ;;  %v3312_v36 = vld [vmem:[#allocation2 + $0xa9] sm:$0xff] }
 0x19c   :  { %4898 = vmatprep.subr.bf16.mxu0 %v5587_v14  ;;  %v6765_v14 = vpack.c.bf16 %v2375_v8, %v2374_v4  ;;  %vm6808_vm13 = vmpackc.low %vm5656_vm2, %vm2394_vm12  ;;  %v2385_v4 = vld [vmem:[#allocation2 + $0x11f] sm:$0xff] }
 0x19f   :  { %4899 = vmatpush3.bf16.msra.mxu0 %v5588_v16  ;;  %v3313_v16 = vld [vmem:[#allocation2 + $0xb1] sm:$0xff] }
 0x1a0   :  { %5205 = vmatmul.mubr.bf16.vlgmr.msra.gmra.mrb[80].mxu1 %v6091_v23  ;;  %4900 = vmatprep.subr.bf16.mxu0 %v5590_v34  ;;  %v5594_v23 = vld [vmem:[%s7359_s3 + $0x28] sm:$0xff]   ;;  %v6782_v34 = vld [vmem:[%s7359_s3 + $0x1a0] sm:$0xff]  }
 0x1a1   :  { %5221 = vmatpush3.bf16.msra.mxu1 %v5589_v15  ;;  %5208 = vmatprep.mubr.bf16.mxu1 %v6083_v18  ;;  %v5596_v18 = vld [vmem:[%s7359_s3 + $0x70] sm:$0xff]  }
 0x1a2   :  { %5181 = vmatmul.mubr.msk.bf16.gmra.mrb[56].mxu0 %vm6545_vm14, %v4203_v12  ;;  %5222 = vmatprep.subr.bf16.mxu1 %v5592_v54  ;;  %v2373_v12 = vld [vmem:[#allocation2 + $0xbf] sm:$0xff]  ;;  %v5609_v15 = vld [vmem:[%s7359_s3 + $0x1d0] sm:$0xff]   ;;  %vm6836_vm14 = vcmp.ge.s32.totalorder %v2248_v46, 1 }
 0x1a3   :  { %5184 = vmatprep.mubr.msk.bf16.mxu0 %vm6567_vm0, %v6587_v26  ;;  %4901 = vmatpush3.bf16.msra.mxu0 %v5591_v32  ;;  %vm6859_vm0 = vmpackc.low %vm5656_vm2, %vm6836_vm14 }
 0x1a4   :  { %4902 = vmatprep.subr.bf16.mxu0 %v5593_v27  ;;  %v2376_v27 = vld [vmem:[#allocation2 + $0xd7] sm:$0xff] }
 0x1a5   :  { %5223 = vmatpush3.bf16.msra.mxu1 %v5592_v54  ;;  %v6790_v54 = vld [vmem:[%s7359_s3 + $0x1e8] sm:$0xff]  }
 0x1a6   :  { %5224 = vmatprep.subr.bf16.mxu1 %v5595_v48 }
 0x1a7   :  { %4903 = vmatpush3.bf16.msra.mxu0 %v5594_v23 }
 0x1a8   :  { %5209 = vmatmul.mubr.bf16.gmra.mrb[84].mxu1 %v6152_v63  ;;  %4904 = vmatprep.subr.bf16.mxu0 %v5596_v18  ;;  %v5601_v63 = vld [vmem:[%s7359_s3 + $0xa0] sm:$0xff]  }
 0x1a9   :  { %5225 = vmatpush3.bf16.msra.mxu1 %v5595_v48  ;;  %5212 = vmatprep.mubr.bf16.mxu1 %v6147_v58  ;;  %v2371_v58 = vld [vmem:[#allocation2 + $0xaf] sm:$0xff]  ;;  %v2170_v48 = vadd.s32 128, %v6294_v62  ;;  %v2378_v18 = vld [vmem:[#allocation2 + $0xe7] sm:$0xff] }
 0x1aa   :  { %5185 = vmatmul.mubr.msk.bf16.gmra.mrb[60].mxu0 %vm6583_vm3, %v6674_v44  ;;  %5226 = vmatprep.subr.bf16.mxu1 %v5598_v42  ;;  %v4342_v51 = vpack.c.bf16 %v2371_v58, %v2370_v24  ;;  %v6817_v56 = vpack.c.bf16 %v2379_v55, %v2378_v18  ;;  %v6832_v58 = vld [vmem:[%s7359_s3 + $0x1b0] sm:$0xff]   ;;  %v2172_v24 = vadd.s32 128, %v6336_v17  ;;  %v5621_v62 = vld [vmem:[%s7359_s3 + $0x200] sm:$0xff]  }
 0x1ab   :  { %4905 = vmatpush3.bf16.msra.mxu0 %v5597_v43  ;;  %4337 = vmatprep.mubr.msk.bf16.mxu0 %vm6678_vm5, %v6395_v49 }
 0x1ac   :  { %4906 = vmatprep.subr.bf16.mxu0 %v5599_v45  ;;  %v6815_v45 = vld [vmem:[%s7359_s3 + $0x1f0] sm:$0xff]  }
 0x1ad   :  { %5227 = vmatpush3.bf16.msra.mxu1 %v5598_v42  ;;  %v6805_v42 = vpack.c.bf16 %v2377_v53, %v2376_v27 }
 0x1ae   :  { %5228 = vmatprep.subr.bf16.mxu1 %v5601_v63 }
 0x1af   :  { %4907 = vmatpush3.bf16.msra.mxu0 %v5600_v47  ;;  %v2262_v47 = vand.u32 15, %v2170_v48  ;;  %v4405_v48 = vpack.c.bf16 %v2385_v4, %v2384_v33 }
 0x1b0   :  { %5213 = vmatmul.mubr.bf16.gmra.mrb[88].mxu1 %v6204_v30  ;;  %4972 = vmatprep.subr.bf16.mxu0 %v5605_v57  ;;  %v5603_v30 = vld [vmem:[%s7359_s3 + $0xb0] sm:$0xff]  }
 0x1b1   :  { %5229 = vmatpush3.bf16.msra.mxu1 %v5601_v63  ;;  %5216 = vmatprep.mubr.bf16.mxu1 %v6202_v29  ;;  %v5629_v29 = vld [vmem:[#allocation2 + $0x8] sm:$0xff]  ;;  %vm6847_vm15 = vcmp.ge.s32.totalorder %v2262_v47, 1  ;;  %v2165_v47 = vadd.s32 128, %v6449_v11 }
 0x1b2   :  { %4340 = vmatmul.mubr.msk.bf16.vlgmr.msra.gmra.mrb[96].mxu0 %vm6678_vm5, %v6367_v37  ;;  %5230 = vmatprep.subr.bf16.mxu1 %v5602_v1  ;;  %v2583_v6 = vpack.c.bf16 %v5629_v29, %v5629_v29  ;;  %v2164_v37 = vadd.s32 128, %v6197_v22  ;;  %v4348_v22 = vpack.c.bf16 %v2373_v12, %v2372_v9  ;;  %vm6872_vm1 = vmpackc.low %vm5656_vm2, %vm6847_vm15 }
 0x1b3   :  { %4343 = vmatprep.mubr.msk.bf16.mxu0 %vm6707_vm7, %v4342_v51  ;;  %4973 = vmatpush3.bf16.msra.mxu0 %v5606_v0  ;;  %v2227_v20 = vand.u32 15, %v2165_v47 }
 0x1b4   :  { %4974 = vmatprep.subr.bf16.mxu0 %v5607_v3  ;;  %v2220_v21 = vand.u32 15, %v2164_v37 }
 0x1b5   :  { %5231 = vmatpush3.bf16.msra.mxu1 %v5602_v1  ;;  %v5619_v1 = vld [vmem:[%s7359_s3 + $0x1f8] sm:$0xff]  }
 0x1b6   :  { %5232 = vmatprep.subr.bf16.mxu1 %v5603_v30  ;;  %vm2392_vm10 = vcmp.ge.s32.totalorder %v2220_v21, 1 }
 0x1b7   :  { %4975 = vmatpush3.bf16.msra.mxu0 %v5608_v10  ;;  %vm6771_vm11 = vmpackc.low %vm5656_vm2, %vm2392_vm10 }
 0x1b8   :  { %5217 = vmatmul.mubr.bf16.gmra.mrb[92].mxu1 %v2583_v6  ;;  %4976 = vmatprep.subr.bf16.mxu0 %v5609_v15 }
 0x1b9   :  { %5233 = vmatpush3.bf16.msra.mxu1 %v5603_v30  ;;  %5236 = vmatprep.mubr.msk.bf16.mxu1 %vm6678_vm5, %v4342_v51  ;;  %v2382_v30 = vld [vmem:[#allocation2 + $0x107] sm:$0xff] }
 0x1ba   :  { %4346 = vmatmul.mubr.msk.bf16.gmra.mrb[100].mxu0 %vm6707_vm7, %v6395_v49  ;;  %5234 = vmatprep.subr.bf16.mxu1 %v5604_v13  ;;  %v6758_v49 = vld [vmem:[%s7359_s3 + $0x198] sm:$0xff]  }
 0x1bb   :  { %4349 = vmatprep.mubr.msk.bf16.mxu0 %vm6737_vm9, %v4348_v22  ;;  %4977 = vmatpush3.bf16.msra.mxu0 %v5610_v7 }
 0x1bc   :  { %4978 = vmatprep.subr.bf16.mxu0 %v5611_v28 }
 0x1bd   :  { %5235 = vmatpush3.bf16.msra.mxu1 %v5604_v13  ;;  %v2276_v13 = vand.u32 15, %v2172_v24  ;;  %v3315_v24 = vld [vmem:[#allocation2 + $0xc1] sm:$0xff] }
 0x1be   :  { %5300 = vmatprep.subr.bf16.mxu1 %v5605_v57 }
 0x1bf   :  { %4979 = vmatpush3.bf16.msra.mxu0 %v6758_v49  ;;  %vm6891_vm3 = vcmp.ge.s32.totalorder %v2276_v13, 1 }
 0x1c0   :  { %5237 = vmatmul.mubr.msk.bf16.vlgmr.msra.gmra.mrb[80].mxu1 %vm6707_vm7, %v4348_v22  ;;  %4980 = vmatprep.subr.bf16.mxu0 %v6763_v5  ;;  %vm6911_vm5 = vmpackc.low %vm5656_vm2, %vm6891_vm3 }
 0x1c1   :  { %5308 = vmatpush3.bf16.msra.mxu1 %v5606_v0  ;;  %5240 = vmatprep.mubr.msk.bf16.mxu1 %vm6737_vm9, %v6765_v14  ;;  %v2161_v0 = vadd.s32 128, %v6383_v25  ;;  %v5620_v25 = vld [vmem:[%s7359_s3 + $0x1b8] sm:$0xff]  }
 0x1c2   :  { %4352 = vmatmul.mubr.msk.bf16.gmra.mrb[104].mxu0 %vm6737_vm9, %v4342_v51  ;;  %5301 = vmatprep.subr.bf16.mxu1 %v5607_v3  ;;  %v2381_v51 = vld [vmem:[#allocation2 + $0xff] sm:$0xff]  ;;  %v2383_v3 = vld [vmem:[#allocation2 + $0x10f] sm:$0xff]  ;;  %vm3335_vm9 = vcmp.le.s32.totalorder %v2227_v20, 14 }
 0x1c3   :  { %4355 = vmatprep.mubr.msk.bf16.mxu0 %vm6771_vm11, %v6765_v14  ;;  %v4588_v32 = vpop.f32.mrb[32].mxu0  ;;  %4981 = vmatpush3.bf16.msra.mxu0 %v6782_v34  ;;  %v6878_v19 = vpack.c.bf16 %v2383_v3, %v2382_v30  ;;  %v5622_v30 = vld [vmem:[%s7359_s3 + $0x208] sm:$0xff]  }
 0x1c4   :  { %v4589_v23 = vpop.f32.mrb[33].mxu0  ;;  %4982 = vmatprep.subr.bf16.mxu0 %v6790_v54 }
 0x1c5   :  { %5309 = vmatpush3.bf16.msra.mxu1 %v5608_v10  ;;  %v6798_v39 = vadd.f32 %v4589_v23, %v4588_v32  ;;  %v4591_v40 = vpop.f32.mrb[34].mxu0  ;;  %v6867_v10 = vpack.c.bf16 %v2381_v51, %v2380_v59 }
 0x1c6   :  { %5302 = vmatprep.subr.bf16.mxu1 %v5609_v15  ;;  %v4592_v43 = vpop.f32.mrb[35].mxu0 }
 0x1c7   :  { %v6819_v63 = vadd.f32 %v4592_v43, %v4591_v40  ;;  %4983 = vmatpush3.bf16.msra.mxu0 %v6803_v41  ;;  %v6927_v40 = vpack.c.bf16 %v3313_v16, %v3312_v36  ;;  %v2169_v16 = vadd.s32 128, %v6507_v38 }
 0x1c8   :  { %5241 = vmatmul.mubr.msk.bf16.gmra.mrb[84].mxu1 %vm6771_vm11, %v6805_v42  ;;  %4984 = vmatprep.subr.bf16.mxu0 %v6815_v45 }
 0x1c9   :  { %5310 = vmatpush3.bf16.msra.mxu1 %v5610_v7  ;;  %5244 = vmatprep.mubr.msk.bf16.mxu1 %vm6808_vm13, %v6817_v56 }
 0x1ca   :  { %4358 = vmatmul.mubr.msk.bf16.gmra.mrb[108].mxu0 %vm6771_vm11, %v4348_v22  ;;  %5303 = vmatprep.subr.bf16.mxu1 %v5611_v28  ;;  %v2199_v22 = vand.u32 15, %v2161_v0  ;;  %vm6989_vm11 = vmpackc.low %vm3335_vm9, %vm5656_vm2 }
 0x1cb   :  { %4361 = vmatprep.mubr.msk.bf16.mxu0 %vm6808_vm13, %v6805_v42  ;;  %v4594_v57 = vpop.f32.mrb[36].mxu0  ;;  %4985 = vmatpush3.bf16.msra.mxu0 %v6832_v58 }
 0x1cc   :  { %v4595_v17 = vpop.f32.mrb[37].mxu0  ;;  %4986 = vmatprep.subr.bf16.mxu0 %v5619_v1  ;;  %vm6898_vm4 = vcmp.le.s32.totalorder %v2199_v22, 14  ;;  %v2167_v22 = vadd.s32 128, %v6475_v31 }
 0x1cd   :  { %v6853_v29 = vadd.f32 %v4595_v17, %v4594_v57  ;;  %5311 = vmatpush3.bf16.msra.mxu1 %v6758_v49  ;;  %v4597_v6 = vpop.f32.mrb[38].mxu0  ;;  %v2163_v49 = vadd.s32 128, %v6421_v61  ;;  %vm6919_vm6 = vmpackc.low %vm6898_vm4, %vm5656_vm2 }
 0x1ce   :  { %v4598_v37 = vpop.f32.mrb[39].mxu0  ;;  %5304 = vmatprep.subr.bf16.mxu1 %v6763_v5 }
 0x1cf   :  { %v6876_v15 = vadd.f32 %v4598_v37, %v4597_v6  ;;  %4987 = vmatpush3.bf16.msra.mxu0 %v5620_v25  ;;  %v5623_v37 = vld [vmem:[%s7359_s3 + $0x210] sm:$0xff]  }
 0x1d0   :  { %5245 = vmatmul.mubr.msk.bf16.gmra.mrb[88].mxu1 %vm6859_vm0, %v6867_v10 }
 0x1d1   :  { %5312 = vmatpush3.bf16.msra.mxu1 %v6782_v34  ;;  %5248 = vmatprep.mubr.msk.bf16.mxu1 %vm6872_vm1, %v6878_v19 }
 0x1d2   :  { %4364 = vmatmul.mubr.msk.bf16.gmra.mrb[112].mxu0 %vm6808_vm13, %v6765_v14  ;;  %5305 = vmatprep.subr.bf16.mxu1 %v6790_v54 }
 0x1d3   :  { %4367 = vmatprep.mubr.msk.bf16.mxu0 %vm6859_vm0, %v6817_v56  ;;  %v4600_v7 = vpop.f32.mrb[40].mxu0  ;;  %v4612_v28 = vpop.f32.mrb[0].mxu1 }
 0x1d4   :  { %v4601_v5 = vpop.f32.mrb[41].mxu0  ;;  %v4613_v14 = vpop.f32.mrb[1].mxu1 }
 0x1d5   :  { %v6903_v34 = vadd.f32 %v4601_v5, %v4600_v7  ;;  %v6905_v35 = vadd.f32 %v4613_v14, %v4612_v28  ;;  %5313 = vmatpush3.bf16.msra.mxu1 %v6803_v41  ;;  %v4603_v54 = vpop.f32.mrb[42].mxu0  ;;  %v4615_v32 = vpop.f32.mrb[2].mxu1  ;;  %v2213_v41 = vand.u32 15, %v2163_v49  ;;  %v3316_v7 = vld [vmem:[#allocation2 + $0xc9] sm:$0xff]  ;;  %v3317_v28 = vld [vmem:[#allocation2 + $0xd1] sm:$0xff]  ;;  %v2241_v49 = vand.u32 15, %v2167_v22 }
 0x1d6   :  { %v4604_v61 = vpop.f32.mrb[43].mxu0  ;;  %v4616_v53 = vpop.f32.mrb[3].mxu1  ;;  %5306 = vmatprep.subr.bf16.mxu1 %v6815_v45  ;;  %v6998_v8 = vpack.c.bf16 %v3317_v28, %v3316_v7  ;;  %v5625_v14 = vld [vmem:[%s7359_s3 + $0x220] sm:$0xff]   ;;  %v2171_v45 = vadd.s32 128, %v6538_v50 }
 0x1d7   :  { %v6923_v18 = vadd.f32 %v4604_v61, %v4603_v54  ;;  %v6925_v55 = vadd.f32 %v4616_v53, %v4615_v32  ;;  %vm6944_vm7 = vcmp.le.s32.totalorder %v2213_v41, 14  ;;  %vm3337_vm13 = vcmp.le.s32.totalorder %v2241_v49, 14  ;;  %v3318_v32 = vld [vmem:[#allocation2 + $0xd9] sm:$0xff]  ;;  %v3319_v61 = vld [vmem:[#allocation2 + $0xe1] sm:$0xff] }
 0x1d8   :  { %5249 = vmatmul.mubr.msk.bf16.gmra.mrb[92].mxu1 %vm6911_vm5, %v4405_v48  ;;  %vm6957_vm8 = vmpackc.low %vm6944_vm7, %vm5656_vm2  ;;  %v7033_v38 = vpack.c.bf16 %v3319_v61, %v3318_v32 }
 0x1d9   :  { %5314 = vmatpush3.bf16.msra.mxu1 %v6832_v58  ;;  %4487 = vmatprep.mubr.msk.bf16.mxu1 %vm6919_vm6, %v6927_v40  ;;  %vm7024_vm14 = vmpackc.low %vm3337_vm13, %vm5656_vm2 }
 0x1da   :  { %4370 = vmatmul.mubr.msk.bf16.gmra.mrb[116].mxu0 %vm6859_vm0, %v6805_v42  ;;  %5307 = vmatprep.subr.bf16.mxu1 %v5619_v1  ;;  %v3314_v42 = vld [vmem:[#allocation2 + $0xb9] sm:$0xff] }
 0x1db   :  { %4373 = vmatprep.mubr.msk.bf16.mxu0 %vm6872_vm1, %v6867_v10  ;;  %v4606_v43 = vpop.f32.mrb[44].mxu0  ;;  %v4618_v46 = vpop.f32.mrb[4].mxu1  ;;  %v6968_v9 = vpack.c.bf16 %v3315_v24, %v3314_v42 }
 0x1dc   :  { %v4607_v58 = vpop.f32.mrb[45].mxu0  ;;  %v4619_v52 = vpop.f32.mrb[5].mxu1 }
 0x1dd   :  { %v6949_v1 = vadd.f32 %v4607_v58, %v4606_v43  ;;  %v6951_v57 = vadd.f32 %v4619_v52, %v4618_v46  ;;  %5315 = vmatpush3.bf16.msra.mxu1 %v5620_v25  ;;  %v4609_v59 = vpop.f32.mrb[46].mxu0  ;;  %v4621_v51 = vpop.f32.mrb[6].mxu1  ;;  %v2185_v25 = vand.u32 15, %v2159_v60  ;;  %v5627_v43 = vld [vmem:[%s7359_s3 + $0x230] sm:$0xff]  }
 0x1de   :  { %v4610_v0 = vpop.f32.mrb[47].mxu0  ;;  %v4622_v17 = vpop.f32.mrb[7].mxu1  ;;  %5252 = vmatprep.subr.bf16.mxu1 %v5621_v62  ;;  %v3320_v58 = vld [vmem:[#allocation2 + $0xe9] sm:$0xff]  ;;  %v3321_v52 = vld [vmem:[#allocation2 + $0xf1] sm:$0xff] }
 0x1df   :  { %v6964_v3 = vadd.f32 %v4610_v0, %v4609_v59  ;;  %v6966_v6 = vadd.f32 %v4622_v17, %v4621_v51  ;;  %vm3329_vm10 = vcmp.le.s32.totalorder %v2185_v25, 14  ;;  %v7059_v0 = vpack.c.bf16 %v3321_v52, %v3320_v58 }
 0x1e0   :  { %4490 = vmatmul.mubr.msk.bf16.vlgmr.msra.gmra.mrb[96].mxu1 %vm6919_vm6, %v6674_v44  ;;  %vm7004_vm12 = vmpackc.low %vm3329_vm10, %vm5656_vm2  ;;  %v2269_v17 = vand.u32 15, %v2171_v45 }
 0x1e1   :  { %5253 = vmatpush3.bf16.msra.mxu1 %v5621_v62  ;;  %4493 = vmatprep.mubr.msk.bf16.mxu1 %vm6957_vm8, %v6968_v9  ;;  %v2255_v62 = vand.u32 15, %v2169_v16  ;;  %v3325_v16 = vld [vmem:[#allocation2 + $0x111] sm:$0xff] }
 0x1e2   :  { %4376 = vmatmul.mubr.msk.bf16.gmra.mrb[120].mxu0 %vm6872_vm1, %v6817_v56  ;;  %5254 = vmatprep.subr.bf16.mxu1 %v5622_v30  ;;  %vm3341_vm1 = vcmp.le.s32.totalorder %v2269_v17, 14 }
 0x1e3   :  { %4379 = vmatprep.mubr.msk.bf16.mxu0 %vm6911_vm5, %v6878_v19  ;;  %v4624_v13 = vpop.f32.mrb[8].mxu1  ;;  %v5624_v19 = vld [vmem:[%s7359_s3 + $0x218] sm:$0xff]   ;;  %vm3339_vm15 = vcmp.le.s32.totalorder %v2255_v62, 14  ;;  %vm7072_vm3 = vmpackc.low %vm3341_vm1, %vm5656_vm2 }
 0x1e4   :  { %v4625_v21 = vpop.f32.mrb[9].mxu1  ;;  %vm7049_vm0 = vmpackc.low %vm3339_vm15, %vm5656_vm2 }
 0x1e5   :  { %v6986_v33 = vadd.f32 %v4625_v21, %v4624_v13  ;;  %v4627_v12 = vpop.f32.mrb[10].mxu1  ;;  %5255 = vmatpush3.bf16.msra.mxu1 %v5622_v30  ;;  %v3323_v13 = vld [vmem:[#allocation2 + $0x101] sm:$0xff] }
 0x1e6   :  { %v4628_v56 = vpop.f32.mrb[11].mxu1  ;;  %5256 = vmatprep.subr.bf16.mxu1 %v5623_v37 }
 0x1e7   :  { %v6996_v31 = vadd.f32 %v4628_v56, %v4627_v12 }
 0x1e8   :  { %4496 = vmatmul.mubr.msk.bf16.gmra.mrb[100].mxu1 %vm6957_vm8, %v6927_v40 }
 0x1e9   :  { %4499 = vmatprep.mubr.msk.bf16.mxu1 %vm6989_vm11, %v6998_v8  ;;  %5257 = vmatpush3.bf16.msra.mxu1 %v5623_v37  ;;  %v3322_v37 = vld [vmem:[#allocation2 + $0xf9] sm:$0xff] }
 0x1ea   :  { %4382 = vmatmul.mubr.msk.bf16.gmra.mrb[124].mxu0 %vm6911_vm5, %v6867_v10  ;;  %5258 = vmatprep.subr.bf16.mxu1 %v5624_v19  ;;  %v4516_v56 = vpack.c.bf16 %v3323_v13, %v3322_v37 }
 0x1eb   :  { %4481 = vmatprep.mubr.msk.bf16.mxu0 %vm7004_vm12, %v6674_v44  ;;  %v4630_v36 = vpop.f32.mrb[12].mxu1  ;;  %v5626_v44 = vld [vmem:[%s7359_s3 + $0x228] sm:$0xff]  }
 0x1ec   :  { %v4631_v54 = vpop.f32.mrb[13].mxu1 }
 0x1ed   :  { %v7021_v53 = vadd.f32 %v4631_v54, %v4630_v36  ;;  %v4633_v27 = vpop.f32.mrb[14].mxu1  ;;  %5259 = vmatpush3.bf16.msra.mxu1 %v5624_v19  ;;  %v3324_v36 = vld [vmem:[#allocation2 + $0x109] sm:$0xff] }
 0x1ee   :  { %v4634_v10 = vpop.f32.mrb[15].mxu1  ;;  %5260 = vmatprep.subr.bf16.mxu1 %v5625_v14 }
 0x1ef   :  { %v7031_v41 = vadd.f32 %v4634_v10, %v4633_v27  ;;  %v4522_v10 = vpack.c.bf16 %v3325_v16, %v3324_v36 }
 0x1f0   :  { %4502 = vmatmul.mubr.msk.bf16.gmra.mrb[104].mxu1 %vm6989_vm11, %v6968_v9 }
 0x1f1   :  { %4505 = vmatprep.mubr.msk.bf16.mxu1 %vm7024_vm14, %v7033_v38  ;;  %5261 = vmatpush3.bf16.msra.mxu1 %v5625_v14 }
 0x1f2   :  { %4484 = vmatmul.mubr.msk.bf16.vlgmr.msra.gmra.mrb[128].mxu0 %vm7004_vm12, %v6587_v26  ;;  %5262 = vmatprep.subr.bf16.mxu1 %v5626_v44  ;;  %v5628_v26 = vld [vmem:[%s7359_s3 + $0x238] sm:$0xff]  }
 0x1f3   :  { %v4668_v46 = vpop.f32.mrb[16].mxu1 }
 0x1f4   :  { %v4669_v47 = vpop.f32.mrb[17].mxu1 }
 0x1f5   :  { %v4670_v42 = vadd.f32 %v4669_v47, %v4668_v46  ;;  %v4671_v24 = vpop.f32.mrb[18].mxu1  ;;  %5263 = vmatpush3.bf16.msra.mxu1 %v5626_v44 }
 0x1f6   :  { %v4672_v59 = vpop.f32.mrb[19].mxu1  ;;  %5264 = vmatprep.subr.bf16.mxu1 %v5627_v43 }
 0x1f7   :  { %v7057_v60 = vadd.f32 %v4670_v42, %v6798_v39  ;;  %v4673_v50 = vadd.f32 %v4672_v59, %v4671_v24  ;;  %v2173_v39 = vadd.s32 128, %v6560_v2 }
 0x1f8   :  { %4508 = vmatmul.mubr.msk.bf16.gmra.mrb[108].mxu1 %vm7024_vm14, %v6998_v8 }
 0x1f9   :  { %v7065_v30 = vadd.f32 %v4673_v50, %v6819_v63  ;;  %4511 = vmatprep.mubr.msk.bf16.mxu1 %vm7049_vm0, %v7059_v0  ;;  %5265 = vmatpush3.bf16.msra.mxu1 %v5627_v43  ;;  %v2283_v19 = vand.u32 15, %v2173_v39 }
 0x1fa   :  { %5266 = vmatprep.subr.bf16.mxu1 %v5628_v26 }
 0x1fb   :  { %v4674_v20 = vpop.f32.mrb[20].mxu1  ;;  %vm3343_vm4 = vcmp.le.s32.totalorder %v2283_v19, 14 }
 0x1fc   :  { %v4675_v25 = vpop.f32.mrb[21].mxu1  ;;  %vm7088_vm5 = vmpackc.low %vm3343_vm4, %vm5656_vm2 }
 0x1fd   :  { %v4676_v22 = vadd.f32 %v4675_v25, %v4674_v20  ;;  %v4677_v21 = vpop.f32.mrb[22].mxu1  ;;  %5267 = vmatpush3.bf16.msra.mxu1 %v5628_v26 }
 0x1fe   :  { %v4678_v7 = vpop.f32.mrb[23].mxu1 }
 0x1ff   :  { %v7077_v28 = vadd.f32 %v4676_v22, %v6853_v29  ;;  %v4679_v12 = vadd.f32 %v4678_v7, %v4677_v21 }
 0x200   :  { %4514 = vmatmul.mubr.msk.bf16.gmra.mrb[112].mxu1 %vm7049_vm0, %v7033_v38 }
 0x201   :  { %v7083_v2 = vadd.f32 %v4679_v12, %v6876_v15  ;;  %4517 = vmatprep.mubr.msk.bf16.mxu1 %vm7072_vm3, %v4516_v56  ;;  %v3327_v12 = vld [vmem:[#allocation2 + $0x121] sm:$0xff] }
 0x203   :  { %v4680_v49 = vpop.f32.mrb[24].mxu1 }
 0x204   :  { %v4681_v14 = vpop.f32.mrb[25].mxu1 }
 0x205   :  { %v4682_v29 = vadd.f32 %v4681_v14, %v4680_v49  ;;  %v4683_v54 = vpop.f32.mrb[26].mxu1 }
 0x206   :  { %v4684_v32 = vpop.f32.mrb[27].mxu1 }
 0x207   :  { %v7093_v27 = vadd.f32 %v4682_v29, %v6903_v34  ;;  %v4685_v15 = vadd.f32 %v4684_v32, %v4683_v54 }
 0x208   :  { %4520 = vmatmul.mubr.msk.bf16.gmra.mrb[116].mxu1 %vm7072_vm3, %v7059_v0 }
 0x209   :  { %v7099_v44 = vadd.f32 %v4685_v15, %v6923_v18  ;;  %4523 = vmatprep.mubr.msk.bf16.mxu1 %vm7088_vm5, %v4522_v10 }
 0x20b   :  { %v4686_v62 = vpop.f32.mrb[28].mxu1 }
 0x20c   :  { %v4687_v43 = vpop.f32.mrb[29].mxu1 }
 0x20d   :  { %v4688_v46 = vadd.f32 %v4687_v43, %v4686_v62  ;;  %v4689_v45 = vpop.f32.mrb[30].mxu1 }
 0x20e   :  { %v4690_v47 = vpop.f32.mrb[31].mxu1 }
 0x20f   :  { %v7104_v34 = vadd.f32 %v4688_v46, %v6949_v1  ;;  %v4691_v58 = vadd.f32 %v4690_v47, %v4689_v45 }
 0x210   :  { %4526 = vmatmul.mubr.msk.bf16.gmra.mrb[120].mxu1 %vm7088_vm5, %v4516_v56 }
 0x211   :  { %v7109_v52 = vadd.f32 %v4691_v58, %v6964_v3  ;;  %5268 = vmatprep.mubr.msk.bf16.mxu1 %vm7004_vm12, %v6927_v40 }
 0x213   :  { %v4692_v18 = vpop.f32.mrb[32].mxu1 }
 0x214   :  { %v4693_v42 = vpop.f32.mrb[33].mxu1 }
 0x215   :  { %v4694_v24 = vadd.f32 %v4693_v42, %v4692_v18  ;;  %v4695_v59 = vpop.f32.mrb[34].mxu1 }
 0x216   :  { %v4696_v26 = vpop.f32.mrb[35].mxu1 }
 0x217   :  { %v7115_v50 = vadd.f32 %v4694_v24, %v6905_v35  ;;  %v4697_v1 = vadd.f32 %v4696_v26, %v4695_v59 }
 0x218   :  { %5269 = vmatmul.mubr.msk.bf16.vlgmr.msra.gmra.mrb[80].mxu1 %vm6919_vm6, %v6968_v9 }
 0x219   :  { %v7121_v3 = vadd.f32 %v4697_v1, %v6925_v55  ;;  %5272 = vmatprep.mubr.msk.bf16.mxu1 %vm6957_vm8, %v6998_v8 }
 0x21b   :  { %v4698_v40 = vpop.f32.mrb[36].mxu1 }
 0x21c   :  { %v4699_v5 = vpop.f32.mrb[37].mxu1 }
 0x21d   :  { %v4700_v17 = vadd.f32 %v4699_v5, %v4698_v40  ;;  %v4701_v20 = vpop.f32.mrb[38].mxu1 }
 0x21e   :  { %v4702_v39 = vpop.f32.mrb[39].mxu1 }
 0x21f   :  { %v7127_v35 = vadd.f32 %v4700_v17, %v6951_v57  ;;  %v4703_v25 = vadd.f32 %v4702_v39, %v4701_v20 }
 0x220   :  { %5273 = vmatmul.mubr.msk.bf16.gmra.mrb[84].mxu1 %vm6989_vm11, %v7033_v38 }
 0x221   :  { %v7133_v23 = vadd.f32 %v4703_v25, %v6966_v6  ;;  %5276 = vmatprep.mubr.msk.bf16.mxu1 %vm7024_vm14, %v7059_v0  ;;  %v3326_v0 = vld [vmem:[#allocation2 + $0x119] sm:$0xff] }
 0x222   :  { %v4549_v36 = vpack.c.bf16 %v3327_v12, %v3326_v0 }
 0x223   :  { %v4704_v55 = vpop.f32.mrb[40].mxu1 }
 0x224   :  { %v4705_v11 = vpop.f32.mrb[41].mxu1 }
 0x225   :  { %v4748_v9 = vpop.f32.mrb[64].mxu0  ;;  %v4706_v8 = vadd.f32 %v4705_v11, %v4704_v55  ;;  %v4707_v37 = vpop.f32.mrb[42].mxu1 }
 0x226   :  { %v4749_v13 = vpop.f32.mrb[65].mxu0  ;;  %v4708_v57 = vpop.f32.mrb[43].mxu1 }
 0x227   :  { %v7139_v22 = vadd.f32 %v4706_v8, %v6986_v33  ;;  %v4750_v21 = vadd.f32 %v4749_v13, %v4748_v9  ;;  %v4751_v4 = vpop.f32.mrb[66].mxu0  ;;  %v4709_v38 = vadd.f32 %v4708_v57, %v4707_v37 }
 0x228   :  { %v4752_v7 = vpop.f32.mrb[67].mxu0  ;;  %5277 = vmatmul.mubr.msk.bf16.gmra.mrb[88].mxu1 %vm7049_vm0, %v4516_v56 }
 0x229   :  { %v7144_v6 = vadd.f32 %v4709_v38, %v6996_v31  ;;  %v4753_v48 = vadd.f32 %v4752_v7, %v4751_v4  ;;  %5280 = vmatprep.mubr.msk.bf16.mxu1 %vm7072_vm3, %v4522_v10  ;;  %v7149_v19 = vadd.f32 %v7057_v60, %v4750_v21 }
 0x22b   :  { %v4710_v33 = vpop.f32.mrb[44].mxu1  ;;  %v7152_v49 = vadd.f32 %v7065_v30, %v4753_v48 }
 0x22c   :  { %v4711_v14 = vpop.f32.mrb[45].mxu1 }
 0x22d   :  { %v4754_v51 = vpop.f32.mrb[68].mxu0  ;;  %v4712_v56 = vadd.f32 %v4711_v14, %v4710_v33  ;;  %v4713_v16 = vpop.f32.mrb[46].mxu1 }
 0x22e   :  { %v4755_v31 = vpop.f32.mrb[69].mxu0  ;;  %v4714_v29 = vpop.f32.mrb[47].mxu1 }
 0x22f   :  { %v7155_v54 = vadd.f32 %v4712_v56, %v7021_v53  ;;  %v4756_v63 = vadd.f32 %v4755_v31, %v4754_v51  ;;  %v4757_v32 = vpop.f32.mrb[70].mxu0  ;;  %v4715_v15 = vadd.f32 %v4714_v29, %v4713_v16 }
 0x230   :  { %v4758_v10 = vpop.f32.mrb[71].mxu0  ;;  %5281 = vmatmul.mubr.msk.bf16.gmra.mrb[92].mxu1 %vm7088_vm5, %v4549_v36 }
 0x231   :  { %v7160_v60 = vadd.f32 %v4715_v15, %v7031_v41  ;;  %v4759_v30 = vadd.f32 %v4758_v10, %v4757_v32  ;;  %v7163_v62 = vadd.f32 %v7077_v28, %v4756_v63 }
 0x233   :  { %v4828_v43 = vpop.f32.mrb[48].mxu1  ;;  %v7166_v46 = vadd.f32 %v7083_v2, %v4759_v30 }
 0x234   :  { %v4829_v53 = vpop.f32.mrb[49].mxu1 }
 0x235   :  { %v4760_v45 = vpop.f32.mrb[72].mxu0  ;;  %v7168_v47 = vadd.f32 %v4829_v53, %v4828_v43  ;;  %v4831_v58 = vpop.f32.mrb[50].mxu1 }
 0x236   :  { %v4761_v18 = vpop.f32.mrb[73].mxu0  ;;  %v4832_v42 = vpop.f32.mrb[51].mxu1 }
 0x237   :  { %v4762_v61 = vadd.f32 %v4761_v18, %v4760_v45  ;;  %v4763_v24 = vpop.f32.mrb[74].mxu0  ;;  %v7170_v59 = vadd.f32 %v4832_v42, %v4831_v58 }
 0x238   :  { %v4764_v41 = vpop.f32.mrb[75].mxu0 }
 0x239   :  { %v4765_v26 = vadd.f32 %v4764_v41, %v4763_v24  ;;  %v7173_v28 = vadd.f32 %v7093_v27, %v4762_v61 }
 0x23b   :  { %v4834_v1 = vpop.f32.mrb[52].mxu1  ;;  %v7176_v2 = vadd.f32 %v7099_v44, %v4765_v26 }
 0x23c   :  { %v4835_v40 = vpop.f32.mrb[53].mxu1 }
 0x23d   :  { %v4766_v5 = vpop.f32.mrb[76].mxu0  ;;  %v7178_v17 = vadd.f32 %v4835_v40, %v4834_v1  ;;  %v4837_v20 = vpop.f32.mrb[54].mxu1 }
 0x23e   :  { %v4767_v39 = vpop.f32.mrb[77].mxu0  ;;  %v4838_v25 = vpop.f32.mrb[55].mxu1 }
 0x23f   :  { %v4768_v55 = vadd.f32 %v4767_v39, %v4766_v5  ;;  %v4769_v11 = vpop.f32.mrb[78].mxu0  ;;  %v7180_v9 = vadd.f32 %v4838_v25, %v4837_v20 }
 0x240   :  { %v4770_v8 = vpop.f32.mrb[79].mxu0 }
 0x241   :  { %v4771_v37 = vadd.f32 %v4770_v8, %v4769_v11  ;;  %v7183_v27 = vadd.f32 %v7104_v34, %v4768_v55 }
 0x243   :  { %v4840_v13 = vpop.f32.mrb[56].mxu1  ;;  %v7186_v44 = vadd.f32 %v7109_v52, %v4771_v37 }
 0x244   :  { %v4841_v57 = vpop.f32.mrb[57].mxu1 }
 0x245   :  { %v4772_v21 = vpop.f32.mrb[80].mxu0  ;;  %v7188_v4 = vadd.f32 %v4841_v57, %v4840_v13  ;;  %v4843_v38 = vpop.f32.mrb[58].mxu1 }
 0x246   :  { %v4773_v7 = vpop.f32.mrb[81].mxu0  ;;  %v4844_v48 = vpop.f32.mrb[59].mxu1 }
 0x247   :  { %v4774_v0 = vadd.f32 %v4773_v7, %v4772_v21  ;;  %v4775_v12 = vpop.f32.mrb[82].mxu0  ;;  %v7190_v33 = vadd.f32 %v4844_v48, %v4843_v38 }
 0x248   :  { %v4776_v14 = vpop.f32.mrb[83].mxu0 }
 0x249   :  { %v4777_v36 = vadd.f32 %v4776_v14, %v4775_v12  ;;  %v7193_v34 = vadd.f32 %v7115_v50, %v4774_v0 }
 0x24b   :  { %v4846_v51 = vpop.f32.mrb[60].mxu1  ;;  %v7196_v52 = vadd.f32 %v7121_v3, %v4777_v36  ;;  %v7231_v36 = vld [vmem:[%s7360_s4] ss:$0 sm:$0xff]  ;;  %s5657_s4 = smov [#allocation3]  }
 0x24c   :  { %v4847_v56 = vpop.f32.mrb[61].mxu1  ;;  %s3894_s1 = sshll.u32 %s5657_s4, 4  ;;  %s3895_s1 = int_to_ptr.vmem [resolvable:$true] %s3894_s1 }
 0x24d   :  { %v4778_v16 = vpop.f32.mrb[84].mxu0  ;;  %v7198_v31 = vadd.f32 %v4847_v56, %v4846_v51  ;;  %v4849_v29 = vpop.f32.mrb[62].mxu1  ;;  %s5630_s17 = scalar_lea.vmem %s3895_s1, 4096  ;;  %p5635_p1 = scmp.lt.s32.totalorder %s3895_s1, %s3895_s1 }
 0x24e   :  { %v4779_v63 = vpop.f32.mrb[85].mxu0  ;;  %v4850_v32 = vpop.f32.mrb[63].mxu1  ;;  %p5631_p0 = scmp.ne.s32.totalorder %s3895_s1, %s5630_s17  ;;  %p5636_p2 = scmp.lt.s32.totalorder %s5630_s17, %s5630_s17 }
 0x24f   :  { %v4780_v15 = vadd.f32 %v4779_v63, %v4778_v16  ;;  %v4781_v10 = vpop.f32.mrb[86].mxu0  ;;  %v7200_v30 = vadd.f32 %v4850_v32, %v4849_v29 }
 0x250   :  { %v4782_v43 = vpop.f32.mrb[87].mxu0  ;;  %p5637_p3 = por %p5636_p2, %p5635_p1 }
 0x251   :  { %v4783_v53 = vadd.f32 %v4782_v43, %v4781_v10  ;;  %v7203_v50 = vadd.f32 %v7127_v35, %v4780_v15 }
 0x252   :  { %p5638_p4 = pnand %p5637_p3, %p5631_p0 }
 0x253   :  { %v4852_v45 = vpop.f32.mrb[64].mxu1  ;;  %v7206_v3 = vadd.f32 %v7133_v23, %v4783_v53 }
 0x254   :  { %v4853_v58 = vpop.f32.mrb[65].mxu1 }
 0x255   :  { %v4784_v18 = vpop.f32.mrb[88].mxu0  ;;  %v7208_v42 = vadd.f32 %v4853_v58, %v4852_v45  ;;  %v4855_v61 = vpop.f32.mrb[66].mxu1 }
 0x256   :  { %v4785_v24 = vpop.f32.mrb[89].mxu0  ;;  %v4856_v41 = vpop.f32.mrb[67].mxu1 }
 0x257   :  { %v4786_v26 = vadd.f32 %v4785_v24, %v4784_v18  ;;  %v4787_v1 = vpop.f32.mrb[90].mxu0  ;;  %v7210_v40 = vadd.f32 %v4856_v41, %v4855_v61 }
 0x258   :  { %v4788_v5 = vpop.f32.mrb[91].mxu0 }
 0x259   :  { %v4789_v20 = vadd.f32 %v4788_v5, %v4787_v1  ;;  %v7213_v35 = vadd.f32 %v7139_v22, %v4786_v26 }
 0x25b   :  { %v4858_v39 = vpop.f32.mrb[68].mxu1  ;;  %v7216_v23 = vadd.f32 %v7144_v6, %v4789_v20 }
 0x25c   :  { %v4859_v25 = vpop.f32.mrb[69].mxu1 }
 0x25d   :  { %v4790_v55 = vpop.f32.mrb[92].mxu0  ;;  %v7218_v11 = vadd.f32 %v4859_v25, %v4858_v39  ;;  %v4861_v8 = vpop.f32.mrb[70].mxu1 }
 0x25e   :  { %v4791_v37 = vpop.f32.mrb[93].mxu0  ;;  %v4862_v13 = vpop.f32.mrb[71].mxu1 }
 0x25f   :  { %v4792_v57 = vadd.f32 %v4791_v37, %v4790_v55  ;;  %v4793_v21 = vpop.f32.mrb[94].mxu0  ;;  %v7220_v38 = vadd.f32 %v4862_v13, %v4861_v8 }
 0x260   :  { %v4794_v7 = vpop.f32.mrb[95].mxu0 }
 0x261   :  { %v4795_v48 = vadd.f32 %v4794_v7, %v4793_v21  ;;  %v7223_v22 = vadd.f32 %v7155_v54, %v4792_v57 }
 0x263   :  { %v4864_v0 = vpop.f32.mrb[72].mxu1  ;;  %v7226_v6 = vadd.f32 %v7160_v60, %v4795_v48 }
 0x264   :  { %v4865_v12 = vpop.f32.mrb[73].mxu1 }
 0x265   :  { %v5174_v14 = vpop.f32.mrb[48].mxu0  ;;  %v7233_v51 = vadd.f32 %v4865_v12, %v4864_v0  ;;  %v4867_v56 = vpop.f32.mrb[74].mxu1 }
 0x266   :  { %v5318_v16 = vadd.f32 %v7163_v62, %v5174_v14  ;;  %v2040_v29 = vpop.f32.mrb[49].mxu0  ;;  %v4868_v63 = vpop.f32.mrb[75].mxu1 }
 0x267   :  { %v5321_v54 = vadd.f32 %v7149_v19, %v2040_v29  ;;  %v5175_v32 = vpop.f32.mrb[50].mxu0  ;;  %v7237_v15 = vadd.f32 %v4868_v63, %v4867_v56 }
 0x268   :  { %v2128_v60 = vadd.f32 %v5318_v16, %v7231_v36  ;;  %v5324_v10 = vadd.f32 %v7166_v46, %v5175_v32  ;;  %v2043_v43 = vpop.f32.mrb[51].mxu0 }
 0x269   :  { %v2126_v53 = vadd.f32 %v5321_v54, %v7231_v36  ;;  %v5327_v45 = vadd.f32 %v7152_v49, %v2043_v43 }
 0x26a   :  { %2144 = vst [vmem:[#allocation3 + $0x10] sm:$0xff] %v2128_v60  ;;  %v2129_v58 = vadd.f32 %v5324_v10, %v7231_v36 }
 0x26b   :  { %2142 = vst [vmem:[#allocation3] sm:$0xff] %v2126_v53  ;;  %v2127_v62 = vadd.f32 %v5327_v45, %v7231_v36  ;;  %v4870_v18 = vpop.f32.mrb[76].mxu1 }
 0x26c   :  { %2145 = vst [vmem:[#allocation3 + $0x18] sm:$0xff] %v2129_v58  ;;  %v4871_v19 = vpop.f32.mrb[77].mxu1 }
 0x26d   :  { %2143 = vst [vmem:[#allocation3 + $0x8] sm:$0xff] %v2127_v62  ;;  %v5178_v61 = vpop.f32.mrb[52].mxu0  ;;  %v7245_v24 = vadd.f32 %v4871_v19, %v4870_v18  ;;  %v4873_v41 = vpop.f32.mrb[78].mxu1 }
 0x26e   :  { %v5330_v46 = vadd.f32 %v7183_v27, %v5178_v61  ;;  %v2056_v26 = vpop.f32.mrb[53].mxu0  ;;  %v4874_v1 = vpop.f32.mrb[79].mxu1 }
 0x26f   :  { %v5333_v49 = vadd.f32 %v7173_v28, %v2056_v26  ;;  %v5179_v5 = vpop.f32.mrb[54].mxu0  ;;  %v7249_v20 = vadd.f32 %v4874_v1, %v4873_v41 }
 0x270   :  { %v2132_v39 = vadd.f32 %v5330_v46, %v7231_v36  ;;  %v5336_v25 = vadd.f32 %v7186_v44, %v5179_v5  ;;  %v2059_v55 = vpop.f32.mrb[55].mxu0 }
 0x271   :  { %v2130_v8 = vadd.f32 %v5333_v49, %v7231_v36  ;;  %v5339_v37 = vadd.f32 %v7176_v2, %v2059_v55 }
 0x272   :  { %2148 = vst [vmem:[#allocation3 + $0x30] sm:$0xff] %v2132_v39  ;;  %v2133_v13 = vadd.f32 %v5336_v25, %v7231_v36 }
 0x273   :  { %2146 = vst [vmem:[#allocation3 + $0x20] sm:$0xff] %v2130_v8  ;;  %v2131_v27 = vadd.f32 %v5339_v37, %v7231_v36 }
 0x274   :  { %2149 = vst [vmem:[#allocation3 + $0x38] sm:$0xff] %v2133_v13 }
 0x275   :  { %2147 = vst [vmem:[#allocation3 + $0x28] sm:$0xff] %v2131_v27  ;;  %v5182_v28 = vpop.f32.mrb[56].mxu0 }
 0x276   :  { %v5342_v57 = vadd.f32 %v7203_v50, %v5182_v28  ;;  %v2072_v21 = vpop.f32.mrb[57].mxu0 }
 0x277   :  { %v5345_v7 = vadd.f32 %v7193_v34, %v2072_v21  ;;  %v5183_v44 = vpop.f32.mrb[58].mxu0 }
 0x278   :  { %v2136_v48 = vadd.f32 %v5342_v57, %v7231_v36  ;;  %v5348_v0 = vadd.f32 %v7206_v3, %v5183_v44  ;;  %v2075_v2 = vpop.f32.mrb[59].mxu0 }
 0x279   :  { %v2134_v12 = vadd.f32 %v5345_v7, %v7231_v36  ;;  %v5351_v14 = vadd.f32 %v7196_v52, %v2075_v2 }
 0x27a   :  { %2152 = vst [vmem:[#allocation3 + $0x50] sm:$0xff] %v2136_v48  ;;  %v2137_v56 = vadd.f32 %v5348_v0, %v7231_v36 }
 0x27b   :  { %2150 = vst [vmem:[#allocation3 + $0x40] sm:$0xff] %v2134_v12  ;;  %v2135_v16 = vadd.f32 %v5351_v14, %v7231_v36 }
 0x27c   :  { %2153 = vst [vmem:[#allocation3 + $0x58] sm:$0xff] %v2137_v56 }
 0x27d   :  { %2151 = vst [vmem:[#allocation3 + $0x48] sm:$0xff] %v2135_v16  ;;  %v5186_v50 = vpop.f32.mrb[60].mxu0 }
 0x27e   :  { %v5354_v34 = vadd.f32 %v7223_v22, %v5186_v50  ;;  %v2088_v29 = vpop.f32.mrb[61].mxu0 }
 0x27f   :  { %v5357_v63 = vadd.f32 %v7213_v35, %v2088_v29  ;;  %v5187_v3 = vpop.f32.mrb[62].mxu0 }
 0x280   :  { %v2140_v54 = vadd.f32 %v5354_v34, %v7231_v36  ;;  %v5360_v32 = vadd.f32 %v7226_v6, %v5187_v3  ;;  %v2091_v52 = vpop.f32.mrb[63].mxu0 }
 0x281   :  { %v2138_v60 = vadd.f32 %v5357_v63, %v7231_v36  ;;  %v5363_v10 = vadd.f32 %v7216_v23, %v2091_v52 }
 0x282   :  { %2156 = vst [vmem:[#allocation3 + $0x70] sm:$0xff] %v2140_v54  ;;  %v2141_v43 = vadd.f32 %v5360_v32, %v7231_v36 }
 0x283   :  { %2154 = vst [vmem:[#allocation3 + $0x60] sm:$0xff] %v2138_v60  ;;  %v2139_v53 = vadd.f32 %v5363_v10, %v7231_v36 }
 0x284   :  { %2157 = vst [vmem:[#allocation3 + $0x78] sm:$0xff] %v2141_v43 }
 0x285   :  { %2155 = vst [vmem:[#allocation3 + $0x68] sm:$0xff] %v2139_v53  ;;  %v4908_v22 = vpop.f32.mrb[96].mxu0 }
 0x286   :  { %v4909_v35 = vpop.f32.mrb[97].mxu0 }
 0x287   :  { %v4910_v45 = vadd.f32 %v4909_v35, %v4908_v22  ;;  %v4911_v58 = vpop.f32.mrb[98].mxu0 }
 0x288   :  { %v4912_v62 = vpop.f32.mrb[99].mxu0 }
 0x289   :  { %v7274_v6 = vadd.f32 %v4910_v45, %v7168_v47  ;;  %v4913_v18 = vadd.f32 %v4912_v62, %v4911_v58 }
 0x28b   :  { %v7277_v19 = vadd.f32 %v4913_v18, %v7170_v59 }
 0x28d   :  { %v4914_v23 = vpop.f32.mrb[100].mxu0 }
 0x28e   :  { %v4915_v61 = vpop.f32.mrb[101].mxu0 }
 0x28f   :  { %v4916_v41 = vadd.f32 %v4915_v61, %v4914_v23  ;;  %v4917_v46 = vpop.f32.mrb[102].mxu0 }
 0x290   :  { %v4918_v26 = vpop.f32.mrb[103].mxu0 }
 0x291   :  { %v5364_v1 = vadd.f32 %v4916_v41, %v7178_v17  ;;  %v4919_v49 = vadd.f32 %v4918_v26, %v4917_v46 }
 0x293   :  { %v5370_v5 = vadd.f32 %v4919_v49, %v7180_v9 }
 0x295   :  { %v4920_v39 = vpop.f32.mrb[104].mxu0 }
 0x296   :  { %v4921_v25 = vpop.f32.mrb[105].mxu0 }
 0x297   :  { %v4922_v55 = vadd.f32 %v4921_v25, %v4920_v39  ;;  %v4923_v8 = vpop.f32.mrb[106].mxu0 }
 0x298   :  { %v4924_v47 = vpop.f32.mrb[107].mxu0 }
 0x299   :  { %v5379_v37 = vadd.f32 %v4922_v55, %v7188_v4  ;;  %v4925_v13 = vadd.f32 %v4924_v47, %v4923_v8 }
 0x29b   :  { %v5385_v59 = vadd.f32 %v4925_v13, %v7190_v33 }
 0x29d   :  { %v4926_v27 = vpop.f32.mrb[108].mxu0 }
 0x29e   :  { %v4927_v28 = vpop.f32.mrb[109].mxu0 }
 0x29f   :  { %v4928_v57 = vadd.f32 %v4927_v28, %v4926_v27  ;;  %v4929_v21 = vpop.f32.mrb[110].mxu0 }
 0x2a0   :  { %v4930_v7 = vpop.f32.mrb[111].mxu0 }
 0x2a1   :  { %v5376_v17 = vadd.f32 %v4928_v57, %v7198_v31  ;;  %v4931_v44 = vadd.f32 %v4930_v7, %v4929_v21 }
 0x2a3   :  { %v7285_v9 = vadd.f32 %v4931_v44, %v7200_v30 }
 0x2a5   :  { %v4932_v48 = vpop.f32.mrb[112].mxu0 }
 0x2a6   :  { %v4933_v0 = vpop.f32.mrb[113].mxu0 }
 0x2a7   :  { %v4934_v2 = vadd.f32 %v4933_v0, %v4932_v48  ;;  %v4935_v12 = vpop.f32.mrb[114].mxu0 }
 0x2a8   :  { %v4936_v14 = vpop.f32.mrb[115].mxu0 }
 0x2a9   :  { %v7288_v4 = vadd.f32 %v4934_v2, %v7208_v42  ;;  %v4937_v33 = vadd.f32 %v4936_v14, %v4935_v12 }
 0x2ab   :  { %v7291_v56 = vadd.f32 %v4937_v33, %v7210_v40 }
 0x2ad   :  { %v4938_v16 = vpop.f32.mrb[116].mxu0 }
 0x2ae   :  { %v4939_v50 = vpop.f32.mrb[117].mxu0 }
 0x2af   :  { %v4940_v34 = vadd.f32 %v4939_v50, %v4938_v16  ;;  %v4941_v31 = vpop.f32.mrb[118].mxu0 }
 0x2b0   :  { %v4942_v29 = vpop.f32.mrb[119].mxu0 }
 0x2b1   :  { %v7294_v30 = vadd.f32 %v4940_v34, %v7218_v11  ;;  %v4943_v63 = vadd.f32 %v4942_v29, %v4941_v31 }
 0x2b3   :  { %v7297_v3 = vadd.f32 %v4943_v63, %v7220_v38  ;;  %v4994_v54 = vpop.f32.mrb[96].mxu1 }
 0x2b4   :  { %v4995_v32 = vpop.f32.mrb[97].mxu1 }
 0x2b5   :  { %v4944_v42 = vpop.f32.mrb[120].mxu0  ;;  %v4996_v52 = vadd.f32 %v4995_v32, %v4994_v54  ;;  %v4997_v60 = vpop.f32.mrb[98].mxu1 }
 0x2b6   :  { %v4945_v10 = vpop.f32.mrb[121].mxu0  ;;  %v4998_v40 = vpop.f32.mrb[99].mxu1 }
 0x2b7   :  { %v4946_v43 = vadd.f32 %v4945_v10, %v4944_v42  ;;  %v4947_v53 = vpop.f32.mrb[122].mxu0  ;;  %v4999_v22 = vadd.f32 %v4998_v40, %v4997_v60  ;;  %v7299_v35 = vadd.f32 %v5364_v1, %v4996_v52 }
 0x2b8   :  { %v4948_v45 = vpop.f32.mrb[123].mxu0 }
 0x2b9   :  { %v5403_v11 = vadd.f32 %v4946_v43, %v7233_v51  ;;  %v4949_v58 = vadd.f32 %v4948_v45, %v4947_v53  ;;  %v7302_v62 = vadd.f32 %v5370_v5, %v4999_v22 }
 0x2bb   :  { %v5409_v38 = vadd.f32 %v4949_v58, %v7237_v15  ;;  %v5000_v18 = vpop.f32.mrb[100].mxu1 }
 0x2bc   :  { %v5001_v23 = vpop.f32.mrb[101].mxu1 }
 0x2bd   :  { %v4950_v61 = vpop.f32.mrb[124].mxu0  ;;  %v5002_v41 = vadd.f32 %v5001_v23, %v5000_v18  ;;  %v5003_v46 = vpop.f32.mrb[102].mxu1 }
 0x2be   :  { %v4951_v26 = vpop.f32.mrb[125].mxu0  ;;  %v5004_v49 = vpop.f32.mrb[103].mxu1 }
 0x2bf   :  { %v4952_v39 = vadd.f32 %v4951_v26, %v4950_v61  ;;  %v4953_v25 = vpop.f32.mrb[126].mxu0  ;;  %v5005_v55 = vadd.f32 %v5004_v49, %v5003_v46  ;;  %v7305_v1 = vadd.f32 %v5379_v37, %v5002_v41 }
 0x2c0   :  { %v4954_v8 = vpop.f32.mrb[127].mxu0 }
 0x2c1   :  { %v5400_v51 = vadd.f32 %v4952_v39, %v7245_v24  ;;  %v4955_v47 = vadd.f32 %v4954_v8, %v4953_v25  ;;  %v7308_v5 = vadd.f32 %v5385_v59, %v5005_v55 }
 0x2c3   :  { %v5406_v15 = vadd.f32 %v4955_v47, %v7249_v20  ;;  %v5006_v13 = vpop.f32.mrb[104].mxu1 }
 0x2c4   :  { %v5007_v27 = vpop.f32.mrb[105].mxu1 }
 0x2c5   :  { %v4988_v28 = vpop.f32.mrb[128].mxu0  ;;  %v5008_v57 = vadd.f32 %v5007_v27, %v5006_v13  ;;  %v5009_v21 = vpop.f32.mrb[106].mxu1 }
 0x2c6   :  { %v4989_v7 = vpop.f32.mrb[129].mxu0  ;;  %v5010_v44 = vpop.f32.mrb[107].mxu1 }
 0x2c7   :  { %v4990_v48 = vadd.f32 %v4989_v7, %v4988_v28  ;;  %v4991_v0 = vpop.f32.mrb[130].mxu0  ;;  %v5011_v2 = vadd.f32 %v5010_v44, %v5009_v21  ;;  %v5377_v37 = vadd.f32 %v5376_v17, %v5008_v57 }
 0x2c8   :  { %v4992_v12 = vpop.f32.mrb[131].mxu0 }
 0x2c9   :  { %v4993_v14 = vadd.f32 %v4992_v12, %v4991_v0  ;;  %v5368_v24 = vadd.f32 %v7274_v6, %v4990_v48  ;;  %v5383_v59 = vadd.f32 %v7285_v9, %v5011_v2 }
 0x2cb   :  { %v5012_v33 = vpop.f32.mrb[108].mxu1  ;;  %v5374_v20 = vadd.f32 %v7277_v19, %v4993_v14 }
 0x2cc   :  { %v5013_v16 = vpop.f32.mrb[109].mxu1 }
 0x2cd   :  { %v5014_v50 = vadd.f32 %v5013_v16, %v5012_v33  ;;  %v5015_v34 = vpop.f32.mrb[110].mxu1 }
 0x2ce   :  { %v5016_v31 = vpop.f32.mrb[111].mxu1 }
 0x2cf   :  { %v5017_v29 = vadd.f32 %v5016_v31, %v5015_v34  ;;  %v5392_v63 = vadd.f32 %v7288_v4, %v5014_v50 }
 0x2d1   :  { %v7316_v54 = vadd.f32 %v7291_v56, %v5017_v29 }
 0x2d3   :  { %v5018_v17 = vpop.f32.mrb[112].mxu1 }
 0x2d4   :  { %v5019_v32 = vpop.f32.mrb[113].mxu1 }
 0x2d5   :  { %v5020_v42 = vadd.f32 %v5019_v32, %v5018_v17  ;;  %v5021_v52 = vpop.f32.mrb[114].mxu1 }
 0x2d6   :  { %v5022_v6 = vpop.f32.mrb[115].mxu1 }
 0x2d7   :  { %v5023_v60 = vadd.f32 %v5022_v6, %v5021_v52  ;;  %v5389_v9 = vadd.f32 %v7294_v30, %v5020_v42 }
 0x2d9   :  { %v5395_v19 = vadd.f32 %v7297_v3, %v5023_v60 }
 0x2db   :  { %v5024_v10 = vpop.f32.mrb[116].mxu1 }
 0x2dc   :  { %v5025_v40 = vpop.f32.mrb[117].mxu1 }
 0x2dd   :  { %v5026_v43 = vadd.f32 %v5025_v40, %v5024_v10  ;;  %v5027_v53 = vpop.f32.mrb[118].mxu1 }
 0x2de   :  { %v5028_v22 = vpop.f32.mrb[119].mxu1 }
 0x2df   :  { %v5029_v45 = vadd.f32 %v5028_v22, %v5027_v53  ;;  %v5404_v4 = vadd.f32 %v5403_v11, %v5026_v43 }
 0x2e1   :  { %v7320_v58 = vadd.f32 %v5409_v38, %v5029_v45 }
 0x2e3   :  { %v5030_v56 = vpop.f32.mrb[120].mxu1 }
 0x2e4   :  { %v5031_v18 = vpop.f32.mrb[121].mxu1 }
 0x2e5   :  { %v5032_v23 = vadd.f32 %v5031_v18, %v5030_v56  ;;  %v5033_v61 = vpop.f32.mrb[122].mxu1 }
 0x2e6   :  { %v5034_v41 = vpop.f32.mrb[123].mxu1 }
 0x2e7   :  { %v5035_v46 = vadd.f32 %v5034_v41, %v5033_v61  ;;  %v5401_v26 = vadd.f32 %v5400_v51, %v5032_v23 }
 0x2e9   :  { %v5407_v49 = vadd.f32 %v5406_v15, %v5035_v46 }
 0x2eb   :  { %v5270_v30 = vpop.f32.mrb[80].mxu1 }
 0x2ec   :  { %v5366_v3 = vadd.f32 %v7299_v35, %v5270_v30  ;;  %v3771_v39 = vpop.f32.mrb[81].mxu1 }
 0x2ed   :  { %v5369_v25 = vadd.f32 %v5368_v24, %v3771_v39  ;;  %v5271_v55 = vpop.f32.mrb[82].mxu1 }
 0x2ee   :  { %v3859_v8 = vadd.f32 %v5366_v3, %v7231_v36  ;;  %v5372_v11 = vadd.f32 %v7302_v62, %v5271_v55  ;;  %v3774_v38 = vpop.f32.mrb[83].mxu1 }
 0x2ef   :  { %v3857_v47 = vadd.f32 %v5369_v25, %v7231_v36  ;;  %v5375_v13 = vadd.f32 %v5374_v20, %v3774_v38 }
 0x2f0   :  { %3875 = vst [vmem:[#allocation3 + $0x90] sm:$0xff] %v3859_v8  ;;  %v3860_v27 = vadd.f32 %v5372_v11, %v7231_v36 }
 0x2f1   :  { %3873 = vst [vmem:[#allocation3 + $0x80] sm:$0xff] %v3857_v47  ;;  %v3858_v51 = vadd.f32 %v5375_v13, %v7231_v36 }
 0x2f2   :  { %3876 = vst [vmem:[#allocation3 + $0x98] sm:$0xff] %v3860_v27 }
 0x2f3   :  { %3874 = vst [vmem:[#allocation3 + $0x88] sm:$0xff] %v3858_v51  ;;  %v5274_v35 = vpop.f32.mrb[84].mxu1 }
 0x2f4   :  { %v5378_v15 = vadd.f32 %v5377_v37, %v5274_v35  ;;  %v3787_v28 = vpop.f32.mrb[85].mxu1 }
 0x2f5   :  { %v5381_v57 = vadd.f32 %v7305_v1, %v3787_v28  ;;  %v5275_v21 = vpop.f32.mrb[86].mxu1 }
 0x2f6   :  { %v3863_v62 = vadd.f32 %v5378_v15, %v7231_v36  ;;  %v5384_v7 = vadd.f32 %v5383_v59, %v5275_v21  ;;  %v3790_v44 = vpop.f32.mrb[87].mxu1 }
 0x2f7   :  { %v3861_v48 = vadd.f32 %v5381_v57, %v7231_v36  ;;  %v5387_v0 = vadd.f32 %v7308_v5, %v3790_v44 }
 0x2f8   :  { %3879 = vst [vmem:[#allocation3 + $0xb0] sm:$0xff] %v3863_v62  ;;  %v3864_v2 = vadd.f32 %v5384_v7, %v7231_v36 }
 0x2f9   :  { %3877 = vst [vmem:[#allocation3 + $0xa0] sm:$0xff] %v3861_v48  ;;  %v3862_v12 = vadd.f32 %v5387_v0, %v7231_v36 }
 0x2fa   :  { %3880 = vst [vmem:[#allocation3 + $0xb8] sm:$0xff] %v3864_v2 }
 0x2fb   :  { %3878 = vst [vmem:[#allocation3 + $0xa8] sm:$0xff] %v3862_v12  ;;  %v5278_v37 = vpop.f32.mrb[88].mxu1 }
 0x2fc   :  { %v5390_v14 = vadd.f32 %v5389_v9, %v5278_v37  ;;  %v3803_v1 = vpop.f32.mrb[89].mxu1 }
 0x2fd   :  { %v5393_v24 = vadd.f32 %v5392_v63, %v3803_v1  ;;  %v5279_v33 = vpop.f32.mrb[90].mxu1 }
 0x2fe   :  { %v3867_v59 = vadd.f32 %v5390_v14, %v7231_v36  ;;  %v5396_v20 = vadd.f32 %v5395_v19, %v5279_v33  ;;  %v3806_v16 = vpop.f32.mrb[91].mxu1 }
 0x2ff   :  { %v3865_v50 = vadd.f32 %v5393_v24, %v7231_v36  ;;  %v5399_v5 = vadd.f32 %v7316_v54, %v3806_v16 }
 0x300   :  { %3883 = vst [vmem:[#allocation3 + $0xd0] sm:$0xff] %v3867_v59  ;;  %v3868_v34 = vadd.f32 %v5396_v20, %v7231_v36 }
 0x301   :  { %3881 = vst [vmem:[#allocation3 + $0xc0] sm:$0xff] %v3865_v50  ;;  %v3866_v31 = vadd.f32 %v5399_v5, %v7231_v36 }
 0x302   :  { %3884 = vst [vmem:[#allocation3 + $0xd8] sm:$0xff] %v3868_v34 }
 0x303   :  { %3882 = vst [vmem:[#allocation3 + $0xc8] sm:$0xff] %v3866_v31  ;;  %v5282_v29 = vpop.f32.mrb[92].mxu1 }
 0x304   :  { %v5402_v17 = vadd.f32 %v5401_v26, %v5282_v29  ;;  %v3819_v63 = vpop.f32.mrb[93].mxu1 }
 0x305   :  { %v5405_v32 = vadd.f32 %v5404_v4, %v3819_v63  ;;  %v5283_v42 = vpop.f32.mrb[94].mxu1 }
 0x306   :  { %v3871_v52 = vadd.f32 %v5402_v17, %v7231_v36  ;;  %v5408_v6 = vadd.f32 %v5407_v49, %v5283_v42  ;;  %v3822_v60 = vpop.f32.mrb[95].mxu1 }
 0x307   :  { %v3869_v54 = vadd.f32 %v5405_v32, %v7231_v36  ;;  %v5411_v9 = vadd.f32 %v7320_v58, %v3822_v60 }
 0x308   :  { %3887 = vst [vmem:[#allocation3 + $0xf0] sm:$0xff] %v3871_v52  ;;  %v3872_v19 = vadd.f32 %v5408_v6, %v7231_v36 }
 0x309   :  { %3885 = vst [vmem:[#allocation3 + $0xe0] sm:$0xff] %v3869_v54  ;;  %v3870_v10 = vadd.f32 %v5411_v9, %v7231_v36 }
 0x30a   :  { %3888 = vst [vmem:[#allocation3 + $0xf8] sm:$0xff] %v3872_v19 }
 0x30b   :  { %3886 = vst [vmem:[#allocation3 + $0xe8] sm:$0xff] %v3870_v10 }
 0x30c   :  { %5641 = shalt.err (!%p5638_p4)
}
 0x30d   :  { %s5642_s20 = scalar_lea.hbm %s7362_s6, 4096 }
 0x30e   :  { %p5643_p5 = scmp.ne.s32.totalorder %s7362_s6, %s5642_s20  ;;  %p5646_p6 = scmp.lt.u32.totalorder %s5642_s20, %s7362_s6 }
 0x310   :  { %p5648_p7 = pnand %p5646_p6, %p5643_p5 }
 0x312   :  { %5651 = shalt.err (!%p5648_p7)
}
 0x313   :  { %s5658_s5 = smov 128   ;;  %s5659_s25 = smov 8  }
 0x314   :  { %3900 = dma.vmem_to_hbm [thread:$0]  %s3895_s1, 4096, %s7362_s6, [#allocation4], %s5658_s5, %s5658_s5, %s5659_s25  }
 0x315   :  { %5652 = dma.done.wait [#allocation4], 4096  }
 0x316   :  { %5653 = vsyncadd [#allocation4], 4294963200 }
 0x317   :  { %3904 = vsyncpa [#allocation4], 1 }

</bundles_post_ra>
